<compile_context>
chip_gen: v6e
topology: v6e:2x2x1
jax: 0.10.0
libtpu: 0.0.40
codegen_flags: <defaults>
</compile_context>

<pallas_src>
import math

import jax
import jax.numpy as jnp
from jax.experimental import pallas as pl
from jax.experimental.pallas import tpu as pltpu

LANES = 128          # Cout padding -> lane-dense output stores
MAX_TM = 1024        # rows of conv output per grid step (multiple of 8)
BN_EPS = 1e-5


def _round_up(x, m):
    return ((x + m - 1) // m) * m


# ----------------------------------------------------------------------------
# XLA glue: im2col (patch matrices are <= ~2 MB/batch), pooling, adaptive pool
# ----------------------------------------------------------------------------
def _im2col_3x3x3(x_ndhwc):
    """(N, D, H, W, C) -> (N, D*H*W, 27*C) patches for a 3x3x3 / pad-1 conv.
    Lane order is t*C + ci with t = kd*9 + kh*3 + kw (matches _fold_conv_bn)."""
    N, D, H, W, C = x_ndhwc.shape
    xp = jnp.pad(x_ndhwc, ((0, 0), (1, 1), (1, 1), (1, 1), (0, 0)))
    taps = [xp[:, dd:dd + D, dh:dh + H, dw:dw + W, :]
            for dd in range(3) for dh in range(3) for dw in range(3)]
    patches = jnp.concatenate(taps, axis=-1)              # (N, D, H, W, 27*C)
    return patches.reshape(N, D * H * W, 27 * C)


def _maxpool_ndhwc(x, k):
    """MaxPool3d(kernel=stride=k, floor mode) on NDHWC."""
    N, D, H, W, C = x.shape
    Do, Ho, Wo = D // k, H // k, W // k
    x = x[:, :Do * k, :Ho * k, :Wo * k, :]
    x = x.reshape(N, Do, k, Ho, k, Wo, k, C)
    return jnp.max(x, axis=(2, 4, 6))


def adaptive_avg_pool3d(x_ncdhw, out_size):
    """nn.AdaptiveAvgPool3d semantics (tiny fixed output -> plain JAX glue)."""
    N, C, D, H, W = x_ncdhw.shape
    od, oh, ow = out_size

    def win(i, insz, outsz):
        s = (i * insz) // outsz
        e = -(-((i + 1) * insz) // outsz)   # ceil
        return s, e

    d_stack = []
    for i in range(od):
        ds, de = win(i, D, od)
        h_stack = []
        for j in range(oh):
            hs, he = win(j, H, oh)
            w_stack = []
            for l in range(ow):
                ws, we = win(l, W, ow)
                w_stack.append(
                    jnp.mean(x_ncdhw[:, :, ds:de, hs:he, ws:we], axis=(2, 3, 4)))
            h_stack.append(jnp.stack(w_stack, axis=-1))
        d_stack.append(jnp.stack(h_stack, axis=-2))
    return jnp.stack(d_stack, axis=2)   # (N, C, od, oh, ow)


# ----------------------------------------------------------------------------
# Conv3d(3x3x3, pad=1) + BatchNorm3d(inference) + ReLU as one packed Pallas matmul
# ----------------------------------------------------------------------------
def _fold_conv_bn(w_pt, b, gamma, beta, rmean, rvar, eps=BN_EPS):
    """Fold Conv3d bias + BN into a (Kp, 128) bf16 RHS (taps packed along K) and
    a single (1, 128) f32 shift.  Kp = round_up(27*Cin, 128); Cout padded to 128."""
    cout, cin = w_pt.shape[0], w_pt.shape[1]
    scale = gamma / jnp.sqrt(rvar + eps)                              # (Cout,)
    # (Cout, Cin, kd, kh, kw) -> (kd, kh, kw, ci, co) -> (27*Cin, Cout)
    w = jnp.transpose(w_pt, (2, 3, 4, 1, 0)).reshape(27 * cin, cout)
    w = w * scale[None, :]
    kp = _round_up(27 * cin, LANES)
    w = jnp.pad(w, ((0, kp - 27 * cin), (0, LANES - cout))).astype(jnp.bfloat16)
    shift = (b - rmean) * scale + beta
    shift = jnp.pad(shift, (0, LANES - cout)).reshape(1, LANES).astype(jnp.float32)
    return w, shift


def _conv_bn_relu_kernel(p_ref, w_ref, s_ref, o_ref):
    # One MXU dot per (batch, row-tile) grid step: all 27 taps are packed in K.
    acc = jnp.dot(p_ref[...], w_ref[...], preferred_element_type=jnp.float32)
    o_ref[...] = jnp.maximum(acc + s_ref[...], 0.0).astype(o_ref.dtype)


def _packed_conv_call(patches, w, s):
    """patches: (N, M, Kp) bf16; w: (Kp, 128) bf16; s: (1, 128) f32
    -> (N, M, 128) bf16 (ReLU(patches @ w + s), Cout lane-padded)."""
    N, M, Kp = patches.shape
    tm = MAX_TM if M % MAX_TM == 0 else M            # 4096->1024, 64->64, 8->8
    grid = (N, M // tm)
    return pl.pallas_call(
        _conv_bn_relu_kernel,
        out_shape=jax.ShapeDtypeStruct((N, M, LANES), jnp.bfloat16),
        grid_spec=pltpu.PrefetchScalarGridSpec(
            num_scalar_prefetch=0,
            grid=grid,
            in_specs=[
                pl.BlockSpec((None, tm, Kp), lambda b, m: (b, m, 0)),   # patches
                pl.BlockSpec((Kp, LANES), lambda b, m: (0, 0)),         # packed weights
                pl.BlockSpec((1, LANES), lambda b, m: (0, 0)),          # f32 shift
            ],
            out_specs=pl.BlockSpec((None, tm, LANES), lambda b, m: (b, m, 0)),
        ),
        compiler_params=pltpu.CompilerParams(
            dimension_semantics=("parallel", "parallel"),   # batch + row tiles
            vmem_limit_bytes=32 * 1024 * 1024,
        ),
    )(patches, w, s)


def _conv3d_bn_relu(x_ndhwc, folded):
    """x_ndhwc: (N, D, H, W, Cin_real) bf16 -> (N, D, H, W, 128) bf16."""
    w, s = folded
    N, D, H, W, _ = x_ndhwc.shape
    kp = w.shape[0]
    patches = _im2col_3x3x3(x_ndhwc).astype(jnp.bfloat16)
    patches = jnp.pad(patches, ((0, 0), (0, 0), (0, kp - patches.shape[-1])))
    y = _packed_conv_call(patches, w, s)             # (N, D*H*W, 128)
    return y.reshape(N, D, H, W, LANES)


# ----------------------------------------------------------------------------
# Parameters (deterministic, matching VGG6.__init__ shapes / init scheme)
# ----------------------------------------------------------------------------
def init_params(key, in_channels=2):
    convs = [(in_channels, 8), (8, 16), (16, 32), (32, 32), (32, 64), (64, 64)]
    params = []
    for cin, cout in convs:
        key, sub = jax.random.split(key)
        fan_out = cout * 3 * 3 * 3                       # kaiming_normal_, mode='fan_out'
        std = math.sqrt(2.0 / fan_out)
        w = std * jax.random.normal(sub, (cout, cin, 3, 3, 3), dtype=jnp.float32)
        b = jnp.zeros((cout,), jnp.float32)              # conv bias = 0
        gamma = jnp.ones((cout,), jnp.float32)           # BN weight = 1
        beta = jnp.zeros((cout,), jnp.float32)           # BN bias = 0
        rmean = jnp.zeros((cout,), jnp.float32)          # running_mean
        rvar = jnp.ones((cout,), jnp.float32)            # running_var
        params.append((w, b, gamma, beta, rmean, rvar))
    return params


# ----------------------------------------------------------------------------
# Full forward: features (6 convs + 3 pools) -> adaptive avgpool -> flatten
# ----------------------------------------------------------------------------
def vgg6_forward(x_ncdhw, params):
    folded = [_fold_conv_bn(*p) for p in params]
    couts = [p[0].shape[0] for p in params]
    x = jnp.transpose(x_ncdhw, (0, 2, 3, 4, 1)).astype(jnp.bfloat16)   # NCDHW -> NDHWC
    pool_sizes = (4, 2, 2)
    for blk, k in enumerate(pool_sizes):
        for j in range(2):
            idx = 2 * blk + j
            y = _conv3d_bn_relu(x, folded[idx])      # (N, D, H, W, 128) lane-padded
            x = y[..., :couts[idx]]                  # real channels for next im2col
        x = _maxpool_ndhwc(x, k)
    x = x.astype(jnp.float32)
    x = jnp.transpose(x, (0, 4, 1, 2, 3))            # NDHWC -> NCDHW (PyTorch order)
    x = adaptive_avg_pool3d(x, (1, 3, 3))            # (N, 64, 1, 3, 3)
    return x.reshape(x.shape[0], -1)                 # Flatten(1) -> (N, 576)


if __name__ == "__main__":
    key = jax.random.PRNGKey(0)
    pkey, xkey = jax.random.split(key)
    params = init_params(pkey, in_channels=2)
    # batch=2, in_channels=2, D=H=W=16, NCDHW like PyTorch
    x = jax.random.normal(xkey, (2, 2, 16, 16, 16), dtype=jnp.float32)
    out = jax.jit(vgg6_forward)(x, params)
    out = jax.block_until_ready(out)
    assert out.shape == (2, 64 * 1 * 3 * 3), out.shape
    assert bool(jnp.all(jnp.isfinite(out)))
    print("KERNEL_OK")
</pallas_src>

<mosaic_0001>
module attributes {stable_mosaic.version = 11 : i64} {
  func.func @_conv_bn_relu_kernel(%arg0: i32, %arg1: i32, %arg2: memref<1x1024x128xbf16, #tpu.memory_space<vmem>>, %arg3: memref<128x128xbf16, #tpu.memory_space<vmem>>, %arg4: memref<1x128xf32, #tpu.memory_space<vmem>>, %arg5: memref<1x1024x128xbf16, #tpu.memory_space<vmem>>) attributes {dimension_semantics = [#tpu.dimension_semantics<parallel>, #tpu.dimension_semantics<parallel>], iteration_bounds = array<i64: 2, 4>, scalar_prefetch = 0 : i64, scratch_operands = 0 : i64, tpu.core_type = #tpu.core_type<tc>, window_params = [{transform_indices = @transform_0, window_bounds = array<i64: 1, 1024, 128>}, {pipeline_mode = #tpu.pipeline_mode<synchronous>, transform_indices = @transform_1, window_bounds = array<i64: 128, 128>}, {pipeline_mode = #tpu.pipeline_mode<synchronous>, transform_indices = @transform_2, window_bounds = array<i64: 1, 128>}, {transform_indices = @transform_3, window_bounds = array<i64: 1, 1024, 128>}]} {
    %c0 = arith.constant 0 : index
    %c0_0 = arith.constant 0 : index
    %c0_1 = arith.constant 0 : index
    %0 = vector.load %arg2[%c0, %c0_0, %c0_1] : memref<1x1024x128xbf16, #tpu.memory_space<vmem>>, vector<1x1024x128xbf16>
    %1 = vector.shape_cast %0 : vector<1x1024x128xbf16> to vector<1024x128xbf16>
    %c0_2 = arith.constant 0 : index
    %c0_3 = arith.constant 0 : index
    %2 = vector.load %arg3[%c0_2, %c0_3] : memref<128x128xbf16, #tpu.memory_space<vmem>>, vector<128x128xbf16>
    %cst = arith.constant dense<0.000000e+00> : vector<1024x128xf32>
    %3 = tpu.matmul %1, %2, %cst {dimension_numbers = #tpu.dot_dimension_numbers<[1], [0], [0], [1], [0, 0, 1, 1], [], []>} : vector<1024x128xbf16>, vector<128x128xbf16>, vector<1024x128xf32> -> vector<1024x128xf32>
    %c0_4 = arith.constant 0 : index
    %c0_5 = arith.constant 0 : index
    %4 = vector.load %arg4[%c0_4, %c0_5] : memref<1x128xf32, #tpu.memory_space<vmem>>, vector<1x128xf32>
    %5 = vector.broadcast %4 : vector<1x128xf32> to vector<1024x128xf32>
    %6 = arith.addf %3, %5 : vector<1024x128xf32>
    %cst_6 = arith.constant 0.000000e+00 : f32
    %7 = vector.broadcast %cst_6 : f32 to vector<1024x128xf32>
    %8 = arith.maximumf %6, %7 : vector<1024x128xf32>
    %9 = arith.truncf %8 : vector<1024x128xf32> to vector<1024x128xbf16>
    %c0_7 = arith.constant 0 : index
    %c0_8 = arith.constant 0 : index
    %c0_9 = arith.constant 0 : index
    %10 = vector.load %arg5[%c0_7, %c0_8, %c0_9] : memref<1x1024x128xbf16, #tpu.memory_space<vmem>>, vector<1x1024x128xbf16>
    %11 = vector.shape_cast %10 : vector<1x1024x128xbf16> to vector<1024x128xbf16>
    %12 = vector.shape_cast %9 : vector<1024x128xbf16> to vector<1x1024x128xbf16>
    tpu.vector_store %arg5[%c0_7, %c0_8, %c0_9], %12 {strides = array<i32>} : memref<1x1024x128xbf16, #tpu.memory_space<vmem>>, vector<1x1024x128xbf16>,
    return
  }
  func.func @transform_0(%arg0: i32, %arg1: i32) -> (i32, i32, i32) {
    %c0_i32 = arith.constant 0 : i32
    %c0_i32_0 = arith.constant 0 : i32
    return %arg0, %arg1, %c0_i32 : i32, i32, i32
  }
  func.func @transform_1(%arg0: i32, %arg1: i32) -> (i32, i32) {
    %c0_i32 = arith.constant 0 : i32
    %c0_i32_0 = arith.constant 0 : i32
    %c0_i32_1 = arith.constant 0 : i32
    return %c0_i32, %c0_i32_0 : i32, i32
  }
  func.func @transform_2(%arg0: i32, %arg1: i32) -> (i32, i32) {
    %c0_i32 = arith.constant 0 : i32
    %c0_i32_0 = arith.constant 0 : i32
    %c0_i32_1 = arith.constant 0 : i32
    return %c0_i32, %c0_i32_0 : i32, i32
  }
  func.func @transform_3(%arg0: i32, %arg1: i32) -> (i32, i32, i32) {
    %c0_i32 = arith.constant 0 : i32
    %c0_i32_0 = arith.constant 0 : i32
    return %arg0, %arg1, %c0_i32 : i32, i32, i32
  }
}

module attributes {stable_mosaic.version = 11 : i64} {
  func.func @_conv_bn_relu_kernel(%arg0: i32, %arg1: i32, %arg2: memref<1x1024x256xbf16, #tpu.memory_space<vmem>>, %arg3: memref<256x128xbf16, #tpu.memory_space<vmem>>, %arg4: memref<1x128xf32, #tpu.memory_space<vmem>>, %arg5: memref<1x1024x128xbf16, #tpu.memory_space<vmem>>) attributes {dimension_semantics = [#tpu.dimension_semantics<parallel>, #tpu.dimension_semantics<parallel>], iteration_bounds = array<i64: 2, 4>, scalar_prefetch = 0 : i64, scratch_operands = 0 : i64, tpu.core_type = #tpu.core_type<tc>, window_params = [{transform_indices = @transform_0, window_bounds = array<i64: 1, 1024, 256>}, {pipeline_mode = #tpu.pipeline_mode<synchronous>, transform_indices = @transform_1, window_bounds = array<i64: 256, 128>}, {pipeline_mode = #tpu.pipeline_mode<synchronous>, transform_indices = @transform_2, window_bounds = array<i64: 1, 128>}, {transform_indices = @transform_3, window_bounds = array<i64: 1, 1024, 128>}]} {
    %c0 = arith.constant 0 : index
    %c0_0 = arith.constant 0 : index
    %c0_1 = arith.constant 0 : index
    %0 = vector.load %arg2[%c0, %c0_0, %c0_1] : memref<1x1024x256xbf16, #tpu.memory_space<vmem>>, vector<1x1024x256xbf16>
    %1 = vector.shape_cast %0 : vector<1x1024x256xbf16> to vector<1024x256xbf16>
    %c0_2 = arith.constant 0 : index
    %c0_3 = arith.constant 0 : index
    %2 = vector.load %arg3[%c0_2, %c0_3] : memref<256x128xbf16, #tpu.memory_space<vmem>>, vector<256x128xbf16>
    %cst = arith.constant dense<0.000000e+00> : vector<1024x128xf32>
    %3 = tpu.matmul %1, %2, %cst {dimension_numbers = #tpu.dot_dimension_numbers<[1], [0], [0], [1], [0, 0, 1, 1], [], []>} : vector<1024x256xbf16>, vector<256x128xbf16>, vector<1024x128xf32> -> vector<1024x128xf32>
    %c0_4 = arith.constant 0 : index
    %c0_5 = arith.constant 0 : index
    %4 = vector.load %arg4[%c0_4, %c0_5] : memref<1x128xf32, #tpu.memory_space<vmem>>, vector<1x128xf32>
    %5 = vector.broadcast %4 : vector<1x128xf32> to vector<1024x128xf32>
    %6 = arith.addf %3, %5 : vector<1024x128xf32>
    %cst_6 = arith.constant 0.000000e+00 : f32
    %7 = vector.broadcast %cst_6 : f32 to vector<1024x128xf32>
    %8 = arith.maximumf %6, %7 : vector<1024x128xf32>
    %9 = arith.truncf %8 : vector<1024x128xf32> to vector<1024x128xbf16>
    %c0_7 = arith.constant 0 : index
    %c0_8 = arith.constant 0 : index
    %c0_9 = arith.constant 0 : index
    %10 = vector.load %arg5[%c0_7, %c0_8, %c0_9] : memref<1x1024x128xbf16, #tpu.memory_space<vmem>>, vector<1x1024x128xbf16>
    %11 = vector.shape_cast %10 : vector<1x1024x128xbf16> to vector<1024x128xbf16>
    %12 = vector.shape_cast %9 : vector<1024x128xbf16> to vector<1x1024x128xbf16>
    tpu.vector_store %arg5[%c0_7, %c0_8, %c0_9], %12 {strides = array<i32>} : memref<1x1024x128xbf16, #tpu.memory_space<vmem>>, vector<1x1024x128xbf16>,
    return
  }
  func.func @transform_0(%arg0: i32, %arg1: i32) -> (i32, i32, i32) {
    %c0_i32 = arith.constant 0 : i32
    %c0_i32_0 = arith.constant 0 : i32
    return %arg0, %arg1, %c0_i32 : i32, i32, i32
  }
  func.func @transform_1(%arg0: i32, %arg1: i32) -> (i32, i32) {
    %c0_i32 = arith.constant 0 : i32
    %c0_i32_0 = arith.constant 0 : i32
    %c0_i32_1 = arith.constant 0 : i32
    return %c0_i32, %c0_i32_0 : i32, i32
  }
  func.func @transform_2(%arg0: i32, %arg1: i32) -> (i32, i32) {
    %c0_i32 = arith.constant 0 : i32
    %c0_i32_0 = arith.constant 0 : i32
    %c0_i32_1 = arith.constant 0 : i32
    return %c0_i32, %c0_i32_0 : i32, i32
  }
  func.func @transform_3(%arg0: i32, %arg1: i32) -> (i32, i32, i32) {
    %c0_i32 = arith.constant 0 : i32
    %c0_i32_0 = arith.constant 0 : i32
    return %arg0, %arg1, %c0_i32 : i32, i32, i32
  }
}

module attributes {stable_mosaic.version = 11 : i64} {
  func.func @_conv_bn_relu_kernel(%arg0: i32, %arg1: i32, %arg2: memref<1x64x512xbf16, #tpu.memory_space<vmem>>, %arg3: memref<512x128xbf16, #tpu.memory_space<vmem>>, %arg4: memref<1x128xf32, #tpu.memory_space<vmem>>, %arg5: memref<1x64x128xbf16, #tpu.memory_space<vmem>>) attributes {dimension_semantics = [#tpu.dimension_semantics<parallel>, #tpu.dimension_semantics<parallel>], iteration_bounds = array<i64: 2, 1>, scalar_prefetch = 0 : i64, scratch_operands = 0 : i64, tpu.core_type = #tpu.core_type<tc>, window_params = [{transform_indices = @transform_0, window_bounds = array<i64: 1, 64, 512>}, {pipeline_mode = #tpu.pipeline_mode<synchronous>, transform_indices = @transform_1, window_bounds = array<i64: 512, 128>}, {pipeline_mode = #tpu.pipeline_mode<synchronous>, transform_indices = @transform_2, window_bounds = array<i64: 1, 128>}, {transform_indices = @transform_3, window_bounds = array<i64: 1, 64, 128>}]} {
    %c0 = arith.constant 0 : index
    %c0_0 = arith.constant 0 : index
    %c0_1 = arith.constant 0 : index
    %0 = vector.load %arg2[%c0, %c0_0, %c0_1] : memref<1x64x512xbf16, #tpu.memory_space<vmem>>, vector<1x64x512xbf16>
    %1 = vector.shape_cast %0 : vector<1x64x512xbf16> to vector<64x512xbf16>
    %c0_2 = arith.constant 0 : index
    %c0_3 = arith.constant 0 : index
    %2 = vector.load %arg3[%c0_2, %c0_3] : memref<512x128xbf16, #tpu.memory_space<vmem>>, vector<512x128xbf16>
    %cst = arith.constant dense<0.000000e+00> : vector<64x128xf32>
    %3 = tpu.matmul %1, %2, %cst {dimension_numbers = #tpu.dot_dimension_numbers<[1], [0], [0], [1], [0, 0, 1, 1], [], []>} : vector<64x512xbf16>, vector<512x128xbf16>, vector<64x128xf32> -> vector<64x128xf32>
    %c0_4 = arith.constant 0 : index
    %c0_5 = arith.constant 0 : index
    %4 = vector.load %arg4[%c0_4, %c0_5] : memref<1x128xf32, #tpu.memory_space<vmem>>, vector<1x128xf32>
    %5 = vector.broadcast %4 : vector<1x128xf32> to vector<64x128xf32>
    %6 = arith.addf %3, %5 : vector<64x128xf32>
    %cst_6 = arith.constant 0.000000e+00 : f32
    %7 = vector.broadcast %cst_6 : f32 to vector<64x128xf32>
    %8 = arith.maximumf %6, %7 : vector<64x128xf32>
    %9 = arith.truncf %8 : vector<64x128xf32> to vector<64x128xbf16>
    %c0_7 = arith.constant 0 : index
    %c0_8 = arith.constant 0 : index
    %c0_9 = arith.constant 0 : index
    %10 = vector.load %arg5[%c0_7, %c0_8, %c0_9] : memref<1x64x128xbf16, #tpu.memory_space<vmem>>, vector<1x64x128xbf16>
    %11 = vector.shape_cast %10 : vector<1x64x128xbf16> to vector<64x128xbf16>
    %12 = vector.shape_cast %9 : vector<64x128xbf16> to vector<1x64x128xbf16>
    tpu.vector_store %arg5[%c0_7, %c0_8, %c0_9], %12 {strides = array<i32>} : memref<1x64x128xbf16, #tpu.memory_space<vmem>>, vector<1x64x128xbf16>,
    return
  }
  func.func @transform_0(%arg0: i32, %arg1: i32) -> (i32, i32, i32) {
    %c0_i32 = arith.constant 0 : i32
    %c0_i32_0 = arith.constant 0 : i32
    return %arg0, %arg1, %c0_i32 : i32, i32, i32
  }
  func.func @transform_1(%arg0: i32, %arg1: i32) -> (i32, i32) {
    %c0_i32 = arith.constant 0 : i32
    %c0_i32_0 = arith.constant 0 : i32
    %c0_i32_1 = arith.constant 0 : i32
    return %c0_i32, %c0_i32_0 : i32, i32
  }
  func.func @transform_2(%arg0: i32, %arg1: i32) -> (i32, i32) {
    %c0_i32 = arith.constant 0 : i32
    %c0_i32_0 = arith.constant 0 : i32
    %c0_i32_1 = arith.constant 0 : i32
    return %c0_i32, %c0_i32_0 : i32, i32
  }
  func.func @transform_3(%arg0: i32, %arg1: i32) -> (i32, i32, i32) {
    %c0_i32 = arith.constant 0 : i32
    %c0_i32_0 = arith.constant 0 : i32
    return %arg0, %arg1, %c0_i32 : i32, i32, i32
  }
}

module attributes {stable_mosaic.version = 11 : i64} {
  func.func @_conv_bn_relu_kernel(%arg0: i32, %arg1: i32, %arg2: memref<1x64x896xbf16, #tpu.memory_space<vmem>>, %arg3: memref<896x128xbf16, #tpu.memory_space<vmem>>, %arg4: memref<1x128xf32, #tpu.memory_space<vmem>>, %arg5: memref<1x64x128xbf16, #tpu.memory_space<vmem>>) attributes {dimension_semantics = [#tpu.dimension_semantics<parallel>, #tpu.dimension_semantics<parallel>], iteration_bounds = array<i64: 2, 1>, scalar_prefetch = 0 : i64, scratch_operands = 0 : i64, tpu.core_type = #tpu.core_type<tc>, window_params = [{transform_indices = @transform_0, window_bounds = array<i64: 1, 64, 896>}, {pipeline_mode = #tpu.pipeline_mode<synchronous>, transform_indices = @transform_1, window_bounds = array<i64: 896, 128>}, {pipeline_mode = #tpu.pipeline_mode<synchronous>, transform_indices = @transform_2, window_bounds = array<i64: 1, 128>}, {transform_indices = @transform_3, window_bounds = array<i64: 1, 64, 128>}]} {
    %c0 = arith.constant 0 : index
    %c0_0 = arith.constant 0 : index
    %c0_1 = arith.constant 0 : index
    %0 = vector.load %arg2[%c0, %c0_0, %c0_1] : memref<1x64x896xbf16, #tpu.memory_space<vmem>>, vector<1x64x896xbf16>
    %1 = vector.shape_cast %0 : vector<1x64x896xbf16> to vector<64x896xbf16>
    %c0_2 = arith.constant 0 : index
    %c0_3 = arith.constant 0 : index
    %2 = vector.load %arg3[%c0_2, %c0_3] : memref<896x128xbf16, #tpu.memory_space<vmem>>, vector<896x128xbf16>
    %cst = arith.constant dense<0.000000e+00> : vector<64x128xf32>
    %3 = tpu.matmul %1, %2, %cst {dimension_numbers = #tpu.dot_dimension_numbers<[1], [0], [0], [1], [0, 0, 1, 1], [], []>} : vector<64x896xbf16>, vector<896x128xbf16>, vector<64x128xf32> -> vector<64x128xf32>
    %c0_4 = arith.constant 0 : index
    %c0_5 = arith.constant 0 : index
    %4 = vector.load %arg4[%c0_4, %c0_5] : memref<1x128xf32, #tpu.memory_space<vmem>>, vector<1x128xf32>
    %5 = vector.broadcast %4 : vector<1x128xf32> to vector<64x128xf32>
    %6 = arith.addf %3, %5 : vector<64x128xf32>
    %cst_6 = arith.constant 0.000000e+00 : f32
    %7 = vector.broadcast %cst_6 : f32 to vector<64x128xf32>
    %8 = arith.maximumf %6, %7 : vector<64x128xf32>
    %9 = arith.truncf %8 : vector<64x128xf32> to vector<64x128xbf16>
    %c0_7 = arith.constant 0 : index
    %c0_8 = arith.constant 0 : index
    %c0_9 = arith.constant 0 : index
    %10 = vector.load %arg5[%c0_7, %c0_8, %c0_9] : memref<1x64x128xbf16, #tpu.memory_space<vmem>>, vector<1x64x128xbf16>
    %11 = vector.shape_cast %10 : vector<1x64x128xbf16> to vector<64x128xbf16>
    %12 = vector.shape_cast %9 : vector<64x128xbf16> to vector<1x64x128xbf16>
    tpu.vector_store %arg5[%c0_7, %c0_8, %c0_9], %12 {strides = array<i32>} : memref<1x64x128xbf16, #tpu.memory_space<vmem>>, vector<1x64x128xbf16>,
    return
  }
  func.func @transform_0(%arg0: i32, %arg1: i32) -> (i32, i32, i32) {
    %c0_i32 = arith.constant 0 : i32
    %c0_i32_0 = arith.constant 0 : i32
    return %arg0, %arg1, %c0_i32 : i32, i32, i32
  }
  func.func @transform_1(%arg0: i32, %arg1: i32) -> (i32, i32) {
    %c0_i32 = arith.constant 0 : i32
    %c0_i32_0 = arith.constant 0 : i32
    %c0_i32_1 = arith.constant 0 : i32
    return %c0_i32, %c0_i32_0 : i32, i32
  }
  func.func @transform_2(%arg0: i32, %arg1: i32) -> (i32, i32) {
    %c0_i32 = arith.constant 0 : i32
    %c0_i32_0 = arith.constant 0 : i32
    %c0_i32_1 = arith.constant 0 : i32
    return %c0_i32, %c0_i32_0 : i32, i32
  }
  func.func @transform_3(%arg0: i32, %arg1: i32) -> (i32, i32, i32) {
    %c0_i32 = arith.constant 0 : i32
    %c0_i32_0 = arith.constant 0 : i32
    return %arg0, %arg1, %c0_i32 : i32, i32, i32
  }
}

module attributes {stable_mosaic.version = 11 : i64} {
  func.func @_conv_bn_relu_kernel(%arg0: i32, %arg1: i32, %arg2: memref<1x8x896xbf16, #tpu.memory_space<vmem>>, %arg3: memref<896x128xbf16, #tpu.memory_space<vmem>>, %arg4: memref<1x128xf32, #tpu.memory_space<vmem>>, %arg5: memref<1x8x128xbf16, #tpu.memory_space<vmem>>) attributes {dimension_semantics = [#tpu.dimension_semantics<parallel>, #tpu.dimension_semantics<parallel>], iteration_bounds = array<i64: 2, 1>, scalar_prefetch = 0 : i64, scratch_operands = 0 : i64, tpu.core_type = #tpu.core_type<tc>, window_params = [{transform_indices = @transform_0, window_bounds = array<i64: 1, 8, 896>}, {pipeline_mode = #tpu.pipeline_mode<synchronous>, transform_indices = @transform_1, window_bounds = array<i64: 896, 128>}, {pipeline_mode = #tpu.pipeline_mode<synchronous>, transform_indices = @transform_2, window_bounds = array<i64: 1, 128>}, {transform_indices = @transform_3, window_bounds = array<i64: 1, 8, 128>}]} {
    %c0 = arith.constant 0 : index
    %c0_0 = arith.constant 0 : index
    %c0_1 = arith.constant 0 : index
    %0 = vector.load %arg2[%c0, %c0_0, %c0_1] : memref<1x8x896xbf16, #tpu.memory_space<vmem>>, vector<1x8x896xbf16>
    %1 = vector.shape_cast %0 : vector<1x8x896xbf16> to vector<8x896xbf16>
    %c0_2 = arith.constant 0 : index
    %c0_3 = arith.constant 0 : index
    %2 = vector.load %arg3[%c0_2, %c0_3] : memref<896x128xbf16, #tpu.memory_space<vmem>>, vector<896x128xbf16>
    %cst = arith.constant dense<0.000000e+00> : vector<8x128xf32>
    %3 = tpu.matmul %1, %2, %cst {dimension_numbers = #tpu.dot_dimension_numbers<[1], [0], [0], [1], [0, 0, 1, 1], [], []>} : vector<8x896xbf16>, vector<896x128xbf16>, vector<8x128xf32> -> vector<8x128xf32>
    %c0_4 = arith.constant 0 : index
    %c0_5 = arith.constant 0 : index
    %4 = vector.load %arg4[%c0_4, %c0_5] : memref<1x128xf32, #tpu.memory_space<vmem>>, vector<1x128xf32>
    %5 = vector.broadcast %4 : vector<1x128xf32> to vector<8x128xf32>
    %6 = arith.addf %3, %5 : vector<8x128xf32>
    %cst_6 = arith.constant 0.000000e+00 : f32
    %7 = vector.broadcast %cst_6 : f32 to vector<8x128xf32>
    %8 = arith.maximumf %6, %7 : vector<8x128xf32>
    %9 = arith.truncf %8 : vector<8x128xf32> to vector<8x128xbf16>
    %c0_7 = arith.constant 0 : index
    %c0_8 = arith.constant 0 : index
    %c0_9 = arith.constant 0 : index
    %10 = vector.load %arg5[%c0_7, %c0_8, %c0_9] : memref<1x8x128xbf16, #tpu.memory_space<vmem>>, vector<1x8x128xbf16>
    %11 = vector.shape_cast %10 : vector<1x8x128xbf16> to vector<8x128xbf16>
    %12 = vector.shape_cast %9 : vector<8x128xbf16> to vector<1x8x128xbf16>
    tpu.vector_store %arg5[%c0_7, %c0_8, %c0_9], %12 {strides = array<i32>} : memref<1x8x128xbf16, #tpu.memory_space<vmem>>, vector<1x8x128xbf16>,
    return
  }
  func.func @transform_0(%arg0: i32, %arg1: i32) -> (i32, i32, i32) {
    %c0_i32 = arith.constant 0 : i32
    %c0_i32_0 = arith.constant 0 : i32
    return %arg0, %arg1, %c0_i32 : i32, i32, i32
  }
  func.func @transform_1(%arg0: i32, %arg1: i32) -> (i32, i32) {
    %c0_i32 = arith.constant 0 : i32
    %c0_i32_0 = arith.constant 0 : i32
    %c0_i32_1 = arith.constant 0 : i32
    return %c0_i32, %c0_i32_0 : i32, i32
  }
  func.func @transform_2(%arg0: i32, %arg1: i32) -> (i32, i32) {
    %c0_i32 = arith.constant 0 : i32
    %c0_i32_0 = arith.constant 0 : i32
    %c0_i32_1 = arith.constant 0 : i32
    return %c0_i32, %c0_i32_0 : i32, i32
  }
  func.func @transform_3(%arg0: i32, %arg1: i32) -> (i32, i32, i32) {
    %c0_i32 = arith.constant 0 : i32
    %c0_i32_0 = arith.constant 0 : i32
    return %arg0, %arg1, %c0_i32 : i32, i32, i32
  }
}

module attributes {stable_mosaic.version = 11 : i64} {
  func.func @_conv_bn_relu_kernel(%arg0: i32, %arg1: i32, %arg2: memref<1x8x1792xbf16, #tpu.memory_space<vmem>>, %arg3: memref<1792x128xbf16, #tpu.memory_space<vmem>>, %arg4: memref<1x128xf32, #tpu.memory_space<vmem>>, %arg5: memref<1x8x128xbf16, #tpu.memory_space<vmem>>) attributes {dimension_semantics = [#tpu.dimension_semantics<parallel>, #tpu.dimension_semantics<parallel>], iteration_bounds = array<i64: 2, 1>, scalar_prefetch = 0 : i64, scratch_operands = 0 : i64, tpu.core_type = #tpu.core_type<tc>, window_params = [{transform_indices = @transform_0, window_bounds = array<i64: 1, 8, 1792>}, {pipeline_mode = #tpu.pipeline_mode<synchronous>, transform_indices = @transform_1, window_bounds = array<i64: 1792, 128>}, {pipeline_mode = #tpu.pipeline_mode<synchronous>, transform_indices = @transform_2, window_bounds = array<i64: 1, 128>}, {transform_indices = @transform_3, window_bounds = array<i64: 1, 8, 128>}]} {
    %c0 = arith.constant 0 : index
    %c0_0 = arith.constant 0 : index
    %c0_1 = arith.constant 0 : index
    %0 = vector.load %arg2[%c0, %c0_0, %c0_1] : memref<1x8x1792xbf16, #tpu.memory_space<vmem>>, vector<1x8x1792xbf16>
    %1 = vector.shape_cast %0 : vector<1x8x1792xbf16> to vector<8x1792xbf16>
    %c0_2 = arith.constant 0 : index
    %c0_3 = arith.constant 0 : index
    %2 = vector.load %arg3[%c0_2, %c0_3] : memref<1792x128xbf16, #tpu.memory_space<vmem>>, vector<1792x128xbf16>
    %cst = arith.constant dense<0.000000e+00> : vector<8x128xf32>
    %3 = tpu.matmul %1, %2, %cst {dimension_numbers = #tpu.dot_dimension_numbers<[1], [0], [0], [1], [0, 0, 1, 1], [], []>} : vector<8x1792xbf16>, vector<1792x128xbf16>, vector<8x128xf32> -> vector<8x128xf32>
    %c0_4 = arith.constant 0 : index
    %c0_5 = arith.constant 0 : index
    %4 = vector.load %arg4[%c0_4, %c0_5] : memref<1x128xf32, #tpu.memory_space<vmem>>, vector<1x128xf32>
    %5 = vector.broadcast %4 : vector<1x128xf32> to vector<8x128xf32>
    %6 = arith.addf %3, %5 : vector<8x128xf32>
    %cst_6 = arith.constant 0.000000e+00 : f32
    %7 = vector.broadcast %cst_6 : f32 to vector<8x128xf32>
    %8 = arith.maximumf %6, %7 : vector<8x128xf32>
    %9 = arith.truncf %8 : vector<8x128xf32> to vector<8x128xbf16>
    %c0_7 = arith.constant 0 : index
    %c0_8 = arith.constant 0 : index
    %c0_9 = arith.constant 0 : index
    %10 = vector.load %arg5[%c0_7, %c0_8, %c0_9] : memref<1x8x128xbf16, #tpu.memory_space<vmem>>, vector<1x8x128xbf16>
    %11 = vector.shape_cast %10 : vector<1x8x128xbf16> to vector<8x128xbf16>
    %12 = vector.shape_cast %9 : vector<8x128xbf16> to vector<1x8x128xbf16>
    tpu.vector_store %arg5[%c0_7, %c0_8, %c0_9], %12 {strides = array<i32>} : memref<1x8x128xbf16, #tpu.memory_space<vmem>>, vector<1x8x128xbf16>,
    return
  }
  func.func @transform_0(%arg0: i32, %arg1: i32) -> (i32, i32, i32) {
    %c0_i32 = arith.constant 0 : i32
    %c0_i32_0 = arith.constant 0 : i32
    return %arg0, %arg1, %c0_i32 : i32, i32, i32
  }
  func.func @transform_1(%arg0: i32, %arg1: i32) -> (i32, i32) {
    %c0_i32 = arith.constant 0 : i32
    %c0_i32_0 = arith.constant 0 : i32
    %c0_i32_1 = arith.constant 0 : i32
    return %c0_i32, %c0_i32_0 : i32, i32
  }
  func.func @transform_2(%arg0: i32, %arg1: i32) -> (i32, i32) {
    %c0_i32 = arith.constant 0 : i32
    %c0_i32_0 = arith.constant 0 : i32
    %c0_i32_1 = arith.constant 0 : i32
    return %c0_i32, %c0_i32_0 : i32, i32
  }
  func.func @transform_3(%arg0: i32, %arg1: i32) -> (i32, i32, i32) {
    %c0_i32 = arith.constant 0 : i32
    %c0_i32_0 = arith.constant 0 : i32
    return %arg0, %arg1, %c0_i32 : i32, i32, i32
  }
}

</mosaic_0001>

<bundles_post_ra>
// kernel: vgg6_forward.6
= control target key start
LH: loop header
LB: loop body
LE: loop exit
PB: predicated region body
PF: predicated region fallthrough
CT: control target
= control target key end

     0   :  { %s3326_s12 = smov 0   ;;  %s3328_s13 = smov 0   ;;  %s3676_s0 = inlined_call_operand.vmem [shape: bf16[2,4096,128], index: 0, kind: input, shape index: {}]   ;;  %s3677_s1 = inlined_call_operand.vmem [shape: bf16[128,128], index: 1, kind: input, shape index: {}]   ;;  %s3678_s2 = inlined_call_operand.vmem [shape: f32[1,128], index: 2, kind: input, shape index: {}]   ;;  %s3679_s3 = inlined_call_operand.vmem [shape: bf16[2,4096,128], index: 3, kind: output, shape index: {}]  }
   0x1   :  { %s3330_s14 = smov 0   ;;  %s3332_s15 = smov 0  }
   0x2   :  { %s3334_s16 = smov 0  }
   0x3 LB: > { %s22_s17 = sadd.s32 1, %s3296_s14  ;;  %s25_s18 = sadd.s32 1, %s3300_s15  ;;  %s3304_s16 = sphi %s3334_s16, %s13_s16   ;;  %s3300_s15 = sphi %s3332_s15, %s3683_s15   ;;  %s3296_s14 = sphi %s3330_s14, %s3682_s14   ;;  %s3292_s13 = sphi %s3328_s13, %s3681_s13   ;;  %s3288_s12 = sphi %s3326_s12, %s3680_s12  }
   0x4   : > { %p23_p0 = scmp.ge.s32.totalorder %s22_s17, 4  ;;  %p2201_p1 = scmp.ge.s32.totalorder %s3304_s16, 1 }
   0x5   : > { %p158_p2 = scmp.lt.s32.totalorder %s3304_s16, 9 }
   0x6   : > { %s3685_s17 = smov (%p23_p0, %s22_s17), 0  ;;  %s3687_s18 = smov (!%p23_p0, %s25_s18), %s3300_s15 }
   0x7   : > { %p159_p3 = pnand %p2201_p1, %p158_p2  ;;  %p27_p4 = scmp.ge.s32.totalorder %s3687_s18, 2 }
   0x8   : > { %s2202_s21 = sshll.u32 (!%p159_p3), %s3288_s12, 7  ;;  %p191_p5 = scmp.lt.s32.totalorder (!%p159_p3), %s3292_s13, 1 }
   0x9   : > { %s3689_s18 = smov (%p27_p4, %s3687_s18), 0  ;;  %162 = sbr.rel (%p159_p3) target bundleno = 373 (0x175), region = 32 }
   0xa   : > { %p193_p6 = scmp.lt.s32.totalorder (!%p159_p3), %s2202_s21, 511 }
   0xe   : > { %v3194_v0 = vld [vmem:[%s3677_s1 + $0x38] sm:$0xff]   ;;  %v3195_v1 = vld [vmem:[%s3677_s1 + $0x30] sm:$0xff]   ;;  %s3691_s13 = smov (!%p191_p5, %s3292_s13), 1  ;;  %v3196_v2 = vld [vmem:[%s3677_s1 + $0x28] sm:$0xff]   ;;  %s3693_s21 = smov (!%p193_p6, %s2202_s21), 511 }
   0xf   : > { %2994 = vmatprep.subr.bf16.mxu0 %v3194_v0  ;;  %3138 = vmatprep.subr.bf16.mxu1 %v3194_v0  ;;  %s2203_s26 = sshll.u32 %s3691_s13, 9  ;;  %v3197_v3 = vld [vmem:[%s3677_s1 + $0x20] sm:$0xff]   ;;  %v3198_v6 = vld [vmem:[%s3677_s1 + $0x18] sm:$0xff]   ;;  %v3199_v7 = vld [vmem:[%s3677_s1 + $0x10] sm:$0xff]  }
  0x10   : > { %2995 = vmatpush3.bf16.msra.mxu0 %v3194_v0  ;;  %3146 = vmatpush3.bf16.msra.mxu1 %v3194_v0  ;;  %s3368_s27 = sadd.s32 %s2203_s26, %s3693_s21  ;;  %v3200_v8 = vld [vmem:[%s3677_s1 + $0x8] sm:$0xff]   ;;  %v3201_v9 = vld [vmem:[%s3677_s1] sm:$0xff]  }
  0x11   : > { %2996 = vmatprep.subr.bf16.mxu0 %v3195_v1  ;;  %3139 = vmatprep.subr.bf16.mxu1 %v3195_v1  ;;  %s2204_s28 = sshll.u32 %s3368_s27, 2 }
  0x12   : > { %s3379_s6 = scalar_lea.vmem %s3676_s0, %s2204_s28  ;;  %s3475_s24 = scalar_lea.vmem %s3679_s3, %s2204_s28 }
  0x13   : > { %v3202_v4 = vld [vmem:[%s3379_s6] sm:$0xff]   ;;  %v3204_v10 = vld [vmem:[%s3379_s6 + $0x8] sm:$0xff]   ;;  %v3206_v12 = vld [vmem:[%s3379_s6 + $0x10] sm:$0xff]  }
  0x14   : > { %2997 = vmatpush3.bf16.msra.mxu0 %v3195_v1  ;;  %3147 = vmatpush3.bf16.msra.mxu1 %v3195_v1  ;;  %v3203_v5 = vld [vmem:[%s3379_s6 + $0x100] sm:$0xff]   ;;  %v3205_v11 = vld [vmem:[%s3379_s6 + $0x108] sm:$0xff]   ;;  %v3207_v13 = vld [vmem:[%s3379_s6 + $0x110] sm:$0xff]  }
  0x15   : > { %2998 = vmatprep.subr.bf16.mxu0 %v3196_v2  ;;  %3140 = vmatprep.subr.bf16.mxu1 %v3196_v2  ;;  %v3208_v14 = vld [vmem:[%s3379_s6 + $0x18] sm:$0xff]   ;;  %v3210_v16 = vld [vmem:[%s3379_s6 + $0x20] sm:$0xff]   ;;  %v3212_v18 = vld [vmem:[%s3379_s6 + $0x28] sm:$0xff]  }
  0x16   : > { %3010 = vmatprep.mubr.bf16.mxu0 %v3202_v4  ;;  %3074 = vmatprep.mubr.bf16.mxu1 %v3203_v5  ;;  %v3209_v15 = vld [vmem:[%s3379_s6 + $0x118] sm:$0xff]   ;;  %v3211_v17 = vld [vmem:[%s3379_s6 + $0x120] sm:$0xff]   ;;  %v3213_v19 = vld [vmem:[%s3379_s6 + $0x128] sm:$0xff]  }
  0x17   : > { %v3214_v20 = vld [vmem:[%s3379_s6 + $0x30] sm:$0xff]   ;;  %v3216_v22 = vld [vmem:[%s3379_s6 + $0x38] sm:$0xff]   ;;  %v3218_v24 = vld [vmem:[%s3379_s6 + $0x40] sm:$0xff]  }
  0x18   : > { %2999 = vmatpush3.bf16.msra.mxu0 %v3196_v2  ;;  %3148 = vmatpush3.bf16.msra.mxu1 %v3196_v2  ;;  %v3215_v21 = vld [vmem:[%s3379_s6 + $0x130] sm:$0xff]   ;;  %v3217_v23 = vld [vmem:[%s3379_s6 + $0x138] sm:$0xff]   ;;  %v3219_v25 = vld [vmem:[%s3379_s6 + $0x140] sm:$0xff]  }
  0x19   : > { %3000 = vmatprep.subr.bf16.mxu0 %v3197_v3  ;;  %3141 = vmatprep.subr.bf16.mxu1 %v3197_v3  ;;  %v3220_v26 = vld [vmem:[%s3379_s6 + $0x48] sm:$0xff]   ;;  %v3222_v28 = vld [vmem:[%s3379_s6 + $0x50] sm:$0xff]   ;;  %v3224_v30 = vld [vmem:[%s3379_s6 + $0x58] sm:$0xff]  }
  0x1a   : > { %v3221_v27 = vld [vmem:[%s3379_s6 + $0x148] sm:$0xff]   ;;  %v3223_v29 = vld [vmem:[%s3379_s6 + $0x150] sm:$0xff]   ;;  %v3225_v31 = vld [vmem:[%s3379_s6 + $0x158] sm:$0xff]  }
  0x1b   : > { %v3226_v32 = vld [vmem:[%s3379_s6 + $0x60] sm:$0xff]   ;;  %v3228_v34 = vld [vmem:[%s3379_s6 + $0x68] sm:$0xff]   ;;  %v3230_v36 = vld [vmem:[%s3379_s6 + $0x70] sm:$0xff]  }
  0x1c   : > { %3001 = vmatpush3.bf16.msra.mxu0 %v3197_v3  ;;  %3149 = vmatpush3.bf16.msra.mxu1 %v3197_v3  ;;  %v3227_v33 = vld [vmem:[%s3379_s6 + $0x160] sm:$0xff]   ;;  %v3229_v35 = vld [vmem:[%s3379_s6 + $0x168] sm:$0xff]   ;;  %v3231_v37 = vld [vmem:[%s3379_s6 + $0x170] sm:$0xff]  }
  0x1d   : > { %3002 = vmatprep.subr.bf16.mxu0 %v3198_v6  ;;  %3142 = vmatprep.subr.bf16.mxu1 %v3198_v6  ;;  %v3232_v38 = vld [vmem:[%s3379_s6 + $0x78] sm:$0xff]   ;;  %v3234_v40 = vld [vmem:[%s3379_s6 + $0x80] sm:$0xff]   ;;  %v3236_v42 = vld [vmem:[%s3379_s6 + $0x88] sm:$0xff]  }
  0x1e   : > { %v3233_v39 = vld [vmem:[%s3379_s6 + $0x178] sm:$0xff]   ;;  %v3235_v41 = vld [vmem:[%s3379_s6 + $0x180] sm:$0xff]   ;;  %v3237_v43 = vld [vmem:[%s3379_s6 + $0x188] sm:$0xff]  }
  0x1f   : > { %v3238_v44 = vld [vmem:[%s3379_s6 + $0x90] sm:$0xff]   ;;  %v3240_v46 = vld [vmem:[%s3379_s6 + $0x98] sm:$0xff]   ;;  %v3242_v48 = vld [vmem:[%s3379_s6 + $0xa0] sm:$0xff]  }
  0x20   : > { %3003 = vmatpush3.bf16.msra.mxu0 %v3198_v6  ;;  %3150 = vmatpush3.bf16.msra.mxu1 %v3198_v6  ;;  %v3239_v45 = vld [vmem:[%s3379_s6 + $0x190] sm:$0xff]   ;;  %v3241_v47 = vld [vmem:[%s3379_s6 + $0x198] sm:$0xff]   ;;  %v3243_v49 = vld [vmem:[%s3379_s6 + $0x1a0] sm:$0xff]  }
  0x21   : > { %3004 = vmatprep.subr.bf16.mxu0 %v3199_v7  ;;  %3143 = vmatprep.subr.bf16.mxu1 %v3199_v7  ;;  %v3244_v50 = vld [vmem:[%s3379_s6 + $0xa8] sm:$0xff]   ;;  %v3246_v52 = vld [vmem:[%s3379_s6 + $0xb0] sm:$0xff]   ;;  %v3248_v54 = vld [vmem:[%s3379_s6 + $0xb8] sm:$0xff]  }
  0x22   : > { %v3245_v51 = vld [vmem:[%s3379_s6 + $0x1a8] sm:$0xff]   ;;  %v3247_v53 = vld [vmem:[%s3379_s6 + $0x1b0] sm:$0xff]   ;;  %v3249_v55 = vld [vmem:[%s3379_s6 + $0x1b8] sm:$0xff]  }
  0x23   : > { %v3250_v56 = vld [vmem:[%s3379_s6 + $0xc0] sm:$0xff]   ;;  %v3252_v58 = vld [vmem:[%s3379_s6 + $0xc8] sm:$0xff]   ;;  %v3254_v60 = vld [vmem:[%s3379_s6 + $0xd0] sm:$0xff]  }
  0x24   : > { %3005 = vmatpush3.bf16.msra.mxu0 %v3199_v7  ;;  %3151 = vmatpush3.bf16.msra.mxu1 %v3199_v7  ;;  %v3251_v57 = vld [vmem:[%s3379_s6 + $0x1c0] sm:$0xff]   ;;  %v3253_v59 = vld [vmem:[%s3379_s6 + $0x1c8] sm:$0xff]   ;;  %v3255_v61 = vld [vmem:[%s3379_s6 + $0x1d0] sm:$0xff]  }
  0x25   : > { %3006 = vmatprep.subr.bf16.mxu0 %v3200_v8  ;;  %3144 = vmatprep.subr.bf16.mxu1 %v3200_v8  ;;  %v3256_v62 = vld [vmem:[%s3379_s6 + $0xd8] sm:$0xff]   ;;  %v3258_v0 = vld [vmem:[%s3379_s6 + $0xe0] sm:$0xff]   ;;  %v3260_v2 = vld [vmem:[%s3379_s6 + $0xe8] sm:$0xff]  }
  0x26   : > { %v3257_v63 = vld [vmem:[%s3379_s6 + $0x1d8] sm:$0xff]   ;;  %v3259_v1 = vld [vmem:[%s3379_s6 + $0x1e0] sm:$0xff]   ;;  %v3261_v3 = vld [vmem:[%s3379_s6 + $0x1e8] sm:$0xff]  }
  0x27   : > { %v3262_v4 = vld [vmem:[%s3379_s6 + $0xf0] sm:$0xff]   ;;  %v3264_v6 = vld [vmem:[%s3379_s6 + $0xf8] sm:$0xff]  }
  0x28   : > { %3007 = vmatpush3.bf16.msra.mxu0 %v3200_v8  ;;  %3152 = vmatpush3.bf16.msra.mxu1 %v3200_v8  ;;  %v3263_v5 = vld [vmem:[%s3379_s6 + $0x1f0] sm:$0xff]   ;;  %v3265_v7 = vld [vmem:[%s3379_s6 + $0x1f8] sm:$0xff]   ;;  %v3460_v8 = vld [vmem:[%s3678_s2] ss:$0 sm:$0xff] }
  0x29   : > { %3008 = vmatprep.subr.bf16.mxu0 %v3201_v9  ;;  %3145 = vmatprep.subr.bf16.mxu1 %v3201_v9 }
  0x2c   : > { %3009 = vmatpush3.bf16.msra.mxu0 %v3201_v9  ;;  %3153 = vmatpush3.bf16.msra.mxu1 %v3201_v9 }
  0x2f   : > { %3011 = vmatmul.mubr.bf16.vlgmr.msra.gmra.mxu0 %v3204_v10  ;;  %3075 = vmatmul.mubr.bf16.vlgmr.msra.gmra.mxu1 %v3205_v11 }
  0x30   : > { %3014 = vmatprep.mubr.bf16.mxu0 %v3206_v12  ;;  %3078 = vmatprep.mubr.bf16.mxu1 %v3207_v13 }
  0x37   : > { %3015 = vmatmul.mubr.bf16.gmra.mxu0 %v3208_v14  ;;  %3079 = vmatmul.mubr.bf16.gmra.mxu1 %v3209_v15 }
  0x38   : > { %3018 = vmatprep.mubr.bf16.mxu0 %v3210_v16  ;;  %3082 = vmatprep.mubr.bf16.mxu1 %v3211_v17 }
  0x3f   : > { %3019 = vmatmul.mubr.bf16.gmra.mxu0 %v3212_v18  ;;  %3083 = vmatmul.mubr.bf16.gmra.mxu1 %v3213_v19 }
  0x40   : > { %3022 = vmatprep.mubr.bf16.mxu0 %v3214_v20  ;;  %3086 = vmatprep.mubr.bf16.mxu1 %v3215_v21 }
  0x47   : > { %3023 = vmatmul.mubr.bf16.gmra.mxu0 %v3216_v22  ;;  %3087 = vmatmul.mubr.bf16.gmra.mxu1 %v3217_v23 }
  0x48   : > { %3026 = vmatprep.mubr.bf16.mxu0 %v3218_v24  ;;  %3090 = vmatprep.mubr.bf16.mxu1 %v3219_v25 }
  0x4f   : > { %3027 = vmatmul.mubr.bf16.gmra.mxu0 %v3220_v26  ;;  %3091 = vmatmul.mubr.bf16.gmra.mxu1 %v3221_v27 }
  0x50   : > { %3030 = vmatprep.mubr.bf16.mxu0 %v3222_v28  ;;  %3094 = vmatprep.mubr.bf16.mxu1 %v3223_v29 }
  0x57   : > { %3031 = vmatmul.mubr.bf16.gmra.mxu0 %v3224_v30  ;;  %3095 = vmatmul.mubr.bf16.gmra.mxu1 %v3225_v31 }
  0x58   : > { %3034 = vmatprep.mubr.bf16.mxu0 %v3226_v32  ;;  %3098 = vmatprep.mubr.bf16.mxu1 %v3227_v33 }
  0x5f   : > { %3035 = vmatmul.mubr.bf16.gmra.mxu0 %v3228_v34  ;;  %3099 = vmatmul.mubr.bf16.gmra.mxu1 %v3229_v35 }
  0x60   : > { %3038 = vmatprep.mubr.bf16.mxu0 %v3230_v36  ;;  %3102 = vmatprep.mubr.bf16.mxu1 %v3231_v37 }
  0x67   : > { %3039 = vmatmul.mubr.bf16.gmra.mxu0 %v3232_v38  ;;  %3103 = vmatmul.mubr.bf16.gmra.mxu1 %v3233_v39 }
  0x68   : > { %3042 = vmatprep.mubr.bf16.mxu0 %v3234_v40  ;;  %3106 = vmatprep.mubr.bf16.mxu1 %v3235_v41 }
  0x6f   : > { %3043 = vmatmul.mubr.bf16.gmra.mxu0 %v3236_v42  ;;  %3107 = vmatmul.mubr.bf16.gmra.mxu1 %v3237_v43 }
  0x70   : > { %3046 = vmatprep.mubr.bf16.mxu0 %v3238_v44  ;;  %3110 = vmatprep.mubr.bf16.mxu1 %v3239_v45 }
  0x77   : > { %3047 = vmatmul.mubr.bf16.gmra.mxu0 %v3240_v46  ;;  %3111 = vmatmul.mubr.bf16.gmra.mxu1 %v3241_v47 }
  0x78   : > { %3050 = vmatprep.mubr.bf16.mxu0 %v3242_v48  ;;  %3114 = vmatprep.mubr.bf16.mxu1 %v3243_v49 }
  0x7f   : > { %3051 = vmatmul.mubr.bf16.gmra.mxu0 %v3244_v50  ;;  %3115 = vmatmul.mubr.bf16.gmra.mxu1 %v3245_v51 }
  0x80   : > { %3054 = vmatprep.mubr.bf16.mxu0 %v3246_v52  ;;  %3118 = vmatprep.mubr.bf16.mxu1 %v3247_v53 }
  0x87   : > { %3055 = vmatmul.mubr.bf16.gmra.mxu0 %v3248_v54  ;;  %3119 = vmatmul.mubr.bf16.gmra.mxu1 %v3249_v55 }
  0x88   : > { %3058 = vmatprep.mubr.bf16.mxu0 %v3250_v56  ;;  %3122 = vmatprep.mubr.bf16.mxu1 %v3251_v57 }
  0x8f   : > { %3059 = vmatmul.mubr.bf16.gmra.mxu0 %v3252_v58  ;;  %3123 = vmatmul.mubr.bf16.gmra.mxu1 %v3253_v59 }
  0x90   : > { %3062 = vmatprep.mubr.bf16.mxu0 %v3254_v60  ;;  %3126 = vmatprep.mubr.bf16.mxu1 %v3255_v61 }
  0x97   : > { %3063 = vmatmul.mubr.bf16.gmra.mxu0 %v3256_v62  ;;  %3127 = vmatmul.mubr.bf16.gmra.mxu1 %v3257_v63 }
  0x98   : > { %3066 = vmatprep.mubr.bf16.mxu0 %v3258_v0  ;;  %3130 = vmatprep.mubr.bf16.mxu1 %v3259_v1 }
  0x9f   : > { %3067 = vmatmul.mubr.bf16.gmra.mxu0 %v3260_v2  ;;  %3131 = vmatmul.mubr.bf16.gmra.mxu1 %v3261_v3 }
  0xa0   : > { %3070 = vmatprep.mubr.bf16.mxu0 %v3262_v4  ;;  %3134 = vmatprep.mubr.bf16.mxu1 %v3263_v5 }
  0xa7   : > { %3071 = vmatmul.mubr.bf16.gmra.mxu0 %v3264_v6  ;;  %3135 = vmatmul.mubr.bf16.gmra.mxu1 %v3265_v7 }
  0xef   : > { %v3012_v9 = vpop.f32.mrf.mxu0  ;;  %v3076_v10 = vpop.f32.mrf.mxu1 }
  0xf0   : > { %v837_v11 = vadd.f32 %v3012_v9, %v3460_v8  ;;  %v1093_v12 = vadd.f32 %v3076_v10, %v3460_v8 }
  0xf1   : > { %v828_v13 = vpop.f32.mrf.mxu0  ;;  %v1084_v14 = vpop.f32.mrf.mxu1 }
  0xf2   : > { %v829_v15 = vadd.f32 %v3460_v8, %v828_v13  ;;  %v1085_v16 = vadd.f32 %v3460_v8, %v1084_v14  ;;  %v1341_v21 = vmax.f32 %v837_v11, 0.0  ;;  %v1405_v22 = vmax.f32 %v1093_v12, 0.0 }
  0xf3   : > { %v3013_v17 = vpop.f32.mrf.mxu0  ;;  %v3077_v18 = vpop.f32.mrf.mxu1 }
  0xf4   : > { %v840_v19 = vadd.f32 %v3013_v17, %v3460_v8  ;;  %v1096_v20 = vadd.f32 %v3077_v18, %v3460_v8  ;;  %v1339_v29 = vmax.f32 %v829_v15, 0.0  ;;  %v1403_v30 = vmax.f32 %v1085_v16, 0.0 }
  0xf5   : > { %v831_v23 = vpop.f32.mrf.mxu0  ;;  %v1087_v24 = vpop.f32.mrf.mxu1 }
  0xf6   : > { %v1342_v25 = vmax.f32 %v840_v19, 0.0  ;;  %v1406_v26 = vmax.f32 %v1096_v20, 0.0  ;;  %v832_v27 = vadd.f32 %v3460_v8, %v831_v23  ;;  %v1088_v28 = vadd.f32 %v3460_v8, %v1087_v24 }
  0xf7   : > { %v3016_v31 = vpop.f32.mrf.mxu0  ;;  %v3080_v32 = vpop.f32.mrf.mxu1 }
  0xf8   : > { %v2547_v33 = vpack.c.bf16 %v1342_v25, %v1341_v21  ;;  %v2707_v34 = vpack.c.bf16 %v1406_v26, %v1405_v22  ;;  %v1340_v35 = vmax.f32 %v832_v27, 0.0  ;;  %v1404_v36 = vmax.f32 %v1088_v28, 0.0 }
  0xf9   : > { %v853_v37 = vadd.f32 %v3016_v31, %v3460_v8  ;;  %v1109_v38 = vadd.f32 %v3080_v32, %v3460_v8  ;;  %v844_v39 = vpop.f32.mrf.mxu0  ;;  %v1100_v40 = vpop.f32.mrf.mxu1 }
  0xfa   : > { %2859 = vst [vmem:[%s3475_s24 + $0x8] sm:$0xff] %v2547_v33   ;;  %2891 = vst [vmem:[%s3475_s24 + $0x108] sm:$0xff] %v2707_v34   ;;  %v2542_v41 = vpack.c.bf16 %v1340_v35, %v1339_v29  ;;  %v2702_v42 = vpack.c.bf16 %v1404_v36, %v1403_v30  ;;  %v845_v43 = vadd.f32 %v3460_v8, %v844_v39 }
  0xfb   : > { %v1101_v44 = vadd.f32 %v3460_v8, %v1100_v40  ;;  %v3017_v45 = vpop.f32.mrf.mxu0  ;;  %v3081_v46 = vpop.f32.mrf.mxu1  ;;  %v1345_v49 = vmax.f32 %v853_v37, 0.0  ;;  %v1409_v50 = vmax.f32 %v1109_v38, 0.0 }
  0xfc   : > { %2543 = vst [vmem:[%s3475_s24] sm:$0xff] %v2542_v41   ;;  %2890 = vst [vmem:[%s3475_s24 + $0x100] sm:$0xff] %v2702_v42   ;;  %v856_v47 = vadd.f32 %v3017_v45, %v3460_v8  ;;  %v1112_v48 = vadd.f32 %v3081_v46, %v3460_v8  ;;  %v1343_v57 = vmax.f32 %v845_v43, 0.0 }
  0xfd   : > { %v847_v51 = vpop.f32.mrf.mxu0  ;;  %v1103_v52 = vpop.f32.mrf.mxu1  ;;  %v1407_v58 = vmax.f32 %v1101_v44, 0.0 }
  0xfe   : > { %v1346_v53 = vmax.f32 %v856_v47, 0.0  ;;  %v1410_v54 = vmax.f32 %v1112_v48, 0.0  ;;  %v848_v55 = vadd.f32 %v3460_v8, %v847_v51  ;;  %v1104_v56 = vadd.f32 %v3460_v8, %v1103_v52 }
  0xff   : > { %v3020_v59 = vpop.f32.mrf.mxu0  ;;  %v3084_v60 = vpop.f32.mrf.mxu1 }
 0x100   : > { %v2557_v61 = vpack.c.bf16 %v1346_v53, %v1345_v49  ;;  %v2717_v62 = vpack.c.bf16 %v1410_v54, %v1409_v50  ;;  %v1344_v63 = vmax.f32 %v848_v55, 0.0  ;;  %v1408_v0 = vmax.f32 %v1104_v56, 0.0 }
 0x101   : > { %v869_v1 = vadd.f32 %v3020_v59, %v3460_v8  ;;  %v1125_v2 = vadd.f32 %v3084_v60, %v3460_v8  ;;  %v860_v3 = vpop.f32.mrf.mxu0  ;;  %v1116_v4 = vpop.f32.mrf.mxu1 }
 0x102   : > { %2861 = vst [vmem:[%s3475_s24 + $0x18] sm:$0xff] %v2557_v61   ;;  %2893 = vst [vmem:[%s3475_s24 + $0x118] sm:$0xff] %v2717_v62   ;;  %v2552_v5 = vpack.c.bf16 %v1344_v63, %v1343_v57  ;;  %v2712_v6 = vpack.c.bf16 %v1408_v0, %v1407_v58  ;;  %v861_v7 = vadd.f32 %v3460_v8, %v860_v3 }
 0x103   : > { %v1117_v9 = vadd.f32 %v3460_v8, %v1116_v4  ;;  %v3021_v10 = vpop.f32.mrf.mxu0  ;;  %v3085_v11 = vpop.f32.mrf.mxu1  ;;  %v1349_v14 = vmax.f32 %v869_v1, 0.0  ;;  %v1413_v15 = vmax.f32 %v1125_v2, 0.0 }
 0x104   : > { %2860 = vst [vmem:[%s3475_s24 + $0x10] sm:$0xff] %v2552_v5   ;;  %2892 = vst [vmem:[%s3475_s24 + $0x110] sm:$0xff] %v2712_v6   ;;  %v872_v12 = vadd.f32 %v3021_v10, %v3460_v8  ;;  %v1128_v13 = vadd.f32 %v3085_v11, %v3460_v8  ;;  %v1347_v22 = vmax.f32 %v861_v7, 0.0 }
 0x105   : > { %v863_v16 = vpop.f32.mrf.mxu0  ;;  %v1119_v17 = vpop.f32.mrf.mxu1  ;;  %v1411_v23 = vmax.f32 %v1117_v9, 0.0 }
 0x106   : > { %v1350_v18 = vmax.f32 %v872_v12, 0.0  ;;  %v1414_v19 = vmax.f32 %v1128_v13, 0.0  ;;  %v864_v20 = vadd.f32 %v3460_v8, %v863_v16  ;;  %v1120_v21 = vadd.f32 %v3460_v8, %v1119_v17 }
 0x107   : > { %v3024_v24 = vpop.f32.mrf.mxu0  ;;  %v3088_v25 = vpop.f32.mrf.mxu1 }
 0x108   : > { %v2567_v26 = vpack.c.bf16 %v1350_v18, %v1349_v14  ;;  %v2727_v27 = vpack.c.bf16 %v1414_v19, %v1413_v15  ;;  %v1348_v28 = vmax.f32 %v864_v20, 0.0  ;;  %v1412_v29 = vmax.f32 %v1120_v21, 0.0 }
 0x109   : > { %v885_v30 = vadd.f32 %v3024_v24, %v3460_v8  ;;  %v1141_v31 = vadd.f32 %v3088_v25, %v3460_v8  ;;  %v876_v32 = vpop.f32.mrf.mxu0  ;;  %v1132_v33 = vpop.f32.mrf.mxu1 }
 0x10a   : > { %2863 = vst [vmem:[%s3475_s24 + $0x28] sm:$0xff] %v2567_v26   ;;  %2895 = vst [vmem:[%s3475_s24 + $0x128] sm:$0xff] %v2727_v27   ;;  %v2562_v34 = vpack.c.bf16 %v1348_v28, %v1347_v22  ;;  %v2722_v35 = vpack.c.bf16 %v1412_v29, %v1411_v23  ;;  %v877_v36 = vadd.f32 %v3460_v8, %v876_v32 }
 0x10b   : > { %v1133_v37 = vadd.f32 %v3460_v8, %v1132_v33  ;;  %v3025_v38 = vpop.f32.mrf.mxu0  ;;  %v3089_v39 = vpop.f32.mrf.mxu1  ;;  %v1353_v42 = vmax.f32 %v885_v30, 0.0  ;;  %v1417_v43 = vmax.f32 %v1141_v31, 0.0 }
 0x10c   : > { %2862 = vst [vmem:[%s3475_s24 + $0x20] sm:$0xff] %v2562_v34   ;;  %2894 = vst [vmem:[%s3475_s24 + $0x120] sm:$0xff] %v2722_v35   ;;  %v888_v40 = vadd.f32 %v3025_v38, %v3460_v8  ;;  %v1144_v41 = vadd.f32 %v3089_v39, %v3460_v8  ;;  %v1351_v50 = vmax.f32 %v877_v36, 0.0 }
 0x10d   : > { %v879_v44 = vpop.f32.mrf.mxu0  ;;  %v1135_v45 = vpop.f32.mrf.mxu1  ;;  %v1415_v51 = vmax.f32 %v1133_v37, 0.0 }
 0x10e   : > { %v1354_v46 = vmax.f32 %v888_v40, 0.0  ;;  %v1418_v47 = vmax.f32 %v1144_v41, 0.0  ;;  %v880_v48 = vadd.f32 %v3460_v8, %v879_v44  ;;  %v1136_v49 = vadd.f32 %v3460_v8, %v1135_v45 }
 0x10f   : > { %v3028_v52 = vpop.f32.mrf.mxu0  ;;  %v3092_v53 = vpop.f32.mrf.mxu1 }
 0x110   : > { %v2577_v54 = vpack.c.bf16 %v1354_v46, %v1353_v42  ;;  %v2737_v55 = vpack.c.bf16 %v1418_v47, %v1417_v43  ;;  %v1352_v56 = vmax.f32 %v880_v48, 0.0  ;;  %v1416_v57 = vmax.f32 %v1136_v49, 0.0 }
 0x111   : > { %v901_v58 = vadd.f32 %v3028_v52, %v3460_v8  ;;  %v1157_v59 = vadd.f32 %v3092_v53, %v3460_v8  ;;  %v892_v60 = vpop.f32.mrf.mxu0  ;;  %v1148_v61 = vpop.f32.mrf.mxu1 }
 0x112   : > { %2865 = vst [vmem:[%s3475_s24 + $0x38] sm:$0xff] %v2577_v54   ;;  %2897 = vst [vmem:[%s3475_s24 + $0x138] sm:$0xff] %v2737_v55   ;;  %v2572_v62 = vpack.c.bf16 %v1352_v56, %v1351_v50  ;;  %v2732_v63 = vpack.c.bf16 %v1416_v57, %v1415_v51  ;;  %v893_v0 = vadd.f32 %v3460_v8, %v892_v60 }
 0x113   : > { %v1149_v1 = vadd.f32 %v3460_v8, %v1148_v61  ;;  %v3029_v2 = vpop.f32.mrf.mxu0  ;;  %v3093_v3 = vpop.f32.mrf.mxu1  ;;  %v1357_v6 = vmax.f32 %v901_v58, 0.0  ;;  %v1421_v7 = vmax.f32 %v1157_v59, 0.0 }
 0x114   : > { %2864 = vst [vmem:[%s3475_s24 + $0x30] sm:$0xff] %v2572_v62   ;;  %2896 = vst [vmem:[%s3475_s24 + $0x130] sm:$0xff] %v2732_v63   ;;  %v904_v4 = vadd.f32 %v3029_v2, %v3460_v8  ;;  %v1160_v5 = vadd.f32 %v3093_v3, %v3460_v8  ;;  %v1355_v15 = vmax.f32 %v893_v0, 0.0 }
 0x115   : > { %v895_v9 = vpop.f32.mrf.mxu0  ;;  %v1151_v10 = vpop.f32.mrf.mxu1  ;;  %v1419_v16 = vmax.f32 %v1149_v1, 0.0 }
 0x116   : > { %v1358_v11 = vmax.f32 %v904_v4, 0.0  ;;  %v1422_v12 = vmax.f32 %v1160_v5, 0.0  ;;  %v896_v13 = vadd.f32 %v3460_v8, %v895_v9  ;;  %v1152_v14 = vadd.f32 %v3460_v8, %v1151_v10 }
 0x117   : > { %v3032_v17 = vpop.f32.mrf.mxu0  ;;  %v3096_v18 = vpop.f32.mrf.mxu1 }
 0x118   : > { %v2587_v19 = vpack.c.bf16 %v1358_v11, %v1357_v6  ;;  %v2747_v20 = vpack.c.bf16 %v1422_v12, %v1421_v7  ;;  %v1356_v21 = vmax.f32 %v896_v13, 0.0  ;;  %v1420_v22 = vmax.f32 %v1152_v14, 0.0 }
 0x119   : > { %v917_v23 = vadd.f32 %v3032_v17, %v3460_v8  ;;  %v1173_v24 = vadd.f32 %v3096_v18, %v3460_v8  ;;  %v908_v25 = vpop.f32.mrf.mxu0  ;;  %v1164_v26 = vpop.f32.mrf.mxu1 }
 0x11a   : > { %2867 = vst [vmem:[%s3475_s24 + $0x48] sm:$0xff] %v2587_v19   ;;  %2899 = vst [vmem:[%s3475_s24 + $0x148] sm:$0xff] %v2747_v20   ;;  %v2582_v27 = vpack.c.bf16 %v1356_v21, %v1355_v15  ;;  %v2742_v28 = vpack.c.bf16 %v1420_v22, %v1419_v16  ;;  %v909_v29 = vadd.f32 %v3460_v8, %v908_v25 }
 0x11b   : > { %v1165_v30 = vadd.f32 %v3460_v8, %v1164_v26  ;;  %v3033_v31 = vpop.f32.mrf.mxu0  ;;  %v3097_v32 = vpop.f32.mrf.mxu1  ;;  %v1361_v35 = vmax.f32 %v917_v23, 0.0  ;;  %v1425_v36 = vmax.f32 %v1173_v24, 0.0 }
 0x11c   : > { %2866 = vst [vmem:[%s3475_s24 + $0x40] sm:$0xff] %v2582_v27   ;;  %2898 = vst [vmem:[%s3475_s24 + $0x140] sm:$0xff] %v2742_v28   ;;  %v920_v33 = vadd.f32 %v3033_v31, %v3460_v8  ;;  %v1176_v34 = vadd.f32 %v3097_v32, %v3460_v8  ;;  %v1359_v43 = vmax.f32 %v909_v29, 0.0 }
 0x11d   : > { %v911_v37 = vpop.f32.mrf.mxu0  ;;  %v1167_v38 = vpop.f32.mrf.mxu1  ;;  %v1423_v44 = vmax.f32 %v1165_v30, 0.0 }
 0x11e   : > { %v1362_v39 = vmax.f32 %v920_v33, 0.0  ;;  %v1426_v40 = vmax.f32 %v1176_v34, 0.0  ;;  %v912_v41 = vadd.f32 %v3460_v8, %v911_v37  ;;  %v1168_v42 = vadd.f32 %v3460_v8, %v1167_v38 }
 0x11f   : > { %v3036_v45 = vpop.f32.mrf.mxu0  ;;  %v3100_v46 = vpop.f32.mrf.mxu1 }
 0x120   : > { %v2597_v47 = vpack.c.bf16 %v1362_v39, %v1361_v35  ;;  %v2757_v48 = vpack.c.bf16 %v1426_v40, %v1425_v36  ;;  %v1360_v49 = vmax.f32 %v912_v41, 0.0  ;;  %v1424_v50 = vmax.f32 %v1168_v42, 0.0 }
 0x121   : > { %v933_v51 = vadd.f32 %v3036_v45, %v3460_v8  ;;  %v1189_v52 = vadd.f32 %v3100_v46, %v3460_v8  ;;  %v924_v53 = vpop.f32.mrf.mxu0  ;;  %v1180_v54 = vpop.f32.mrf.mxu1 }
 0x122   : > { %2869 = vst [vmem:[%s3475_s24 + $0x58] sm:$0xff] %v2597_v47   ;;  %2901 = vst [vmem:[%s3475_s24 + $0x158] sm:$0xff] %v2757_v48   ;;  %v2592_v55 = vpack.c.bf16 %v1360_v49, %v1359_v43  ;;  %v2752_v56 = vpack.c.bf16 %v1424_v50, %v1423_v44  ;;  %v925_v57 = vadd.f32 %v3460_v8, %v924_v53 }
 0x123   : > { %v1181_v58 = vadd.f32 %v3460_v8, %v1180_v54  ;;  %v3037_v59 = vpop.f32.mrf.mxu0  ;;  %v3101_v60 = vpop.f32.mrf.mxu1  ;;  %v1365_v63 = vmax.f32 %v933_v51, 0.0  ;;  %v1429_v0 = vmax.f32 %v1189_v52, 0.0 }
 0x124   : > { %2868 = vst [vmem:[%s3475_s24 + $0x50] sm:$0xff] %v2592_v55   ;;  %2900 = vst [vmem:[%s3475_s24 + $0x150] sm:$0xff] %v2752_v56   ;;  %v936_v61 = vadd.f32 %v3037_v59, %v3460_v8  ;;  %v1192_v62 = vadd.f32 %v3101_v60, %v3460_v8  ;;  %v1363_v7 = vmax.f32 %v925_v57, 0.0 }
 0x125   : > { %v927_v1 = vpop.f32.mrf.mxu0  ;;  %v1183_v2 = vpop.f32.mrf.mxu1  ;;  %v1427_v9 = vmax.f32 %v1181_v58, 0.0 }
 0x126   : > { %v1366_v3 = vmax.f32 %v936_v61, 0.0  ;;  %v1430_v4 = vmax.f32 %v1192_v62, 0.0  ;;  %v928_v5 = vadd.f32 %v3460_v8, %v927_v1  ;;  %v1184_v6 = vadd.f32 %v3460_v8, %v1183_v2 }
 0x127   : > { %v3040_v10 = vpop.f32.mrf.mxu0  ;;  %v3104_v11 = vpop.f32.mrf.mxu1 }
 0x128   : > { %v2607_v12 = vpack.c.bf16 %v1366_v3, %v1365_v63  ;;  %v2767_v13 = vpack.c.bf16 %v1430_v4, %v1429_v0  ;;  %v1364_v14 = vmax.f32 %v928_v5, 0.0  ;;  %v1428_v15 = vmax.f32 %v1184_v6, 0.0 }
 0x129   : > { %v949_v16 = vadd.f32 %v3040_v10, %v3460_v8  ;;  %v1205_v17 = vadd.f32 %v3104_v11, %v3460_v8  ;;  %v940_v18 = vpop.f32.mrf.mxu0  ;;  %v1196_v19 = vpop.f32.mrf.mxu1 }
 0x12a   : > { %2871 = vst [vmem:[%s3475_s24 + $0x68] sm:$0xff] %v2607_v12   ;;  %2903 = vst [vmem:[%s3475_s24 + $0x168] sm:$0xff] %v2767_v13   ;;  %v2602_v20 = vpack.c.bf16 %v1364_v14, %v1363_v7  ;;  %v2762_v21 = vpack.c.bf16 %v1428_v15, %v1427_v9  ;;  %v941_v22 = vadd.f32 %v3460_v8, %v940_v18 }
 0x12b   : > { %v1197_v23 = vadd.f32 %v3460_v8, %v1196_v19  ;;  %v3041_v24 = vpop.f32.mrf.mxu0  ;;  %v3105_v25 = vpop.f32.mrf.mxu1  ;;  %v1369_v28 = vmax.f32 %v949_v16, 0.0  ;;  %v1433_v29 = vmax.f32 %v1205_v17, 0.0 }
 0x12c   : > { %2870 = vst [vmem:[%s3475_s24 + $0x60] sm:$0xff] %v2602_v20   ;;  %2902 = vst [vmem:[%s3475_s24 + $0x160] sm:$0xff] %v2762_v21   ;;  %v952_v26 = vadd.f32 %v3041_v24, %v3460_v8  ;;  %v1208_v27 = vadd.f32 %v3105_v25, %v3460_v8  ;;  %v1367_v36 = vmax.f32 %v941_v22, 0.0 }
 0x12d   : > { %v943_v30 = vpop.f32.mrf.mxu0  ;;  %v1199_v31 = vpop.f32.mrf.mxu1  ;;  %v1431_v37 = vmax.f32 %v1197_v23, 0.0 }
 0x12e   : > { %v1370_v32 = vmax.f32 %v952_v26, 0.0  ;;  %v1434_v33 = vmax.f32 %v1208_v27, 0.0  ;;  %v944_v34 = vadd.f32 %v3460_v8, %v943_v30  ;;  %v1200_v35 = vadd.f32 %v3460_v8, %v1199_v31 }
 0x12f   : > { %v3044_v38 = vpop.f32.mrf.mxu0  ;;  %v3108_v39 = vpop.f32.mrf.mxu1 }
 0x130   : > { %v2617_v40 = vpack.c.bf16 %v1370_v32, %v1369_v28  ;;  %v2777_v41 = vpack.c.bf16 %v1434_v33, %v1433_v29  ;;  %v1368_v42 = vmax.f32 %v944_v34, 0.0  ;;  %v1432_v43 = vmax.f32 %v1200_v35, 0.0 }
 0x131   : > { %v965_v44 = vadd.f32 %v3044_v38, %v3460_v8  ;;  %v1221_v45 = vadd.f32 %v3108_v39, %v3460_v8  ;;  %v956_v46 = vpop.f32.mrf.mxu0  ;;  %v1212_v47 = vpop.f32.mrf.mxu1 }
 0x132   : > { %2873 = vst [vmem:[%s3475_s24 + $0x78] sm:$0xff] %v2617_v40   ;;  %2905 = vst [vmem:[%s3475_s24 + $0x178] sm:$0xff] %v2777_v41   ;;  %v2612_v48 = vpack.c.bf16 %v1368_v42, %v1367_v36  ;;  %v2772_v49 = vpack.c.bf16 %v1432_v43, %v1431_v37  ;;  %v957_v50 = vadd.f32 %v3460_v8, %v956_v46 }
 0x133   : > { %v1213_v51 = vadd.f32 %v3460_v8, %v1212_v47  ;;  %v3045_v52 = vpop.f32.mrf.mxu0  ;;  %v3109_v53 = vpop.f32.mrf.mxu1  ;;  %v1373_v56 = vmax.f32 %v965_v44, 0.0  ;;  %v1437_v57 = vmax.f32 %v1221_v45, 0.0 }
 0x134   : > { %2872 = vst [vmem:[%s3475_s24 + $0x70] sm:$0xff] %v2612_v48   ;;  %2904 = vst [vmem:[%s3475_s24 + $0x170] sm:$0xff] %v2772_v49   ;;  %v968_v54 = vadd.f32 %v3045_v52, %v3460_v8  ;;  %v1224_v55 = vadd.f32 %v3109_v53, %v3460_v8  ;;  %v1371_v0 = vmax.f32 %v957_v50, 0.0 }
 0x135   : > { %v959_v58 = vpop.f32.mrf.mxu0  ;;  %v1215_v59 = vpop.f32.mrf.mxu1  ;;  %v1435_v1 = vmax.f32 %v1213_v51, 0.0 }
 0x136   : > { %v1374_v60 = vmax.f32 %v968_v54, 0.0  ;;  %v1438_v61 = vmax.f32 %v1224_v55, 0.0  ;;  %v960_v62 = vadd.f32 %v3460_v8, %v959_v58  ;;  %v1216_v63 = vadd.f32 %v3460_v8, %v1215_v59 }
 0x137   : > { %v3048_v2 = vpop.f32.mrf.mxu0  ;;  %v3112_v3 = vpop.f32.mrf.mxu1 }
 0x138   : > { %v2627_v4 = vpack.c.bf16 %v1374_v60, %v1373_v56  ;;  %v2787_v5 = vpack.c.bf16 %v1438_v61, %v1437_v57  ;;  %v1372_v6 = vmax.f32 %v960_v62, 0.0  ;;  %v1436_v7 = vmax.f32 %v1216_v63, 0.0 }
 0x139   : > { %v981_v9 = vadd.f32 %v3048_v2, %v3460_v8  ;;  %v1237_v10 = vadd.f32 %v3112_v3, %v3460_v8  ;;  %v972_v11 = vpop.f32.mrf.mxu0  ;;  %v1228_v12 = vpop.f32.mrf.mxu1 }
 0x13a   : > { %2875 = vst [vmem:[%s3475_s24 + $0x88] sm:$0xff] %v2627_v4   ;;  %2907 = vst [vmem:[%s3475_s24 + $0x188] sm:$0xff] %v2787_v5   ;;  %v2622_v13 = vpack.c.bf16 %v1372_v6, %v1371_v0  ;;  %v2782_v14 = vpack.c.bf16 %v1436_v7, %v1435_v1  ;;  %v973_v15 = vadd.f32 %v3460_v8, %v972_v11 }
 0x13b   : > { %v1229_v16 = vadd.f32 %v3460_v8, %v1228_v12  ;;  %v3049_v17 = vpop.f32.mrf.mxu0  ;;  %v3113_v18 = vpop.f32.mrf.mxu1  ;;  %v1377_v21 = vmax.f32 %v981_v9, 0.0  ;;  %v1441_v22 = vmax.f32 %v1237_v10, 0.0 }
 0x13c   : > { %2874 = vst [vmem:[%s3475_s24 + $0x80] sm:$0xff] %v2622_v13   ;;  %2906 = vst [vmem:[%s3475_s24 + $0x180] sm:$0xff] %v2782_v14   ;;  %v984_v19 = vadd.f32 %v3049_v17, %v3460_v8  ;;  %v1240_v20 = vadd.f32 %v3113_v18, %v3460_v8  ;;  %v1375_v29 = vmax.f32 %v973_v15, 0.0 }
 0x13d   : > { %v975_v23 = vpop.f32.mrf.mxu0  ;;  %v1231_v24 = vpop.f32.mrf.mxu1  ;;  %v1439_v30 = vmax.f32 %v1229_v16, 0.0 }
 0x13e   : > { %v1378_v25 = vmax.f32 %v984_v19, 0.0  ;;  %v1442_v26 = vmax.f32 %v1240_v20, 0.0  ;;  %v976_v27 = vadd.f32 %v3460_v8, %v975_v23  ;;  %v1232_v28 = vadd.f32 %v3460_v8, %v1231_v24 }
 0x13f   : > { %v3052_v31 = vpop.f32.mrf.mxu0  ;;  %v3116_v32 = vpop.f32.mrf.mxu1 }
 0x140   : > { %v2637_v33 = vpack.c.bf16 %v1378_v25, %v1377_v21  ;;  %v2797_v34 = vpack.c.bf16 %v1442_v26, %v1441_v22  ;;  %v1376_v35 = vmax.f32 %v976_v27, 0.0  ;;  %v1440_v36 = vmax.f32 %v1232_v28, 0.0 }
 0x141   : > { %v997_v37 = vadd.f32 %v3052_v31, %v3460_v8  ;;  %v1253_v38 = vadd.f32 %v3116_v32, %v3460_v8  ;;  %v988_v39 = vpop.f32.mrf.mxu0  ;;  %v1244_v40 = vpop.f32.mrf.mxu1 }
 0x142   : > { %2877 = vst [vmem:[%s3475_s24 + $0x98] sm:$0xff] %v2637_v33   ;;  %2909 = vst [vmem:[%s3475_s24 + $0x198] sm:$0xff] %v2797_v34   ;;  %v2632_v41 = vpack.c.bf16 %v1376_v35, %v1375_v29  ;;  %v2792_v42 = vpack.c.bf16 %v1440_v36, %v1439_v30  ;;  %v989_v43 = vadd.f32 %v3460_v8, %v988_v39 }
 0x143   : > { %v1245_v44 = vadd.f32 %v3460_v8, %v1244_v40  ;;  %v3053_v45 = vpop.f32.mrf.mxu0  ;;  %v3117_v46 = vpop.f32.mrf.mxu1  ;;  %v1381_v49 = vmax.f32 %v997_v37, 0.0  ;;  %v1445_v50 = vmax.f32 %v1253_v38, 0.0 }
 0x144   : > { %2876 = vst [vmem:[%s3475_s24 + $0x90] sm:$0xff] %v2632_v41   ;;  %2908 = vst [vmem:[%s3475_s24 + $0x190] sm:$0xff] %v2792_v42   ;;  %v1000_v47 = vadd.f32 %v3053_v45, %v3460_v8  ;;  %v1256_v48 = vadd.f32 %v3117_v46, %v3460_v8  ;;  %v1379_v57 = vmax.f32 %v989_v43, 0.0 }
 0x145   : > { %v991_v51 = vpop.f32.mrf.mxu0  ;;  %v1247_v52 = vpop.f32.mrf.mxu1  ;;  %v1443_v58 = vmax.f32 %v1245_v44, 0.0 }
 0x146   : > { %v1382_v53 = vmax.f32 %v1000_v47, 0.0  ;;  %v1446_v54 = vmax.f32 %v1256_v48, 0.0  ;;  %v992_v55 = vadd.f32 %v3460_v8, %v991_v51  ;;  %v1248_v56 = vadd.f32 %v3460_v8, %v1247_v52 }
 0x147   : > { %v3056_v59 = vpop.f32.mrf.mxu0  ;;  %v3120_v60 = vpop.f32.mrf.mxu1 }
 0x148   : > { %v2647_v61 = vpack.c.bf16 %v1382_v53, %v1381_v49  ;;  %v2807_v62 = vpack.c.bf16 %v1446_v54, %v1445_v50  ;;  %v1380_v63 = vmax.f32 %v992_v55, 0.0  ;;  %v1444_v0 = vmax.f32 %v1248_v56, 0.0 }
 0x149   : > { %v1013_v1 = vadd.f32 %v3056_v59, %v3460_v8  ;;  %v1269_v2 = vadd.f32 %v3120_v60, %v3460_v8  ;;  %v1004_v3 = vpop.f32.mrf.mxu0  ;;  %v1260_v4 = vpop.f32.mrf.mxu1 }
 0x14a   : > { %2879 = vst [vmem:[%s3475_s24 + $0xa8] sm:$0xff] %v2647_v61   ;;  %2911 = vst [vmem:[%s3475_s24 + $0x1a8] sm:$0xff] %v2807_v62   ;;  %v2642_v5 = vpack.c.bf16 %v1380_v63, %v1379_v57  ;;  %v2802_v6 = vpack.c.bf16 %v1444_v0, %v1443_v58  ;;  %v1005_v7 = vadd.f32 %v3460_v8, %v1004_v3 }
 0x14b   : > { %v1261_v9 = vadd.f32 %v3460_v8, %v1260_v4  ;;  %v3057_v10 = vpop.f32.mrf.mxu0  ;;  %v3121_v11 = vpop.f32.mrf.mxu1  ;;  %v1385_v14 = vmax.f32 %v1013_v1, 0.0  ;;  %v1449_v15 = vmax.f32 %v1269_v2, 0.0 }
 0x14c   : > { %2878 = vst [vmem:[%s3475_s24 + $0xa0] sm:$0xff] %v2642_v5   ;;  %2910 = vst [vmem:[%s3475_s24 + $0x1a0] sm:$0xff] %v2802_v6   ;;  %v1016_v12 = vadd.f32 %v3057_v10, %v3460_v8  ;;  %v1272_v13 = vadd.f32 %v3121_v11, %v3460_v8  ;;  %v1383_v22 = vmax.f32 %v1005_v7, 0.0 }
 0x14d   : > { %v1007_v16 = vpop.f32.mrf.mxu0  ;;  %v1263_v17 = vpop.f32.mrf.mxu1  ;;  %v1447_v23 = vmax.f32 %v1261_v9, 0.0 }
 0x14e   : > { %v1386_v18 = vmax.f32 %v1016_v12, 0.0  ;;  %v1450_v19 = vmax.f32 %v1272_v13, 0.0  ;;  %v1008_v20 = vadd.f32 %v3460_v8, %v1007_v16  ;;  %v1264_v21 = vadd.f32 %v3460_v8, %v1263_v17 }
 0x14f   : > { %v3060_v24 = vpop.f32.mrf.mxu0  ;;  %v3124_v25 = vpop.f32.mrf.mxu1 }
 0x150   : > { %v2657_v26 = vpack.c.bf16 %v1386_v18, %v1385_v14  ;;  %v2817_v27 = vpack.c.bf16 %v1450_v19, %v1449_v15  ;;  %v1384_v28 = vmax.f32 %v1008_v20, 0.0  ;;  %v1448_v29 = vmax.f32 %v1264_v21, 0.0 }
 0x151   : > { %v1029_v30 = vadd.f32 %v3060_v24, %v3460_v8  ;;  %v1285_v31 = vadd.f32 %v3124_v25, %v3460_v8  ;;  %v1020_v32 = vpop.f32.mrf.mxu0  ;;  %v1276_v33 = vpop.f32.mrf.mxu1 }
 0x152   : > { %2881 = vst [vmem:[%s3475_s24 + $0xb8] sm:$0xff] %v2657_v26   ;;  %2913 = vst [vmem:[%s3475_s24 + $0x1b8] sm:$0xff] %v2817_v27   ;;  %v2652_v34 = vpack.c.bf16 %v1384_v28, %v1383_v22  ;;  %v2812_v35 = vpack.c.bf16 %v1448_v29, %v1447_v23  ;;  %v1021_v36 = vadd.f32 %v3460_v8, %v1020_v32 }
 0x153   : > { %v1277_v37 = vadd.f32 %v3460_v8, %v1276_v33  ;;  %v3061_v38 = vpop.f32.mrf.mxu0  ;;  %v3125_v39 = vpop.f32.mrf.mxu1  ;;  %v1389_v42 = vmax.f32 %v1029_v30, 0.0  ;;  %v1453_v43 = vmax.f32 %v1285_v31, 0.0 }
 0x154   : > { %2880 = vst [vmem:[%s3475_s24 + $0xb0] sm:$0xff] %v2652_v34   ;;  %2912 = vst [vmem:[%s3475_s24 + $0x1b0] sm:$0xff] %v2812_v35   ;;  %v1032_v40 = vadd.f32 %v3061_v38, %v3460_v8  ;;  %v1288_v41 = vadd.f32 %v3125_v39, %v3460_v8  ;;  %v1387_v50 = vmax.f32 %v1021_v36, 0.0 }
 0x155   : > { %v1023_v44 = vpop.f32.mrf.mxu0  ;;  %v1279_v45 = vpop.f32.mrf.mxu1  ;;  %v1451_v51 = vmax.f32 %v1277_v37, 0.0 }
 0x156   : > { %v1390_v46 = vmax.f32 %v1032_v40, 0.0  ;;  %v1454_v47 = vmax.f32 %v1288_v41, 0.0  ;;  %v1024_v48 = vadd.f32 %v3460_v8, %v1023_v44  ;;  %v1280_v49 = vadd.f32 %v3460_v8, %v1279_v45 }
 0x157   : > { %v3064_v52 = vpop.f32.mrf.mxu0  ;;  %v3128_v53 = vpop.f32.mrf.mxu1 }
 0x158   : > { %v2667_v54 = vpack.c.bf16 %v1390_v46, %v1389_v42  ;;  %v2827_v55 = vpack.c.bf16 %v1454_v47, %v1453_v43  ;;  %v1388_v56 = vmax.f32 %v1024_v48, 0.0  ;;  %v1452_v57 = vmax.f32 %v1280_v49, 0.0 }
 0x159   : > { %v1045_v58 = vadd.f32 %v3064_v52, %v3460_v8  ;;  %v1301_v59 = vadd.f32 %v3128_v53, %v3460_v8  ;;  %v1036_v60 = vpop.f32.mrf.mxu0  ;;  %v1292_v61 = vpop.f32.mrf.mxu1 }
 0x15a   : > { %2883 = vst [vmem:[%s3475_s24 + $0xc8] sm:$0xff] %v2667_v54   ;;  %2915 = vst [vmem:[%s3475_s24 + $0x1c8] sm:$0xff] %v2827_v55   ;;  %v2662_v62 = vpack.c.bf16 %v1388_v56, %v1387_v50  ;;  %v2822_v63 = vpack.c.bf16 %v1452_v57, %v1451_v51  ;;  %v1037_v0 = vadd.f32 %v3460_v8, %v1036_v60 }
 0x15b   : > { %v1293_v1 = vadd.f32 %v3460_v8, %v1292_v61  ;;  %v3065_v2 = vpop.f32.mrf.mxu0  ;;  %v3129_v3 = vpop.f32.mrf.mxu1  ;;  %v1393_v6 = vmax.f32 %v1045_v58, 0.0  ;;  %v1457_v7 = vmax.f32 %v1301_v59, 0.0 }
 0x15c   : > { %2882 = vst [vmem:[%s3475_s24 + $0xc0] sm:$0xff] %v2662_v62   ;;  %2914 = vst [vmem:[%s3475_s24 + $0x1c0] sm:$0xff] %v2822_v63   ;;  %v1048_v4 = vadd.f32 %v3065_v2, %v3460_v8  ;;  %v1304_v5 = vadd.f32 %v3129_v3, %v3460_v8  ;;  %v1391_v15 = vmax.f32 %v1037_v0, 0.0 }
 0x15d   : > { %v1039_v9 = vpop.f32.mrf.mxu0  ;;  %v1295_v10 = vpop.f32.mrf.mxu1  ;;  %v1455_v16 = vmax.f32 %v1293_v1, 0.0 }
 0x15e   : > { %v1394_v11 = vmax.f32 %v1048_v4, 0.0  ;;  %v1458_v12 = vmax.f32 %v1304_v5, 0.0  ;;  %v1040_v13 = vadd.f32 %v3460_v8, %v1039_v9  ;;  %v1296_v14 = vadd.f32 %v3460_v8, %v1295_v10 }
 0x15f   : > { %v3068_v17 = vpop.f32.mrf.mxu0  ;;  %v3132_v18 = vpop.f32.mrf.mxu1 }
 0x160   : > { %v2677_v19 = vpack.c.bf16 %v1394_v11, %v1393_v6  ;;  %v2837_v20 = vpack.c.bf16 %v1458_v12, %v1457_v7  ;;  %v1392_v21 = vmax.f32 %v1040_v13, 0.0  ;;  %v1456_v22 = vmax.f32 %v1296_v14, 0.0 }
 0x161   : > { %v1061_v23 = vadd.f32 %v3068_v17, %v3460_v8  ;;  %v1317_v24 = vadd.f32 %v3132_v18, %v3460_v8  ;;  %v1052_v25 = vpop.f32.mrf.mxu0  ;;  %v1308_v26 = vpop.f32.mrf.mxu1 }
 0x162   : > { %2885 = vst [vmem:[%s3475_s24 + $0xd8] sm:$0xff] %v2677_v19   ;;  %2917 = vst [vmem:[%s3475_s24 + $0x1d8] sm:$0xff] %v2837_v20   ;;  %v2672_v27 = vpack.c.bf16 %v1392_v21, %v1391_v15  ;;  %v2832_v28 = vpack.c.bf16 %v1456_v22, %v1455_v16  ;;  %v1053_v29 = vadd.f32 %v3460_v8, %v1052_v25 }
 0x163   : > { %v1309_v30 = vadd.f32 %v3460_v8, %v1308_v26  ;;  %v3069_v31 = vpop.f32.mrf.mxu0  ;;  %v3133_v32 = vpop.f32.mrf.mxu1  ;;  %v1397_v35 = vmax.f32 %v1061_v23, 0.0  ;;  %v1461_v36 = vmax.f32 %v1317_v24, 0.0 }
 0x164   : > { %2884 = vst [vmem:[%s3475_s24 + $0xd0] sm:$0xff] %v2672_v27   ;;  %2916 = vst [vmem:[%s3475_s24 + $0x1d0] sm:$0xff] %v2832_v28   ;;  %v1064_v33 = vadd.f32 %v3069_v31, %v3460_v8  ;;  %v1320_v34 = vadd.f32 %v3133_v32, %v3460_v8  ;;  %v1395_v43 = vmax.f32 %v1053_v29, 0.0 }
 0x165   : > { %v1055_v37 = vpop.f32.mrf.mxu0  ;;  %v1311_v38 = vpop.f32.mrf.mxu1  ;;  %v1459_v44 = vmax.f32 %v1309_v30, 0.0 }
 0x166   : > { %v1398_v39 = vmax.f32 %v1064_v33, 0.0  ;;  %v1462_v40 = vmax.f32 %v1320_v34, 0.0  ;;  %v1056_v41 = vadd.f32 %v3460_v8, %v1055_v37  ;;  %v1312_v42 = vadd.f32 %v3460_v8, %v1311_v38 }
 0x167   : > { %v3072_v45 = vpop.f32.mrf.mxu0  ;;  %v3136_v46 = vpop.f32.mrf.mxu1 }
 0x168   : > { %v2687_v47 = vpack.c.bf16 %v1398_v39, %v1397_v35  ;;  %v2847_v48 = vpack.c.bf16 %v1462_v40, %v1461_v36  ;;  %v1396_v49 = vmax.f32 %v1056_v41, 0.0  ;;  %v1460_v50 = vmax.f32 %v1312_v42, 0.0 }
 0x169   : > { %v1077_v51 = vadd.f32 %v3072_v45, %v3460_v8  ;;  %v1333_v52 = vadd.f32 %v3136_v46, %v3460_v8  ;;  %v1068_v53 = vpop.f32.mrf.mxu0  ;;  %v1324_v54 = vpop.f32.mrf.mxu1 }
 0x16a   : > { %2887 = vst [vmem:[%s3475_s24 + $0xe8] sm:$0xff] %v2687_v47   ;;  %2919 = vst [vmem:[%s3475_s24 + $0x1e8] sm:$0xff] %v2847_v48   ;;  %v2682_v55 = vpack.c.bf16 %v1396_v49, %v1395_v43  ;;  %v2842_v56 = vpack.c.bf16 %v1460_v50, %v1459_v44  ;;  %v1069_v57 = vadd.f32 %v3460_v8, %v1068_v53 }
 0x16b   : > { %v1325_v58 = vadd.f32 %v3460_v8, %v1324_v54  ;;  %v3073_v59 = vpop.f32.mrf.mxu0  ;;  %v3137_v60 = vpop.f32.mrf.mxu1  ;;  %v1401_v63 = vmax.f32 %v1077_v51, 0.0  ;;  %v1465_v0 = vmax.f32 %v1333_v52, 0.0 }
 0x16c   : > { %2886 = vst [vmem:[%s3475_s24 + $0xe0] sm:$0xff] %v2682_v55   ;;  %2918 = vst [vmem:[%s3475_s24 + $0x1e0] sm:$0xff] %v2842_v56   ;;  %v1080_v61 = vadd.f32 %v3073_v59, %v3460_v8  ;;  %v1336_v62 = vadd.f32 %v3137_v60, %v3460_v8  ;;  %v1399_v7 = vmax.f32 %v1069_v57, 0.0 }
 0x16d   : > { %v1071_v1 = vpop.f32.mrf.mxu0  ;;  %v1327_v2 = vpop.f32.mrf.mxu1  ;;  %v1463_v9 = vmax.f32 %v1325_v58, 0.0 }
 0x16e   : > { %v1402_v3 = vmax.f32 %v1080_v61, 0.0  ;;  %v1466_v4 = vmax.f32 %v1336_v62, 0.0  ;;  %v1072_v5 = vadd.f32 %v3460_v8, %v1071_v1  ;;  %v1328_v6 = vadd.f32 %v3460_v8, %v1327_v2 }
 0x170   : > { %v2697_v10 = vpack.c.bf16 %v1402_v3, %v1401_v63  ;;  %v2857_v11 = vpack.c.bf16 %v1466_v4, %v1465_v0  ;;  %v1400_v12 = vmax.f32 %v1072_v5, 0.0  ;;  %v1464_v13 = vmax.f32 %v1328_v6, 0.0 }
 0x172   : > { %2889 = vst [vmem:[%s3475_s24 + $0xf8] sm:$0xff] %v2697_v10   ;;  %2921 = vst [vmem:[%s3475_s24 + $0x1f8] sm:$0xff] %v2857_v11   ;;  %v2692_v14 = vpack.c.bf16 %v1400_v12, %v1399_v7  ;;  %v2852_v15 = vpack.c.bf16 %v1464_v13, %v1463_v9 }
 0x174   : > { %2888 = vst [vmem:[%s3475_s24 + $0xf0] sm:$0xff] %v2692_v14   ;;  %2920 = vst [vmem:[%s3475_s24 + $0x1f0] sm:$0xff] %v2852_v15  }
 0x175 PF: > { %s13_s16 = sadd.s32 1, %s3304_s16   ;;  %s3680_s12 = smov %s3296_s14 }
 0x176   : > { %p10_p7 = scmp.ge.s32.totalorder %s13_s16, 10   ;;  %s3681_s13 = smov %s3300_s15 }
 0x177   : > { %s3682_s14 = smov %s3685_s17  ;;  %s3683_s15 = smov %s3689_s18 }
 0x178   :  { %12 = sbr.rel (!%p10_p7) target bundleno = 3 (0x3), region = 62 }

// kernel: vgg6_forward.7
= control target key start
LH: loop header
LB: loop body
LE: loop exit
PB: predicated region body
PF: predicated region fallthrough
CT: control target
= control target key end

     0   :  { %s3664_s12 = smov 0   ;;  %s3666_s13 = smov 0   ;;  %s4140_s0 = inlined_call_operand.vmem [shape: bf16[2,4096,256], index: 0, kind: input, shape index: {}]   ;;  %s4141_s1 = inlined_call_operand.vmem [shape: bf16[256,128], index: 1, kind: input, shape index: {}]   ;;  %s4142_s2 = inlined_call_operand.vmem [shape: f32[1,128], index: 2, kind: input, shape index: {}]   ;;  %s4143_s3 = inlined_call_operand.vmem [shape: bf16[2,4096,128], index: 3, kind: output, shape index: {}]  }
   0x1   :  { %s3668_s14 = smov 0   ;;  %s3670_s15 = smov 0  }
   0x2   :  { %s3672_s16 = smov 0  }
   0x3 LB: > { %s22_s17 = sadd.s32 1, %s3633_s14  ;;  %s25_s18 = sadd.s32 1, %s3637_s15  ;;  %s3641_s16 = sphi %s3672_s16, %s13_s16   ;;  %s3637_s15 = sphi %s3670_s15, %s4147_s15   ;;  %s3633_s14 = sphi %s3668_s14, %s4146_s14   ;;  %s3629_s13 = sphi %s3666_s13, %s4145_s13   ;;  %s3625_s12 = sphi %s3664_s12, %s4144_s12  }
   0x4   : > { %p23_p0 = scmp.ge.s32.totalorder %s22_s17, 4  ;;  %p2527_p1 = scmp.ge.s32.totalorder %s3641_s16, 1 }
   0x5   : > { %p159_p2 = scmp.lt.s32.totalorder %s3641_s16, 9 }
   0x6   : > { %s4149_s17 = smov (%p23_p0, %s22_s17), 0  ;;  %s4151_s18 = smov (!%p23_p0, %s25_s18), %s3637_s15 }
   0x7   : > { %p160_p3 = pnand %p2527_p1, %p159_p2  ;;  %p27_p4 = scmp.ge.s32.totalorder %s4151_s18, 2 }
   0x8   : > { %s2528_s21 = sshll.u32 (!%p160_p3), %s3625_s12, 7  ;;  %p193_p5 = scmp.lt.s32.totalorder (!%p160_p3), %s3629_s13, 1 }
   0x9   : > { %s4153_s18 = smov (%p27_p4, %s4151_s18), 0  ;;  %163 = sbr.rel (%p160_p3) target bundleno = 531 (0x213), region = 32 }
   0xa   : > { %p195_p6 = scmp.lt.s32.totalorder (!%p160_p3), %s2528_s21, 511 }
   0xe   : > { %v3394_v0 = vld [vmem:[%s4141_s1 + $0x38] sm:$0xff]   ;;  %v3643_v1 = vmov 0   ;;  %v3395_v2 = vld [vmem:[%s4141_s1 + $0x30] sm:$0xff]   ;;  %s4155_s13 = smov (!%p193_p5, %s3629_s13), 1  ;;  %s4157_s21 = smov (!%p195_p6, %s2528_s21), 511  ;;  %v3396_v3 = vld [vmem:[%s4141_s1 + $0x28] sm:$0xff]  }
   0xf   : > { %1117 = vmatprep.subr.bf16.mxu0 %v3643_v1  ;;  %3321 = vmatprep.subr.bf16.mxu1 %v3643_v1  ;;  %s2530_s26 = sshll.u32 %s4155_s13, 10  ;;  %s2529_s27 = sshll.u32 %s4157_s21, 1  ;;  %v3397_v4 = vld [vmem:[%s4141_s1 + $0x20] sm:$0xff]   ;;  %v3398_v5 = vld [vmem:[%s4141_s1 + $0x18] sm:$0xff]   ;;  %v3399_v7 = vld [vmem:[%s4141_s1 + $0x10] sm:$0xff]  }
  0x10   : > { %1118 = vmatpush1.bf16.msra.mxu0 %v3394_v0  ;;  %3337 = vmatpush1.bf16.msra.mxu1 %v3394_v0  ;;  %s199_s28 = sadd.s32 %s2530_s26, %s2529_s27  ;;  %v3400_v9 = vld [vmem:[%s4141_s1 + $0x8] sm:$0xff]   ;;  %v3401_v10 = vld [vmem:[%s4141_s1] sm:$0xff]   ;;  %v3402_v11 = vld [vmem:[%s4141_s1 + $0x78] sm:$0xff]   ;;  %s2533_s19 = sshll.u32 %s4155_s13, 9 }
  0x11   : > { %1119 = vmatprep.subr.bf16.mxu0 %v3643_v1  ;;  %3322 = vmatprep.subr.bf16.mxu1 %v3643_v1  ;;  %s2531_s4 = sshll.u32 %s199_s28, 2  ;;  %v3403_v12 = vld [vmem:[%s4141_s1 + $0x70] sm:$0xff]   ;;  %v3404_v13 = vld [vmem:[%s4141_s1 + $0x68] sm:$0xff]   ;;  %v3405_v14 = vld [vmem:[%s4141_s1 + $0x60] sm:$0xff]   ;;  %s209_s23 = sadd.s32 %s2533_s19, %s4157_s21 }
  0x12   : > { %s3729_s9 = scalar_lea.vmem %s4140_s0, %s2531_s4  ;;  %v3406_v15 = vld [vmem:[%s4141_s1 + $0x58] sm:$0xff]   ;;  %v3407_v16 = vld [vmem:[%s4141_s1 + $0x50] sm:$0xff]   ;;  %v3408_v17 = vld [vmem:[%s4141_s1 + $0x48] sm:$0xff]   ;;  %s2534_s13 = sshll.u32 %s209_s23, 2 }
  0x13   : > { %v3412_v6 = vld [vmem:[%s3729_s9 + $0x4] ss:$8 sps:$4 sm:$0xff]   ;;  %v3410_v19 = vld [vmem:[%s3729_s9] ss:$8 sps:$4 sm:$0xff]   ;;  %v3416_v21 = vld [vmem:[%s3729_s9 + $0x14] ss:$8 sps:$4 sm:$0xff]   ;;  %s3908_s25 = scalar_lea.vmem %s4143_s3, %s2534_s13 }
  0x14   : > { %1120 = vmatpush1.bf16.msra.mxu0 %v3395_v2  ;;  %3338 = vmatpush1.bf16.msra.mxu1 %v3395_v2  ;;  %v3415_v8 = vld [vmem:[%s3729_s9 + $0x204] ss:$8 sps:$4 sm:$0xff]   ;;  %v3413_v20 = vld [vmem:[%s3729_s9 + $0x200] ss:$8 sps:$4 sm:$0xff]   ;;  %v3418_v22 = vld [vmem:[%s3729_s9 + $0x214] ss:$8 sps:$4 sm:$0xff]  }
  0x15   : > { %1121 = vmatprep.subr.bf16.mxu0 %v3643_v1  ;;  %3323 = vmatprep.subr.bf16.mxu1 %v3643_v1  ;;  %v3409_v18 = vld [vmem:[%s4141_s1 + $0x40] sm:$0xff]   ;;  %v3420_v23 = vld [vmem:[%s3729_s9 + $0x10] ss:$8 sps:$4 sm:$0xff]   ;;  %v3428_v29 = vld [vmem:[%s3729_s9 + $0x34] ss:$8 sps:$4 sm:$0xff]  }
  0x16   : > { %1149 = vmatprep.mubr.bf16.mxu0 %v3412_v6  ;;  %1405 = vmatprep.mubr.bf16.mxu1 %v3415_v8  ;;  %v3421_v24 = vld [vmem:[%s3729_s9 + $0x210] ss:$8 sps:$4 sm:$0xff]   ;;  %v3422_v25 = vld [vmem:[%s3729_s9 + $0x24] ss:$8 sps:$4 sm:$0xff]   ;;  %v3426_v27 = vld [vmem:[%s3729_s9 + $0x20] ss:$8 sps:$4 sm:$0xff]  }
  0x17   : > { %v3424_v26 = vld [vmem:[%s3729_s9 + $0x224] ss:$8 sps:$4 sm:$0xff]   ;;  %v3427_v28 = vld [vmem:[%s3729_s9 + $0x220] ss:$8 sps:$4 sm:$0xff]   ;;  %v3430_v30 = vld [vmem:[%s3729_s9 + $0x234] ss:$8 sps:$4 sm:$0xff]  }
  0x18   : > { %1122 = vmatpush1.bf16.msra.mxu0 %v3396_v3  ;;  %3339 = vmatpush1.bf16.msra.mxu1 %v3396_v3  ;;  %v3432_v31 = vld [vmem:[%s3729_s9 + $0x30] ss:$8 sps:$4 sm:$0xff]   ;;  %v3434_v33 = vld [vmem:[%s3729_s9 + $0x44] ss:$8 sps:$4 sm:$0xff]   ;;  %v3438_v35 = vld [vmem:[%s3729_s9 + $0x40] ss:$8 sps:$4 sm:$0xff]  }
  0x19   : > { %1123 = vmatprep.subr.bf16.mxu0 %v3643_v1  ;;  %3324 = vmatprep.subr.bf16.mxu1 %v3643_v1  ;;  %v3433_v32 = vld [vmem:[%s3729_s9 + $0x230] ss:$8 sps:$4 sm:$0xff]   ;;  %v3436_v34 = vld [vmem:[%s3729_s9 + $0x244] ss:$8 sps:$4 sm:$0xff]   ;;  %v3439_v36 = vld [vmem:[%s3729_s9 + $0x240] ss:$8 sps:$4 sm:$0xff]  }
  0x1a   : > { %v3440_v37 = vld [vmem:[%s3729_s9 + $0x54] ss:$8 sps:$4 sm:$0xff]   ;;  %v3444_v39 = vld [vmem:[%s3729_s9 + $0x50] ss:$8 sps:$4 sm:$0xff]   ;;  %v3446_v41 = vld [vmem:[%s3729_s9 + $0x64] ss:$8 sps:$4 sm:$0xff]  }
  0x1b   : > { %v3442_v38 = vld [vmem:[%s3729_s9 + $0x254] ss:$8 sps:$4 sm:$0xff]   ;;  %v3445_v40 = vld [vmem:[%s3729_s9 + $0x250] ss:$8 sps:$4 sm:$0xff]   ;;  %v3448_v42 = vld [vmem:[%s3729_s9 + $0x264] ss:$8 sps:$4 sm:$0xff]  }
  0x1c   : > { %1124 = vmatpush1.bf16.msra.mxu0 %v3397_v4  ;;  %3340 = vmatpush1.bf16.msra.mxu1 %v3397_v4  ;;  %v3450_v43 = vld [vmem:[%s3729_s9 + $0x60] ss:$8 sps:$4 sm:$0xff]   ;;  %v3452_v45 = vld [vmem:[%s3729_s9 + $0x74] ss:$8 sps:$4 sm:$0xff]   ;;  %v3456_v47 = vld [vmem:[%s3729_s9 + $0x70] ss:$8 sps:$4 sm:$0xff]  }
  0x1d   : > { %1125 = vmatprep.subr.bf16.mxu0 %v3643_v1  ;;  %3325 = vmatprep.subr.bf16.mxu1 %v3643_v1  ;;  %v3451_v44 = vld [vmem:[%s3729_s9 + $0x260] ss:$8 sps:$4 sm:$0xff]   ;;  %v3454_v46 = vld [vmem:[%s3729_s9 + $0x274] ss:$8 sps:$4 sm:$0xff]   ;;  %v3457_v48 = vld [vmem:[%s3729_s9 + $0x270] ss:$8 sps:$4 sm:$0xff]  }
  0x1e   : > { %v3458_v49 = vld [vmem:[%s3729_s9 + $0x84] ss:$8 sps:$4 sm:$0xff]   ;;  %v3462_v51 = vld [vmem:[%s3729_s9 + $0x80] ss:$8 sps:$4 sm:$0xff]   ;;  %v3464_v53 = vld [vmem:[%s3729_s9 + $0x94] ss:$8 sps:$4 sm:$0xff]  }
  0x1f   : > { %v3460_v50 = vld [vmem:[%s3729_s9 + $0x284] ss:$8 sps:$4 sm:$0xff]   ;;  %v3463_v52 = vld [vmem:[%s3729_s9 + $0x280] ss:$8 sps:$4 sm:$0xff]   ;;  %v3466_v54 = vld [vmem:[%s3729_s9 + $0x294] ss:$8 sps:$4 sm:$0xff]  }
  0x20   : > { %1126 = vmatpush1.bf16.msra.mxu0 %v3398_v5  ;;  %3341 = vmatpush1.bf16.msra.mxu1 %v3398_v5  ;;  %v3468_v55 = vld [vmem:[%s3729_s9 + $0x90] ss:$8 sps:$4 sm:$0xff]   ;;  %v3470_v57 = vld [vmem:[%s3729_s9 + $0xa4] ss:$8 sps:$4 sm:$0xff]   ;;  %v3474_v59 = vld [vmem:[%s3729_s9 + $0xa0] ss:$8 sps:$4 sm:$0xff]  }
  0x21   : > { %1127 = vmatprep.subr.bf16.mxu0 %v3643_v1  ;;  %3326 = vmatprep.subr.bf16.mxu1 %v3643_v1  ;;  %v3469_v56 = vld [vmem:[%s3729_s9 + $0x290] ss:$8 sps:$4 sm:$0xff]   ;;  %v3472_v58 = vld [vmem:[%s3729_s9 + $0x2a4] ss:$8 sps:$4 sm:$0xff]   ;;  %v3475_v60 = vld [vmem:[%s3729_s9 + $0x2a0] ss:$8 sps:$4 sm:$0xff]  }
  0x22   : > { %v3476_v61 = vld [vmem:[%s3729_s9 + $0xb4] ss:$8 sps:$4 sm:$0xff]   ;;  %v3480_v63 = vld [vmem:[%s3729_s9 + $0xb0] ss:$8 sps:$4 sm:$0xff]   ;;  %v3484_v2 = vld [vmem:[%s3729_s9 + $0x2c4] ss:$8 sps:$4 sm:$0xff]  }
  0x23   : > { %v3478_v62 = vld [vmem:[%s3729_s9 + $0x2b4] ss:$8 sps:$4 sm:$0xff]   ;;  %v3481_v0 = vld [vmem:[%s3729_s9 + $0x2b0] ss:$8 sps:$4 sm:$0xff]   ;;  %v3486_v3 = vld [vmem:[%s3729_s9 + $0xc0] ss:$8 sps:$4 sm:$0xff]  }
  0x24   : > { %1128 = vmatpush1.bf16.msra.mxu0 %v3399_v7  ;;  %3342 = vmatpush1.bf16.msra.mxu1 %v3399_v7  ;;  %v3487_v4 = vld [vmem:[%s3729_s9 + $0x2c0] ss:$8 sps:$4 sm:$0xff]   ;;  %v3488_v5 = vld [vmem:[%s3729_s9 + $0xd4] ss:$8 sps:$4 sm:$0xff]   ;;  %v3492_v7 = vld [vmem:[%s3729_s9 + $0xd0] ss:$8 sps:$4 sm:$0xff]  }
  0x25   : > { %1129 = vmatprep.subr.bf16.mxu0 %v3643_v1  ;;  %3327 = vmatprep.subr.bf16.mxu1 %v3643_v1  ;;  %v3490_v6 = vld [vmem:[%s3729_s9 + $0x2d4] ss:$8 sps:$4 sm:$0xff]   ;;  %v3493_v8 = vld [vmem:[%s3729_s9 + $0x2d0] ss:$8 sps:$4 sm:$0xff]  }
  0x28   : > { %1130 = vmatpush1.bf16.msra.mxu0 %v3400_v9  ;;  %3343 = vmatpush1.bf16.msra.mxu1 %v3400_v9  ;;  %v3494_v9 = vld [vmem:[%s3729_s9 + $0xe4] ss:$8 sps:$4 sm:$0xff]  }
  0x29   : > { %1131 = vmatprep.subr.bf16.mxu0 %v3643_v1  ;;  %3328 = vmatprep.subr.bf16.mxu1 %v3643_v1 }
  0x2c   : > { %1132 = vmatpush1.bf16.msra.mxu0 %v3401_v10  ;;  %3344 = vmatpush1.bf16.msra.mxu1 %v3401_v10  ;;  %v3496_v10 = vld [vmem:[%s3729_s9 + $0x2e4] ss:$8 sps:$4 sm:$0xff]  }
  0x2d   : > { %1133 = vmatprep.subr.bf16.mxu0 %v3643_v1  ;;  %3329 = vmatprep.subr.bf16.mxu1 %v3643_v1 }
  0x30   : > { %1134 = vmatpush2.bf16.msra.mxu0 %v3402_v11  ;;  %3345 = vmatpush2.bf16.msra.mxu1 %v3402_v11  ;;  %v3498_v11 = vld [vmem:[%s3729_s9 + $0xe0] ss:$8 sps:$4 sm:$0xff]  }
  0x31   : > { %1135 = vmatprep.subr.bf16.mxu0 %v3643_v1  ;;  %3330 = vmatprep.subr.bf16.mxu1 %v3643_v1 }
  0x34   : > { %1136 = vmatpush2.bf16.msra.mxu0 %v3403_v12  ;;  %3346 = vmatpush2.bf16.msra.mxu1 %v3403_v12  ;;  %v3499_v12 = vld [vmem:[%s3729_s9 + $0x2e0] ss:$8 sps:$4 sm:$0xff]  }
  0x35   : > { %1137 = vmatprep.subr.bf16.mxu0 %v3643_v1  ;;  %3331 = vmatprep.subr.bf16.mxu1 %v3643_v1 }
  0x38   : > { %1138 = vmatpush2.bf16.msra.mxu0 %v3404_v13  ;;  %3347 = vmatpush2.bf16.msra.mxu1 %v3404_v13  ;;  %v3500_v13 = vld [vmem:[%s3729_s9 + $0xf4] ss:$8 sps:$4 sm:$0xff]  }
  0x39   : > { %1139 = vmatprep.subr.bf16.mxu0 %v3643_v1  ;;  %3332 = vmatprep.subr.bf16.mxu1 %v3643_v1 }
  0x3c   : > { %1140 = vmatpush2.bf16.msra.mxu0 %v3405_v14  ;;  %3348 = vmatpush2.bf16.msra.mxu1 %v3405_v14  ;;  %v3502_v14 = vld [vmem:[%s3729_s9 + $0x2f4] ss:$8 sps:$4 sm:$0xff]  }
  0x3d   : > { %1141 = vmatprep.subr.bf16.mxu0 %v3643_v1  ;;  %3333 = vmatprep.subr.bf16.mxu1 %v3643_v1 }
  0x40   : > { %1142 = vmatpush2.bf16.msra.mxu0 %v3406_v15  ;;  %3349 = vmatpush2.bf16.msra.mxu1 %v3406_v15  ;;  %v3504_v15 = vld [vmem:[%s3729_s9 + $0xf0] ss:$8 sps:$4 sm:$0xff]  }
  0x41   : > { %1143 = vmatprep.subr.bf16.mxu0 %v3643_v1  ;;  %3334 = vmatprep.subr.bf16.mxu1 %v3643_v1 }
  0x44   : > { %1144 = vmatpush2.bf16.msra.mxu0 %v3407_v16  ;;  %3350 = vmatpush2.bf16.msra.mxu1 %v3407_v16  ;;  %v3505_v16 = vld [vmem:[%s3729_s9 + $0x2f0] ss:$8 sps:$4 sm:$0xff]  }
  0x45   : > { %1145 = vmatprep.subr.bf16.mxu0 %v3643_v1  ;;  %3335 = vmatprep.subr.bf16.mxu1 %v3643_v1 }
  0x48   : > { %1146 = vmatpush2.bf16.msra.mxu0 %v3408_v17  ;;  %3351 = vmatpush2.bf16.msra.mxu1 %v3408_v17  ;;  %v3506_v17 = vld [vmem:[%s3729_s9 + $0x104] ss:$8 sps:$4 sm:$0xff]  }
  0x49   : > { %1147 = vmatprep.subr.bf16.mxu0 %v3643_v1  ;;  %3336 = vmatprep.subr.bf16.mxu1 %v3643_v1  ;;  %v3482_v1 = vld [vmem:[%s3729_s9 + $0xc4] ss:$8 sps:$4 sm:$0xff]  }
  0x4c   : > { %1148 = vmatpush2.bf16.msra.mxu0 %v3409_v18  ;;  %3352 = vmatpush2.bf16.msra.mxu1 %v3409_v18  ;;  %v3508_v18 = vld [vmem:[%s3729_s9 + $0x304] ss:$8 sps:$4 sm:$0xff]  }
  0x4f   : > { %1150 = vmatmul.mubr.bf16.vlgmr.msra.gmra.mxu0 %v3410_v19  ;;  %1406 = vmatmul.mubr.bf16.vlgmr.msra.gmra.mxu1 %v3413_v20  ;;  %v3510_v19 = vld [vmem:[%s3729_s9 + $0x100] ss:$8 sps:$4 sm:$0xff]  }
  0x50   : > { %1157 = vmatprep.mubr.bf16.mxu0 %v3416_v21  ;;  %1413 = vmatprep.mubr.bf16.mxu1 %v3418_v22  ;;  %v3511_v20 = vld [vmem:[%s3729_s9 + $0x300] ss:$8 sps:$4 sm:$0xff]   ;;  %v3512_v21 = vld [vmem:[%s3729_s9 + $0x114] ss:$8 sps:$4 sm:$0xff]  }
  0x51   : > { %v3514_v22 = vld [vmem:[%s3729_s9 + $0x314] ss:$8 sps:$4 sm:$0xff]  }
  0x57   : > { %1158 = vmatmul.mubr.bf16.gmra.mxu0 %v3420_v23  ;;  %1414 = vmatmul.mubr.bf16.gmra.mxu1 %v3421_v24  ;;  %v3516_v23 = vld [vmem:[%s3729_s9 + $0x110] ss:$8 sps:$4 sm:$0xff]  }
  0x58   : > { %1165 = vmatprep.mubr.bf16.mxu0 %v3422_v25  ;;  %1421 = vmatprep.mubr.bf16.mxu1 %v3424_v26  ;;  %v3517_v24 = vld [vmem:[%s3729_s9 + $0x310] ss:$8 sps:$4 sm:$0xff]   ;;  %v3518_v25 = vld [vmem:[%s3729_s9 + $0x124] ss:$8 sps:$4 sm:$0xff]  }
  0x59   : > { %v3520_v26 = vld [vmem:[%s3729_s9 + $0x324] ss:$8 sps:$4 sm:$0xff]  }
  0x5f   : > { %1166 = vmatmul.mubr.bf16.gmra.mxu0 %v3426_v27  ;;  %1422 = vmatmul.mubr.bf16.gmra.mxu1 %v3427_v28  ;;  %v3522_v27 = vld [vmem:[%s3729_s9 + $0x120] ss:$8 sps:$4 sm:$0xff]  }
  0x60   : > { %1173 = vmatprep.mubr.bf16.mxu0 %v3428_v29  ;;  %1429 = vmatprep.mubr.bf16.mxu1 %v3430_v30  ;;  %v3523_v28 = vld [vmem:[%s3729_s9 + $0x320] ss:$8 sps:$4 sm:$0xff]   ;;  %v3524_v29 = vld [vmem:[%s3729_s9 + $0x134] ss:$8 sps:$4 sm:$0xff]  }
  0x61   : > { %v3526_v30 = vld [vmem:[%s3729_s9 + $0x334] ss:$8 sps:$4 sm:$0xff]  }
  0x67   : > { %1174 = vmatmul.mubr.bf16.gmra.mxu0 %v3432_v31  ;;  %1430 = vmatmul.mubr.bf16.gmra.mxu1 %v3433_v32  ;;  %v3528_v31 = vld [vmem:[%s3729_s9 + $0x130] ss:$8 sps:$4 sm:$0xff]  }
  0x68   : > { %1181 = vmatprep.mubr.bf16.mxu0 %v3434_v33  ;;  %1437 = vmatprep.mubr.bf16.mxu1 %v3436_v34  ;;  %v3529_v32 = vld [vmem:[%s3729_s9 + $0x330] ss:$8 sps:$4 sm:$0xff]   ;;  %v3530_v33 = vld [vmem:[%s3729_s9 + $0x144] ss:$8 sps:$4 sm:$0xff]  }
  0x69   : > { %v3532_v34 = vld [vmem:[%s3729_s9 + $0x344] ss:$8 sps:$4 sm:$0xff]  }
  0x6f   : > { %1182 = vmatmul.mubr.bf16.gmra.mxu0 %v3438_v35  ;;  %1438 = vmatmul.mubr.bf16.gmra.mxu1 %v3439_v36  ;;  %v3534_v35 = vld [vmem:[%s3729_s9 + $0x140] ss:$8 sps:$4 sm:$0xff]  }
  0x70   : > { %1189 = vmatprep.mubr.bf16.mxu0 %v3440_v37  ;;  %1445 = vmatprep.mubr.bf16.mxu1 %v3442_v38  ;;  %v3535_v36 = vld [vmem:[%s3729_s9 + $0x340] ss:$8 sps:$4 sm:$0xff]   ;;  %v3536_v37 = vld [vmem:[%s3729_s9 + $0x154] ss:$8 sps:$4 sm:$0xff]  }
  0x71   : > { %v3538_v38 = vld [vmem:[%s3729_s9 + $0x354] ss:$8 sps:$4 sm:$0xff]  }
  0x77   : > { %1190 = vmatmul.mubr.bf16.gmra.mxu0 %v3444_v39  ;;  %1446 = vmatmul.mubr.bf16.gmra.mxu1 %v3445_v40  ;;  %v3540_v39 = vld [vmem:[%s3729_s9 + $0x150] ss:$8 sps:$4 sm:$0xff]  }
  0x78   : > { %1197 = vmatprep.mubr.bf16.mxu0 %v3446_v41  ;;  %1453 = vmatprep.mubr.bf16.mxu1 %v3448_v42  ;;  %v3541_v40 = vld [vmem:[%s3729_s9 + $0x350] ss:$8 sps:$4 sm:$0xff]   ;;  %v3542_v41 = vld [vmem:[%s3729_s9 + $0x164] ss:$8 sps:$4 sm:$0xff]  }
  0x79   : > { %v3544_v42 = vld [vmem:[%s3729_s9 + $0x364] ss:$8 sps:$4 sm:$0xff]  }
  0x7f   : > { %1198 = vmatmul.mubr.bf16.gmra.mxu0 %v3450_v43  ;;  %1454 = vmatmul.mubr.bf16.gmra.mxu1 %v3451_v44  ;;  %v3546_v43 = vld [vmem:[%s3729_s9 + $0x160] ss:$8 sps:$4 sm:$0xff]  }
  0x80   : > { %1205 = vmatprep.mubr.bf16.mxu0 %v3452_v45  ;;  %1461 = vmatprep.mubr.bf16.mxu1 %v3454_v46  ;;  %v3547_v44 = vld [vmem:[%s3729_s9 + $0x360] ss:$8 sps:$4 sm:$0xff]   ;;  %v3548_v45 = vld [vmem:[%s3729_s9 + $0x174] ss:$8 sps:$4 sm:$0xff]  }
  0x81   : > { %v3550_v46 = vld [vmem:[%s3729_s9 + $0x374] ss:$8 sps:$4 sm:$0xff]  }
  0x87   : > { %1206 = vmatmul.mubr.bf16.gmra.mxu0 %v3456_v47  ;;  %1462 = vmatmul.mubr.bf16.gmra.mxu1 %v3457_v48  ;;  %v3552_v47 = vld [vmem:[%s3729_s9 + $0x170] ss:$8 sps:$4 sm:$0xff]  }
  0x88   : > { %1213 = vmatprep.mubr.bf16.mxu0 %v3458_v49  ;;  %1469 = vmatprep.mubr.bf16.mxu1 %v3460_v50  ;;  %v3553_v48 = vld [vmem:[%s3729_s9 + $0x370] ss:$8 sps:$4 sm:$0xff]   ;;  %v3554_v49 = vld [vmem:[%s3729_s9 + $0x184] ss:$8 sps:$4 sm:$0xff]  }
  0x89   : > { %v3556_v50 = vld [vmem:[%s3729_s9 + $0x384] ss:$8 sps:$4 sm:$0xff]  }
  0x8f   : > { %1214 = vmatmul.mubr.bf16.gmra.mxu0 %v3462_v51  ;;  %1470 = vmatmul.mubr.bf16.gmra.mxu1 %v3463_v52  ;;  %v3558_v51 = vld [vmem:[%s3729_s9 + $0x180] ss:$8 sps:$4 sm:$0xff]  }
  0x90   : > { %1221 = vmatprep.mubr.bf16.mxu0 %v3464_v53  ;;  %1477 = vmatprep.mubr.bf16.mxu1 %v3466_v54  ;;  %v3559_v52 = vld [vmem:[%s3729_s9 + $0x380] ss:$8 sps:$4 sm:$0xff]   ;;  %v3560_v53 = vld [vmem:[%s3729_s9 + $0x194] ss:$8 sps:$4 sm:$0xff]  }
  0x91   : > { %v3562_v54 = vld [vmem:[%s3729_s9 + $0x394] ss:$8 sps:$4 sm:$0xff]  }
  0x97   : > { %1222 = vmatmul.mubr.bf16.gmra.mxu0 %v3468_v55  ;;  %1478 = vmatmul.mubr.bf16.gmra.mxu1 %v3469_v56  ;;  %v3894_v55 = vld [vmem:[%s4142_s2] ss:$0 sm:$0xff] }
  0x98   : > { %1229 = vmatprep.mubr.bf16.mxu0 %v3470_v57  ;;  %1485 = vmatprep.mubr.bf16.mxu1 %v3472_v58 }
  0x9f   : > { %1230 = vmatmul.mubr.bf16.gmra.mxu0 %v3474_v59  ;;  %1486 = vmatmul.mubr.bf16.gmra.mxu1 %v3475_v60 }
  0xa0   : > { %1237 = vmatprep.mubr.bf16.mxu0 %v3476_v61  ;;  %1493 = vmatprep.mubr.bf16.mxu1 %v3478_v62 }
  0xa7   : > { %1238 = vmatmul.mubr.bf16.gmra.mxu0 %v3480_v63  ;;  %1494 = vmatmul.mubr.bf16.gmra.mxu1 %v3481_v0  ;;  %v3564_v0 = vld [vmem:[%s3729_s9 + $0x190] ss:$8 sps:$4 sm:$0xff]  }
  0xa8   : > { %1245 = vmatprep.mubr.bf16.mxu0 %v3482_v1  ;;  %1501 = vmatprep.mubr.bf16.mxu1 %v3484_v2  ;;  %v3565_v1 = vld [vmem:[%s3729_s9 + $0x390] ss:$8 sps:$4 sm:$0xff]  }
  0xaf   : > { %1246 = vmatmul.mubr.bf16.gmra.mxu0 %v3486_v3  ;;  %1502 = vmatmul.mubr.bf16.gmra.mxu1 %v3487_v4  ;;  %v3566_v4 = vld [vmem:[%s3729_s9 + $0x1a4] ss:$8 sps:$4 sm:$0xff]  }
  0xb0   : > { %1253 = vmatprep.mubr.bf16.mxu0 %v3488_v5  ;;  %1509 = vmatprep.mubr.bf16.mxu1 %v3490_v6 }
  0xb7   : > { %1254 = vmatmul.mubr.bf16.gmra.mxu0 %v3492_v7  ;;  %1510 = vmatmul.mubr.bf16.gmra.mxu1 %v3493_v8  ;;  %v3568_v7 = vld [vmem:[%s3729_s9 + $0x3a4] ss:$8 sps:$4 sm:$0xff]  }
  0xb8   : > { %1261 = vmatprep.mubr.bf16.mxu0 %v3494_v9  ;;  %1517 = vmatprep.mubr.bf16.mxu1 %v3496_v10 }
  0xbf   : > { %1262 = vmatmul.mubr.bf16.gmra.mxu0 %v3498_v11  ;;  %1518 = vmatmul.mubr.bf16.gmra.mxu1 %v3499_v12 }
  0xc0   : > { %1269 = vmatprep.mubr.bf16.mxu0 %v3500_v13  ;;  %1525 = vmatprep.mubr.bf16.mxu1 %v3502_v14 }
  0xc7   : > { %1270 = vmatmul.mubr.bf16.gmra.mxu0 %v3504_v15  ;;  %1526 = vmatmul.mubr.bf16.gmra.mxu1 %v3505_v16 }
  0xc8   : > { %1277 = vmatprep.mubr.bf16.mxu0 %v3506_v17  ;;  %1533 = vmatprep.mubr.bf16.mxu1 %v3508_v18 }
  0xcf   : > { %1278 = vmatmul.mubr.bf16.gmra.mxu0 %v3510_v19  ;;  %1534 = vmatmul.mubr.bf16.gmra.mxu1 %v3511_v20 }
  0xd0   : > { %1285 = vmatprep.mubr.bf16.mxu0 %v3512_v21  ;;  %1541 = vmatprep.mubr.bf16.mxu1 %v3514_v22  ;;  %v3570_v22 = vld [vmem:[%s3729_s9 + $0x1a0] ss:$8 sps:$4 sm:$0xff]  }
  0xd7   : > { %1286 = vmatmul.mubr.bf16.gmra.mxu0 %v3516_v23  ;;  %1542 = vmatmul.mubr.bf16.gmra.mxu1 %v3517_v24  ;;  %v3571_v23 = vld [vmem:[%s3729_s9 + $0x3a0] ss:$8 sps:$4 sm:$0xff]  }
  0xd8   : > { %1293 = vmatprep.mubr.bf16.mxu0 %v3518_v25  ;;  %1549 = vmatprep.mubr.bf16.mxu1 %v3520_v26  ;;  %v3572_v26 = vld [vmem:[%s3729_s9 + $0x1b4] ss:$8 sps:$4 sm:$0xff]  }
  0xdf   : > { %1294 = vmatmul.mubr.bf16.gmra.mxu0 %v3522_v27  ;;  %1550 = vmatmul.mubr.bf16.gmra.mxu1 %v3523_v28 }
  0xe0   : > { %1301 = vmatprep.mubr.bf16.mxu0 %v3524_v29  ;;  %1557 = vmatprep.mubr.bf16.mxu1 %v3526_v30  ;;  %v3574_v29 = vld [vmem:[%s3729_s9 + $0x3b4] ss:$8 sps:$4 sm:$0xff]  }
  0xe7   : > { %1302 = vmatmul.mubr.bf16.gmra.mxu0 %v3528_v31  ;;  %1558 = vmatmul.mubr.bf16.gmra.mxu1 %v3529_v32 }
  0xe8   : > { %1309 = vmatprep.mubr.bf16.mxu0 %v3530_v33  ;;  %1565 = vmatprep.mubr.bf16.mxu1 %v3532_v34 }
  0xef   : > { %1310 = vmatmul.mubr.bf16.gmra.mxu0 %v3534_v35  ;;  %1566 = vmatmul.mubr.bf16.gmra.mxu1 %v3535_v36 }
  0xf0   : > { %1317 = vmatprep.mubr.bf16.mxu0 %v3536_v37  ;;  %1573 = vmatprep.mubr.bf16.mxu1 %v3538_v38 }
  0xf7   : > { %1318 = vmatmul.mubr.bf16.gmra.mxu0 %v3540_v39  ;;  %1574 = vmatmul.mubr.bf16.gmra.mxu1 %v3541_v40 }
  0xf8   : > { %1325 = vmatprep.mubr.bf16.mxu0 %v3542_v41  ;;  %1581 = vmatprep.mubr.bf16.mxu1 %v3544_v42 }
  0xff   : > { %1326 = vmatmul.mubr.bf16.gmra.mxu0 %v3546_v43  ;;  %1582 = vmatmul.mubr.bf16.gmra.mxu1 %v3547_v44  ;;  %v3576_v44 = vld [vmem:[%s3729_s9 + $0x1b0] ss:$8 sps:$4 sm:$0xff]  }
 0x100   : > { %1333 = vmatprep.mubr.bf16.mxu0 %v3548_v45  ;;  %1589 = vmatprep.mubr.bf16.mxu1 %v3550_v46  ;;  %v3577_v45 = vld [vmem:[%s3729_s9 + $0x3b0] ss:$8 sps:$4 sm:$0xff]  }
 0x107   : > { %1334 = vmatmul.mubr.bf16.gmra.mxu0 %v3552_v47  ;;  %1590 = vmatmul.mubr.bf16.gmra.mxu1 %v3553_v48  ;;  %v3580_v48 = vld [vmem:[%s3729_s9 + $0x1c4] ss:$8 sps:$4 sm:$0xff]  }
 0x108   : > { %1341 = vmatprep.mubr.bf16.mxu0 %v3554_v49  ;;  %1597 = vmatprep.mubr.bf16.mxu1 %v3556_v50 }
 0x10f   : > { %v1151_v56 = vpop.f32.mrf.mxu0  ;;  %1342 = vmatmul.mubr.bf16.gmra.mxu0 %v3558_v51  ;;  %v1407_v57 = vpop.f32.mrf.mxu1  ;;  %1598 = vmatmul.mubr.bf16.gmra.mxu1 %v3559_v52  ;;  %v3583_v51 = vld [vmem:[%s3729_s9 + $0x3c4] ss:$8 sps:$4 sm:$0xff]  }
 0x110   : > { %1349 = vmatprep.mubr.bf16.mxu0 %v3560_v53  ;;  %1605 = vmatprep.mubr.bf16.mxu1 %v3562_v54  ;;  %v1152_v60 = vadd.f32 %v3894_v55, %v1151_v56  ;;  %v1408_v61 = vadd.f32 %v3894_v55, %v1407_v57 }
 0x111   : > { %v1153_v58 = vpop.f32.mrf.mxu0  ;;  %v1409_v59 = vpop.f32.mrf.mxu1 }
 0x112   : > { %v1662_v8 = vmax.f32 %v1152_v60, 0.0  ;;  %v1726_v9 = vmax.f32 %v1408_v61, 0.0 }
 0x113   : > { %v1154_v62 = vpop.f32.mrf.mxu0  ;;  %v1410_v63 = vpop.f32.mrf.mxu1 }
 0x114   : > { %v1155_v2 = vadd.f32 %v3894_v55, %v1154_v62  ;;  %v1411_v3 = vadd.f32 %v3894_v55, %v1410_v63 }
 0x115   : > { %v1156_v5 = vpop.f32.mrf.mxu0  ;;  %v1412_v6 = vpop.f32.mrf.mxu1 }
 0x116   : > { %v1663_v10 = vmax.f32 %v1155_v2, 0.0  ;;  %v1727_v11 = vmax.f32 %v1411_v3, 0.0  ;;  %v3578_v3 = vld [vmem:[%s3729_s9 + $0x1c0] ss:$8 sps:$4 sm:$0xff]  }
 0x117   : > { %v1159_v12 = vpop.f32.mrf.mxu0  ;;  %1350 = vmatmul.mubr.bf16.gmra.mxu0 %v3564_v0  ;;  %v1415_v13 = vpop.f32.mrf.mxu1  ;;  %1606 = vmatmul.mubr.bf16.gmra.mxu1 %v3565_v1 }
 0x118   : > { %v2941_v14 = vpack.c.bf16 %v1663_v10, %v1662_v8  ;;  %v3101_v15 = vpack.c.bf16 %v1727_v11, %v1726_v9  ;;  %1357 = vmatprep.mubr.bf16.mxu0 %v3566_v4  ;;  %1613 = vmatprep.mubr.bf16.mxu1 %v3568_v7  ;;  %v1160_v18 = vadd.f32 %v3894_v55, %v1159_v12  ;;  %v3581_v4 = vld [vmem:[%s3729_s9 + $0x3c0] ss:$8 sps:$4 sm:$0xff]   ;;  %v3586_v7 = vld [vmem:[%s3729_s9 + $0x1d4] ss:$8 sps:$4 sm:$0xff]  }
 0x119   : > { %v1161_v16 = vpop.f32.mrf.mxu0  ;;  %v1417_v17 = vpop.f32.mrf.mxu1  ;;  %v1416_v19 = vadd.f32 %v3894_v55, %v1415_v13  ;;  %v3589_v10 = vld [vmem:[%s3729_s9 + $0x3d4] ss:$8 sps:$4 sm:$0xff]  }
 0x11a   : > { %2942 = vst [vmem:[%s3908_s25] sm:$0xff] %v2941_v14   ;;  %3289 = vst [vmem:[%s3908_s25 + $0x100] sm:$0xff] %v3101_v15   ;;  %v1664_v30 = vmax.f32 %v1160_v18, 0.0 }
 0x11b   : > { %v1162_v20 = vpop.f32.mrf.mxu0  ;;  %v1418_v21 = vpop.f32.mrf.mxu1  ;;  %v1728_v31 = vmax.f32 %v1416_v19, 0.0 }
 0x11c   : > { %v1163_v24 = vadd.f32 %v3894_v55, %v1162_v20  ;;  %v1419_v25 = vadd.f32 %v3894_v55, %v1418_v21 }
 0x11d   : > { %v1164_v27 = vpop.f32.mrf.mxu0  ;;  %v1420_v28 = vpop.f32.mrf.mxu1 }
 0x11e   : > { %v1665_v32 = vmax.f32 %v1163_v24, 0.0  ;;  %v1729_v33 = vmax.f32 %v1419_v25, 0.0  ;;  %v3584_v25 = vld [vmem:[%s3729_s9 + $0x1d0] ss:$8 sps:$4 sm:$0xff]  }
 0x11f   : > { %v1167_v34 = vpop.f32.mrf.mxu0  ;;  %1358 = vmatmul.mubr.bf16.gmra.mxu0 %v3570_v22  ;;  %v1423_v35 = vpop.f32.mrf.mxu1  ;;  %1614 = vmatmul.mubr.bf16.gmra.mxu1 %v3571_v23 }
 0x120   : > { %v2946_v36 = vpack.c.bf16 %v1665_v32, %v1664_v30  ;;  %v3106_v37 = vpack.c.bf16 %v1729_v33, %v1728_v31  ;;  %1365 = vmatprep.mubr.bf16.mxu0 %v3572_v26  ;;  %1621 = vmatprep.mubr.bf16.mxu1 %v3574_v29  ;;  %v1168_v40 = vadd.f32 %v3894_v55, %v1167_v34  ;;  %v3587_v26 = vld [vmem:[%s3729_s9 + $0x3d0] ss:$8 sps:$4 sm:$0xff]   ;;  %v3592_v29 = vld [vmem:[%s3729_s9 + $0x1e4] ss:$8 sps:$4 sm:$0xff]  }
 0x121   : > { %v1169_v38 = vpop.f32.mrf.mxu0  ;;  %v1425_v39 = vpop.f32.mrf.mxu1  ;;  %v1424_v41 = vadd.f32 %v3894_v55, %v1423_v35  ;;  %v3595_v32 = vld [vmem:[%s3729_s9 + $0x3e4] ss:$8 sps:$4 sm:$0xff]  }
 0x122   : > { %3258 = vst [vmem:[%s3908_s25 + $0x8] sm:$0xff] %v2946_v36   ;;  %3290 = vst [vmem:[%s3908_s25 + $0x108] sm:$0xff] %v3106_v37   ;;  %v1666_v52 = vmax.f32 %v1168_v40, 0.0 }
 0x123   : > { %v1170_v42 = vpop.f32.mrf.mxu0  ;;  %v1426_v43 = vpop.f32.mrf.mxu1  ;;  %v1730_v53 = vmax.f32 %v1424_v41, 0.0 }
 0x124   : > { %v1171_v46 = vadd.f32 %v3894_v55, %v1170_v42  ;;  %v1427_v47 = vadd.f32 %v3894_v55, %v1426_v43 }
 0x125   : > { %v1172_v49 = vpop.f32.mrf.mxu0  ;;  %v1428_v50 = vpop.f32.mrf.mxu1 }
 0x126   : > { %v1667_v54 = vmax.f32 %v1171_v46, 0.0  ;;  %v1731_v56 = vmax.f32 %v1427_v47, 0.0  ;;  %v3590_v47 = vld [vmem:[%s3729_s9 + $0x1e0] ss:$8 sps:$4 sm:$0xff]  }
 0x127   : > { %v1175_v57 = vpop.f32.mrf.mxu0  ;;  %1366 = vmatmul.mubr.bf16.gmra.mxu0 %v3576_v44  ;;  %v1431_v58 = vpop.f32.mrf.mxu1  ;;  %1622 = vmatmul.mubr.bf16.gmra.mxu1 %v3577_v45 }
 0x128   : > { %v2951_v59 = vpack.c.bf16 %v1667_v54, %v1666_v52  ;;  %v3111_v60 = vpack.c.bf16 %v1731_v56, %v1730_v53  ;;  %1373 = vmatprep.mubr.bf16.mxu0 %v3580_v48  ;;  %1629 = vmatprep.mubr.bf16.mxu1 %v3583_v51  ;;  %v1176_v63 = vadd.f32 %v3894_v55, %v1175_v57  ;;  %v3593_v48 = vld [vmem:[%s3729_s9 + $0x3e0] ss:$8 sps:$4 sm:$0xff]   ;;  %v3598_v51 = vld [vmem:[%s3729_s9 + $0x1f4] ss:$8 sps:$4 sm:$0xff]  }
 0x129   : > { %v1177_v61 = vpop.f32.mrf.mxu0  ;;  %v1433_v62 = vpop.f32.mrf.mxu1  ;;  %v1432_v0 = vadd.f32 %v3894_v55, %v1431_v58  ;;  %v3601_v54 = vld [vmem:[%s3729_s9 + $0x3f4] ss:$8 sps:$4 sm:$0xff]  }
 0x12a   : > { %3259 = vst [vmem:[%s3908_s25 + $0x10] sm:$0xff] %v2951_v59   ;;  %3291 = vst [vmem:[%s3908_s25 + $0x110] sm:$0xff] %v3111_v60   ;;  %v1668_v11 = vmax.f32 %v1176_v63, 0.0 }
 0x12b   : > { %v1178_v1 = vpop.f32.mrf.mxu0  ;;  %v1434_v2 = vpop.f32.mrf.mxu1  ;;  %v1732_v12 = vmax.f32 %v1432_v0, 0.0 }
 0x12c   : > { %v1179_v5 = vadd.f32 %v3894_v55, %v1178_v1  ;;  %v1435_v6 = vadd.f32 %v3894_v55, %v1434_v2 }
 0x12d   : > { %v1180_v8 = vpop.f32.mrf.mxu0  ;;  %v1436_v9 = vpop.f32.mrf.mxu1 }
 0x12e   : > { %v1669_v13 = vmax.f32 %v1179_v5, 0.0  ;;  %v1733_v14 = vmax.f32 %v1435_v6, 0.0  ;;  %v3596_v6 = vld [vmem:[%s3729_s9 + $0x1f0] ss:$8 sps:$4 sm:$0xff]  }
 0x12f   : > { %v1183_v15 = vpop.f32.mrf.mxu0  ;;  %1374 = vmatmul.mubr.bf16.gmra.mxu0 %v3578_v3  ;;  %v1439_v16 = vpop.f32.mrf.mxu1  ;;  %1630 = vmatmul.mubr.bf16.gmra.mxu1 %v3581_v4 }
 0x130   : > { %v2956_v17 = vpack.c.bf16 %v1669_v13, %v1668_v11  ;;  %v3116_v18 = vpack.c.bf16 %v1733_v14, %v1732_v12  ;;  %1381 = vmatprep.mubr.bf16.mxu0 %v3586_v7  ;;  %1637 = vmatprep.mubr.bf16.mxu1 %v3589_v10  ;;  %v1184_v21 = vadd.f32 %v3894_v55, %v1183_v15  ;;  %v3599_v7 = vld [vmem:[%s3729_s9 + $0x3f0] ss:$8 sps:$4 sm:$0xff]  }
 0x131   : > { %v1185_v19 = vpop.f32.mrf.mxu0  ;;  %v1441_v20 = vpop.f32.mrf.mxu1  ;;  %v1440_v22 = vadd.f32 %v3894_v55, %v1439_v16 }
 0x132   : > { %3260 = vst [vmem:[%s3908_s25 + $0x18] sm:$0xff] %v2956_v17   ;;  %3292 = vst [vmem:[%s3908_s25 + $0x118] sm:$0xff] %v3116_v18   ;;  %v1670_v33 = vmax.f32 %v1184_v21, 0.0 }
 0x133   : > { %v1186_v23 = vpop.f32.mrf.mxu0  ;;  %v1442_v24 = vpop.f32.mrf.mxu1  ;;  %v1734_v34 = vmax.f32 %v1440_v22, 0.0 }
 0x134   : > { %v1187_v27 = vadd.f32 %v3894_v55, %v1186_v23  ;;  %v1443_v28 = vadd.f32 %v3894_v55, %v1442_v24 }
 0x135   : > { %v1188_v30 = vpop.f32.mrf.mxu0  ;;  %v1444_v31 = vpop.f32.mrf.mxu1 }
 0x136   : > { %v1671_v35 = vmax.f32 %v1187_v27, 0.0  ;;  %v1735_v36 = vmax.f32 %v1443_v28, 0.0 }
 0x137   : > { %v1191_v37 = vpop.f32.mrf.mxu0  ;;  %1382 = vmatmul.mubr.bf16.gmra.mxu0 %v3584_v25  ;;  %v1447_v38 = vpop.f32.mrf.mxu1  ;;  %1638 = vmatmul.mubr.bf16.gmra.mxu1 %v3587_v26 }
 0x138   : > { %v2961_v39 = vpack.c.bf16 %v1671_v35, %v1670_v33  ;;  %v3121_v40 = vpack.c.bf16 %v1735_v36, %v1734_v34  ;;  %1389 = vmatprep.mubr.bf16.mxu0 %v3592_v29  ;;  %1645 = vmatprep.mubr.bf16.mxu1 %v3595_v32  ;;  %v1192_v43 = vadd.f32 %v3894_v55, %v1191_v37 }
 0x139   : > { %v1193_v41 = vpop.f32.mrf.mxu0  ;;  %v1449_v42 = vpop.f32.mrf.mxu1  ;;  %v1448_v44 = vadd.f32 %v3894_v55, %v1447_v38 }
 0x13a   : > { %3261 = vst [vmem:[%s3908_s25 + $0x20] sm:$0xff] %v2961_v39   ;;  %3293 = vst [vmem:[%s3908_s25 + $0x120] sm:$0xff] %v3121_v40   ;;  %v1672_v56 = vmax.f32 %v1192_v43, 0.0 }
 0x13b   : > { %v1194_v45 = vpop.f32.mrf.mxu0  ;;  %v1450_v46 = vpop.f32.mrf.mxu1  ;;  %v1736_v57 = vmax.f32 %v1448_v44, 0.0 }
 0x13c   : > { %v1195_v49 = vadd.f32 %v3894_v55, %v1194_v45  ;;  %v1451_v50 = vadd.f32 %v3894_v55, %v1450_v46 }
 0x13d   : > { %v1196_v52 = vpop.f32.mrf.mxu0  ;;  %v1452_v53 = vpop.f32.mrf.mxu1 }
 0x13e   : > { %v1673_v58 = vmax.f32 %v1195_v49, 0.0  ;;  %v1737_v59 = vmax.f32 %v1451_v50, 0.0 }
 0x13f   : > { %v1199_v60 = vpop.f32.mrf.mxu0  ;;  %1390 = vmatmul.mubr.bf16.gmra.mxu0 %v3590_v47  ;;  %v1455_v61 = vpop.f32.mrf.mxu1  ;;  %1646 = vmatmul.mubr.bf16.gmra.mxu1 %v3593_v48 }
 0x140   : > { %v2966_v62 = vpack.c.bf16 %v1673_v58, %v1672_v56  ;;  %v3126_v63 = vpack.c.bf16 %v1737_v59, %v1736_v57  ;;  %1397 = vmatprep.mubr.bf16.mxu0 %v3598_v51  ;;  %1653 = vmatprep.mubr.bf16.mxu1 %v3601_v54  ;;  %v1200_v2 = vadd.f32 %v3894_v55, %v1199_v60 }
 0x141   : > { %v1201_v0 = vpop.f32.mrf.mxu0  ;;  %v1457_v1 = vpop.f32.mrf.mxu1  ;;  %v1456_v3 = vadd.f32 %v3894_v55, %v1455_v61 }
 0x142   : > { %3262 = vst [vmem:[%s3908_s25 + $0x28] sm:$0xff] %v2966_v62   ;;  %3294 = vst [vmem:[%s3908_s25 + $0x128] sm:$0xff] %v3126_v63   ;;  %v1674_v12 = vmax.f32 %v1200_v2, 0.0 }
 0x143   : > { %v1202_v4 = vpop.f32.mrf.mxu0  ;;  %v1458_v5 = vpop.f32.mrf.mxu1  ;;  %v1738_v13 = vmax.f32 %v1456_v3, 0.0 }
 0x144   : > { %v1203_v8 = vadd.f32 %v3894_v55, %v1202_v4  ;;  %v1459_v9 = vadd.f32 %v3894_v55, %v1458_v5 }
 0x145   : > { %v1204_v10 = vpop.f32.mrf.mxu0  ;;  %v1460_v11 = vpop.f32.mrf.mxu1 }
 0x146   : > { %v1675_v14 = vmax.f32 %v1203_v8, 0.0  ;;  %v1739_v15 = vmax.f32 %v1459_v9, 0.0 }
 0x147   : > { %v1207_v16 = vpop.f32.mrf.mxu0  ;;  %1398 = vmatmul.mubr.bf16.gmra.mxu0 %v3596_v6  ;;  %v1463_v17 = vpop.f32.mrf.mxu1  ;;  %1654 = vmatmul.mubr.bf16.gmra.mxu1 %v3599_v7 }
 0x148   : > { %v2971_v18 = vpack.c.bf16 %v1675_v14, %v1674_v12  ;;  %v3131_v19 = vpack.c.bf16 %v1739_v15, %v1738_v13  ;;  %v1208_v22 = vadd.f32 %v3894_v55, %v1207_v16  ;;  %v1464_v23 = vadd.f32 %v3894_v55, %v1463_v17 }
 0x149   : > { %v1209_v20 = vpop.f32.mrf.mxu0  ;;  %v1465_v21 = vpop.f32.mrf.mxu1 }
 0x14a   : > { %3263 = vst [vmem:[%s3908_s25 + $0x30] sm:$0xff] %v2971_v18   ;;  %3295 = vst [vmem:[%s3908_s25 + $0x130] sm:$0xff] %v3131_v19   ;;  %v1676_v30 = vmax.f32 %v1208_v22, 0.0  ;;  %v1740_v31 = vmax.f32 %v1464_v23, 0.0 }
 0x14b   : > { %v1210_v24 = vpop.f32.mrf.mxu0  ;;  %v1466_v25 = vpop.f32.mrf.mxu1 }
 0x14c   : > { %v1211_v26 = vadd.f32 %v3894_v55, %v1210_v24  ;;  %v1467_v27 = vadd.f32 %v3894_v55, %v1466_v25 }
 0x14d   : > { %v1212_v28 = vpop.f32.mrf.mxu0  ;;  %v1468_v29 = vpop.f32.mrf.mxu1 }
 0x14e   : > { %v1677_v32 = vmax.f32 %v1211_v26, 0.0  ;;  %v1741_v33 = vmax.f32 %v1467_v27, 0.0 }
 0x14f   : > { %v1215_v34 = vpop.f32.mrf.mxu0  ;;  %v1471_v35 = vpop.f32.mrf.mxu1 }
 0x150   : > { %v2976_v36 = vpack.c.bf16 %v1677_v32, %v1676_v30  ;;  %v3136_v37 = vpack.c.bf16 %v1741_v33, %v1740_v31  ;;  %v1216_v40 = vadd.f32 %v3894_v55, %v1215_v34  ;;  %v1472_v41 = vadd.f32 %v3894_v55, %v1471_v35 }
 0x151   : > { %v1217_v38 = vpop.f32.mrf.mxu0  ;;  %v1473_v39 = vpop.f32.mrf.mxu1 }
 0x152   : > { %3264 = vst [vmem:[%s3908_s25 + $0x38] sm:$0xff] %v2976_v36   ;;  %3296 = vst [vmem:[%s3908_s25 + $0x138] sm:$0xff] %v3136_v37   ;;  %v1678_v48 = vmax.f32 %v1216_v40, 0.0  ;;  %v1742_v49 = vmax.f32 %v1472_v41, 0.0 }
 0x153   : > { %v1218_v42 = vpop.f32.mrf.mxu0  ;;  %v1474_v43 = vpop.f32.mrf.mxu1 }
 0x154   : > { %v1219_v44 = vadd.f32 %v3894_v55, %v1218_v42  ;;  %v1475_v45 = vadd.f32 %v3894_v55, %v1474_v43 }
 0x155   : > { %v1220_v46 = vpop.f32.mrf.mxu0  ;;  %v1476_v47 = vpop.f32.mrf.mxu1 }
 0x156   : > { %v1679_v50 = vmax.f32 %v1219_v44, 0.0  ;;  %v1743_v51 = vmax.f32 %v1475_v45, 0.0 }
 0x157   : > { %v1223_v52 = vpop.f32.mrf.mxu0  ;;  %v1479_v53 = vpop.f32.mrf.mxu1 }
 0x158   : > { %v2981_v54 = vpack.c.bf16 %v1679_v50, %v1678_v48  ;;  %v3141_v56 = vpack.c.bf16 %v1743_v51, %v1742_v49  ;;  %v1224_v59 = vadd.f32 %v3894_v55, %v1223_v52  ;;  %v1480_v60 = vadd.f32 %v3894_v55, %v1479_v53 }
 0x159   : > { %v1225_v57 = vpop.f32.mrf.mxu0  ;;  %v1481_v58 = vpop.f32.mrf.mxu1 }
 0x15a   : > { %3265 = vst [vmem:[%s3908_s25 + $0x40] sm:$0xff] %v2981_v54   ;;  %3297 = vst [vmem:[%s3908_s25 + $0x140] sm:$0xff] %v3141_v56   ;;  %v1680_v3 = vmax.f32 %v1224_v59, 0.0  ;;  %v1744_v4 = vmax.f32 %v1480_v60, 0.0 }
 0x15b   : > { %v1226_v61 = vpop.f32.mrf.mxu0  ;;  %v1482_v62 = vpop.f32.mrf.mxu1 }
 0x15c   : > { %v1227_v63 = vadd.f32 %v3894_v55, %v1226_v61  ;;  %v1483_v0 = vadd.f32 %v3894_v55, %v1482_v62 }
 0x15d   : > { %v1228_v1 = vpop.f32.mrf.mxu0  ;;  %v1484_v2 = vpop.f32.mrf.mxu1 }
 0x15e   : > { %v1681_v5 = vmax.f32 %v1227_v63, 0.0  ;;  %v1745_v6 = vmax.f32 %v1483_v0, 0.0 }
 0x15f   : > { %v1231_v7 = vpop.f32.mrf.mxu0  ;;  %v1487_v8 = vpop.f32.mrf.mxu1 }
 0x160   : > { %v2986_v9 = vpack.c.bf16 %v1681_v5, %v1680_v3  ;;  %v3146_v10 = vpack.c.bf16 %v1745_v6, %v1744_v4  ;;  %v1232_v13 = vadd.f32 %v3894_v55, %v1231_v7  ;;  %v1488_v14 = vadd.f32 %v3894_v55, %v1487_v8 }
 0x161   : > { %v1233_v11 = vpop.f32.mrf.mxu0  ;;  %v1489_v12 = vpop.f32.mrf.mxu1 }
 0x162   : > { %3266 = vst [vmem:[%s3908_s25 + $0x48] sm:$0xff] %v2986_v9   ;;  %3298 = vst [vmem:[%s3908_s25 + $0x148] sm:$0xff] %v3146_v10   ;;  %v1682_v21 = vmax.f32 %v1232_v13, 0.0  ;;  %v1746_v22 = vmax.f32 %v1488_v14, 0.0 }
 0x163   : > { %v1234_v15 = vpop.f32.mrf.mxu0  ;;  %v1490_v16 = vpop.f32.mrf.mxu1 }
 0x164   : > { %v1235_v17 = vadd.f32 %v3894_v55, %v1234_v15  ;;  %v1491_v18 = vadd.f32 %v3894_v55, %v1490_v16 }
 0x165   : > { %v1236_v19 = vpop.f32.mrf.mxu0  ;;  %v1492_v20 = vpop.f32.mrf.mxu1 }
 0x166   : > { %v1683_v23 = vmax.f32 %v1235_v17, 0.0  ;;  %v1747_v24 = vmax.f32 %v1491_v18, 0.0 }
 0x167   : > { %v1239_v25 = vpop.f32.mrf.mxu0  ;;  %v1495_v26 = vpop.f32.mrf.mxu1 }
 0x168   : > { %v2991_v27 = vpack.c.bf16 %v1683_v23, %v1682_v21  ;;  %v3151_v28 = vpack.c.bf16 %v1747_v24, %v1746_v22  ;;  %v1240_v31 = vadd.f32 %v3894_v55, %v1239_v25  ;;  %v1496_v32 = vadd.f32 %v3894_v55, %v1495_v26 }
 0x169   : > { %v1241_v29 = vpop.f32.mrf.mxu0  ;;  %v1497_v30 = vpop.f32.mrf.mxu1 }
 0x16a   : > { %3267 = vst [vmem:[%s3908_s25 + $0x50] sm:$0xff] %v2991_v27   ;;  %3299 = vst [vmem:[%s3908_s25 + $0x150] sm:$0xff] %v3151_v28   ;;  %v1684_v39 = vmax.f32 %v1240_v31, 0.0  ;;  %v1748_v40 = vmax.f32 %v1496_v32, 0.0 }
 0x16b   : > { %v1242_v33 = vpop.f32.mrf.mxu0  ;;  %v1498_v34 = vpop.f32.mrf.mxu1 }
 0x16c   : > { %v1243_v35 = vadd.f32 %v3894_v55, %v1242_v33  ;;  %v1499_v36 = vadd.f32 %v3894_v55, %v1498_v34 }
 0x16d   : > { %v1244_v37 = vpop.f32.mrf.mxu0  ;;  %v1500_v38 = vpop.f32.mrf.mxu1 }
 0x16e   : > { %v1685_v41 = vmax.f32 %v1243_v35, 0.0  ;;  %v1749_v42 = vmax.f32 %v1499_v36, 0.0 }
 0x16f   : > { %v1247_v43 = vpop.f32.mrf.mxu0  ;;  %v1503_v44 = vpop.f32.mrf.mxu1 }
 0x170   : > { %v2996_v45 = vpack.c.bf16 %v1685_v41, %v1684_v39  ;;  %v3156_v46 = vpack.c.bf16 %v1749_v42, %v1748_v40  ;;  %v1248_v49 = vadd.f32 %v3894_v55, %v1247_v43  ;;  %v1504_v50 = vadd.f32 %v3894_v55, %v1503_v44 }
 0x171   : > { %v1249_v47 = vpop.f32.mrf.mxu0  ;;  %v1505_v48 = vpop.f32.mrf.mxu1 }
 0x172   : > { %3268 = vst [vmem:[%s3908_s25 + $0x58] sm:$0xff] %v2996_v45   ;;  %3300 = vst [vmem:[%s3908_s25 + $0x158] sm:$0xff] %v3156_v46   ;;  %v1686_v58 = vmax.f32 %v1248_v49, 0.0  ;;  %v1750_v59 = vmax.f32 %v1504_v50, 0.0 }
 0x173   : > { %v1250_v51 = vpop.f32.mrf.mxu0  ;;  %v1506_v52 = vpop.f32.mrf.mxu1 }
 0x174   : > { %v1251_v53 = vadd.f32 %v3894_v55, %v1250_v51  ;;  %v1507_v54 = vadd.f32 %v3894_v55, %v1506_v52 }
 0x175   : > { %v1252_v56 = vpop.f32.mrf.mxu0  ;;  %v1508_v57 = vpop.f32.mrf.mxu1 }
 0x176   : > { %v1687_v60 = vmax.f32 %v1251_v53, 0.0  ;;  %v1751_v61 = vmax.f32 %v1507_v54, 0.0 }
 0x177   : > { %v1255_v62 = vpop.f32.mrf.mxu0  ;;  %v1511_v63 = vpop.f32.mrf.mxu1 }
 0x178   : > { %v3001_v0 = vpack.c.bf16 %v1687_v60, %v1686_v58  ;;  %v3161_v1 = vpack.c.bf16 %v1751_v61, %v1750_v59  ;;  %v1256_v4 = vadd.f32 %v3894_v55, %v1255_v62  ;;  %v1512_v5 = vadd.f32 %v3894_v55, %v1511_v63 }
 0x179   : > { %v1257_v2 = vpop.f32.mrf.mxu0  ;;  %v1513_v3 = vpop.f32.mrf.mxu1 }
 0x17a   : > { %3269 = vst [vmem:[%s3908_s25 + $0x60] sm:$0xff] %v3001_v0   ;;  %3301 = vst [vmem:[%s3908_s25 + $0x160] sm:$0xff] %v3161_v1   ;;  %v1688_v12 = vmax.f32 %v1256_v4, 0.0  ;;  %v1752_v13 = vmax.f32 %v1512_v5, 0.0 }
 0x17b   : > { %v1258_v6 = vpop.f32.mrf.mxu0  ;;  %v1514_v7 = vpop.f32.mrf.mxu1 }
 0x17c   : > { %v1259_v8 = vadd.f32 %v3894_v55, %v1258_v6  ;;  %v1515_v9 = vadd.f32 %v3894_v55, %v1514_v7 }
 0x17d   : > { %v1260_v10 = vpop.f32.mrf.mxu0  ;;  %v1516_v11 = vpop.f32.mrf.mxu1 }
 0x17e   : > { %v1689_v14 = vmax.f32 %v1259_v8, 0.0  ;;  %v1753_v15 = vmax.f32 %v1515_v9, 0.0 }
 0x17f   : > { %v1263_v16 = vpop.f32.mrf.mxu0  ;;  %v1519_v17 = vpop.f32.mrf.mxu1 }
 0x180   : > { %v3006_v18 = vpack.c.bf16 %v1689_v14, %v1688_v12  ;;  %v3166_v19 = vpack.c.bf16 %v1753_v15, %v1752_v13  ;;  %v1264_v22 = vadd.f32 %v3894_v55, %v1263_v16  ;;  %v1520_v23 = vadd.f32 %v3894_v55, %v1519_v17 }
 0x181   : > { %v1265_v20 = vpop.f32.mrf.mxu0  ;;  %v1521_v21 = vpop.f32.mrf.mxu1 }
 0x182   : > { %3270 = vst [vmem:[%s3908_s25 + $0x68] sm:$0xff] %v3006_v18   ;;  %3302 = vst [vmem:[%s3908_s25 + $0x168] sm:$0xff] %v3166_v19   ;;  %v1690_v30 = vmax.f32 %v1264_v22, 0.0  ;;  %v1754_v31 = vmax.f32 %v1520_v23, 0.0 }
 0x183   : > { %v1266_v24 = vpop.f32.mrf.mxu0  ;;  %v1522_v25 = vpop.f32.mrf.mxu1 }
 0x184   : > { %v1267_v26 = vadd.f32 %v3894_v55, %v1266_v24  ;;  %v1523_v27 = vadd.f32 %v3894_v55, %v1522_v25 }
 0x185   : > { %v1268_v28 = vpop.f32.mrf.mxu0  ;;  %v1524_v29 = vpop.f32.mrf.mxu1 }
 0x186   : > { %v1691_v32 = vmax.f32 %v1267_v26, 0.0  ;;  %v1755_v33 = vmax.f32 %v1523_v27, 0.0 }
 0x187   : > { %v1271_v34 = vpop.f32.mrf.mxu0  ;;  %v1527_v35 = vpop.f32.mrf.mxu1 }
 0x188   : > { %v3011_v36 = vpack.c.bf16 %v1691_v32, %v1690_v30  ;;  %v3171_v37 = vpack.c.bf16 %v1755_v33, %v1754_v31  ;;  %v1272_v40 = vadd.f32 %v3894_v55, %v1271_v34  ;;  %v1528_v41 = vadd.f32 %v3894_v55, %v1527_v35 }
 0x189   : > { %v1273_v38 = vpop.f32.mrf.mxu0  ;;  %v1529_v39 = vpop.f32.mrf.mxu1 }
 0x18a   : > { %3271 = vst [vmem:[%s3908_s25 + $0x70] sm:$0xff] %v3011_v36   ;;  %3303 = vst [vmem:[%s3908_s25 + $0x170] sm:$0xff] %v3171_v37   ;;  %v1692_v48 = vmax.f32 %v1272_v40, 0.0  ;;  %v1756_v49 = vmax.f32 %v1528_v41, 0.0 }
 0x18b   : > { %v1274_v42 = vpop.f32.mrf.mxu0  ;;  %v1530_v43 = vpop.f32.mrf.mxu1 }
 0x18c   : > { %v1275_v44 = vadd.f32 %v3894_v55, %v1274_v42  ;;  %v1531_v45 = vadd.f32 %v3894_v55, %v1530_v43 }
 0x18d   : > { %v1276_v46 = vpop.f32.mrf.mxu0  ;;  %v1532_v47 = vpop.f32.mrf.mxu1 }
 0x18e   : > { %v1693_v50 = vmax.f32 %v1275_v44, 0.0  ;;  %v1757_v51 = vmax.f32 %v1531_v45, 0.0 }
 0x18f   : > { %v1279_v52 = vpop.f32.mrf.mxu0  ;;  %v1535_v53 = vpop.f32.mrf.mxu1 }
 0x190   : > { %v3016_v54 = vpack.c.bf16 %v1693_v50, %v1692_v48  ;;  %v3176_v56 = vpack.c.bf16 %v1757_v51, %v1756_v49  ;;  %v1280_v59 = vadd.f32 %v3894_v55, %v1279_v52  ;;  %v1536_v60 = vadd.f32 %v3894_v55, %v1535_v53 }
 0x191   : > { %v1281_v57 = vpop.f32.mrf.mxu0  ;;  %v1537_v58 = vpop.f32.mrf.mxu1 }
 0x192   : > { %3272 = vst [vmem:[%s3908_s25 + $0x78] sm:$0xff] %v3016_v54   ;;  %3304 = vst [vmem:[%s3908_s25 + $0x178] sm:$0xff] %v3176_v56   ;;  %v1694_v3 = vmax.f32 %v1280_v59, 0.0  ;;  %v1758_v4 = vmax.f32 %v1536_v60, 0.0 }
 0x193   : > { %v1282_v61 = vpop.f32.mrf.mxu0  ;;  %v1538_v62 = vpop.f32.mrf.mxu1 }
 0x194   : > { %v1283_v63 = vadd.f32 %v3894_v55, %v1282_v61  ;;  %v1539_v0 = vadd.f32 %v3894_v55, %v1538_v62 }
 0x195   : > { %v1284_v1 = vpop.f32.mrf.mxu0  ;;  %v1540_v2 = vpop.f32.mrf.mxu1 }
 0x196   : > { %v1695_v5 = vmax.f32 %v1283_v63, 0.0  ;;  %v1759_v6 = vmax.f32 %v1539_v0, 0.0 }
 0x197   : > { %v1287_v7 = vpop.f32.mrf.mxu0  ;;  %v1543_v8 = vpop.f32.mrf.mxu1 }
 0x198   : > { %v3021_v9 = vpack.c.bf16 %v1695_v5, %v1694_v3  ;;  %v3181_v10 = vpack.c.bf16 %v1759_v6, %v1758_v4  ;;  %v1288_v13 = vadd.f32 %v3894_v55, %v1287_v7  ;;  %v1544_v14 = vadd.f32 %v3894_v55, %v1543_v8 }
 0x199   : > { %v1289_v11 = vpop.f32.mrf.mxu0  ;;  %v1545_v12 = vpop.f32.mrf.mxu1 }
 0x19a   : > { %3273 = vst [vmem:[%s3908_s25 + $0x80] sm:$0xff] %v3021_v9   ;;  %3305 = vst [vmem:[%s3908_s25 + $0x180] sm:$0xff] %v3181_v10   ;;  %v1696_v21 = vmax.f32 %v1288_v13, 0.0  ;;  %v1760_v22 = vmax.f32 %v1544_v14, 0.0 }
 0x19b   : > { %v1290_v15 = vpop.f32.mrf.mxu0  ;;  %v1546_v16 = vpop.f32.mrf.mxu1 }
 0x19c   : > { %v1291_v17 = vadd.f32 %v3894_v55, %v1290_v15  ;;  %v1547_v18 = vadd.f32 %v3894_v55, %v1546_v16 }
 0x19d   : > { %v1292_v19 = vpop.f32.mrf.mxu0  ;;  %v1548_v20 = vpop.f32.mrf.mxu1 }
 0x19e   : > { %v1697_v23 = vmax.f32 %v1291_v17, 0.0  ;;  %v1761_v24 = vmax.f32 %v1547_v18, 0.0 }
 0x19f   : > { %v1295_v25 = vpop.f32.mrf.mxu0  ;;  %v1551_v26 = vpop.f32.mrf.mxu1 }
 0x1a0   : > { %v3026_v27 = vpack.c.bf16 %v1697_v23, %v1696_v21  ;;  %v3186_v28 = vpack.c.bf16 %v1761_v24, %v1760_v22  ;;  %v1296_v31 = vadd.f32 %v3894_v55, %v1295_v25  ;;  %v1552_v32 = vadd.f32 %v3894_v55, %v1551_v26 }
 0x1a1   : > { %v1297_v29 = vpop.f32.mrf.mxu0  ;;  %v1553_v30 = vpop.f32.mrf.mxu1 }
 0x1a2   : > { %3274 = vst [vmem:[%s3908_s25 + $0x88] sm:$0xff] %v3026_v27   ;;  %3306 = vst [vmem:[%s3908_s25 + $0x188] sm:$0xff] %v3186_v28   ;;  %v1698_v39 = vmax.f32 %v1296_v31, 0.0  ;;  %v1762_v40 = vmax.f32 %v1552_v32, 0.0 }
 0x1a3   : > { %v1298_v33 = vpop.f32.mrf.mxu0  ;;  %v1554_v34 = vpop.f32.mrf.mxu1 }
 0x1a4   : > { %v1299_v35 = vadd.f32 %v3894_v55, %v1298_v33  ;;  %v1555_v36 = vadd.f32 %v3894_v55, %v1554_v34 }
 0x1a5   : > { %v1300_v37 = vpop.f32.mrf.mxu0  ;;  %v1556_v38 = vpop.f32.mrf.mxu1 }
 0x1a6   : > { %v1699_v41 = vmax.f32 %v1299_v35, 0.0  ;;  %v1763_v42 = vmax.f32 %v1555_v36, 0.0 }
 0x1a7   : > { %v1303_v43 = vpop.f32.mrf.mxu0  ;;  %v1559_v44 = vpop.f32.mrf.mxu1 }
 0x1a8   : > { %v3031_v45 = vpack.c.bf16 %v1699_v41, %v1698_v39  ;;  %v3191_v46 = vpack.c.bf16 %v1763_v42, %v1762_v40  ;;  %v1304_v49 = vadd.f32 %v3894_v55, %v1303_v43  ;;  %v1560_v50 = vadd.f32 %v3894_v55, %v1559_v44 }
 0x1a9   : > { %v1305_v47 = vpop.f32.mrf.mxu0  ;;  %v1561_v48 = vpop.f32.mrf.mxu1 }
 0x1aa   : > { %3275 = vst [vmem:[%s3908_s25 + $0x90] sm:$0xff] %v3031_v45   ;;  %3307 = vst [vmem:[%s3908_s25 + $0x190] sm:$0xff] %v3191_v46   ;;  %v1700_v58 = vmax.f32 %v1304_v49, 0.0  ;;  %v1764_v59 = vmax.f32 %v1560_v50, 0.0 }
 0x1ab   : > { %v1306_v51 = vpop.f32.mrf.mxu0  ;;  %v1562_v52 = vpop.f32.mrf.mxu1 }
 0x1ac   : > { %v1307_v53 = vadd.f32 %v3894_v55, %v1306_v51  ;;  %v1563_v54 = vadd.f32 %v3894_v55, %v1562_v52 }
 0x1ad   : > { %v1308_v56 = vpop.f32.mrf.mxu0  ;;  %v1564_v57 = vpop.f32.mrf.mxu1 }
 0x1ae   : > { %v1701_v60 = vmax.f32 %v1307_v53, 0.0  ;;  %v1765_v61 = vmax.f32 %v1563_v54, 0.0 }
 0x1af   : > { %v1311_v62 = vpop.f32.mrf.mxu0  ;;  %v1567_v63 = vpop.f32.mrf.mxu1 }
 0x1b0   : > { %v3036_v0 = vpack.c.bf16 %v1701_v60, %v1700_v58  ;;  %v3196_v1 = vpack.c.bf16 %v1765_v61, %v1764_v59  ;;  %v1312_v4 = vadd.f32 %v3894_v55, %v1311_v62  ;;  %v1568_v5 = vadd.f32 %v3894_v55, %v1567_v63  ;;  %v4069_v59 = vld [vmem:[%s4142_s2] ss:$0 sm:$0xff] }
 0x1b1   : > { %v1313_v2 = vpop.f32.mrf.mxu0  ;;  %v1569_v3 = vpop.f32.mrf.mxu1 }
 0x1b2   : > { %3276 = vst [vmem:[%s3908_s25 + $0x98] sm:$0xff] %v3036_v0   ;;  %3308 = vst [vmem:[%s3908_s25 + $0x198] sm:$0xff] %v3196_v1   ;;  %v1702_v12 = vmax.f32 %v1312_v4, 0.0  ;;  %v1766_v13 = vmax.f32 %v1568_v5, 0.0 }
 0x1b3   : > { %v1314_v6 = vpop.f32.mrf.mxu0  ;;  %v1570_v7 = vpop.f32.mrf.mxu1 }
 0x1b4   : > { %v1315_v8 = vadd.f32 %v3894_v55, %v1314_v6  ;;  %v1571_v9 = vadd.f32 %v3894_v55, %v1570_v7 }
 0x1b5   : > { %v1316_v10 = vpop.f32.mrf.mxu0  ;;  %v1572_v11 = vpop.f32.mrf.mxu1 }
 0x1b6   : > { %v1703_v14 = vmax.f32 %v1315_v8, 0.0  ;;  %v1767_v15 = vmax.f32 %v1571_v9, 0.0 }
 0x1b7   : > { %v1319_v16 = vpop.f32.mrf.mxu0  ;;  %v1575_v17 = vpop.f32.mrf.mxu1 }
 0x1b8   : > { %v3041_v18 = vpack.c.bf16 %v1703_v14, %v1702_v12  ;;  %v3201_v19 = vpack.c.bf16 %v1767_v15, %v1766_v13  ;;  %v1320_v22 = vadd.f32 %v3894_v55, %v1319_v16  ;;  %v1576_v23 = vadd.f32 %v3894_v55, %v1575_v17 }
 0x1b9   : > { %v1321_v20 = vpop.f32.mrf.mxu0  ;;  %v1577_v21 = vpop.f32.mrf.mxu1 }
 0x1ba   : > { %3277 = vst [vmem:[%s3908_s25 + $0xa0] sm:$0xff] %v3041_v18   ;;  %3309 = vst [vmem:[%s3908_s25 + $0x1a0] sm:$0xff] %v3201_v19   ;;  %v1704_v30 = vmax.f32 %v1320_v22, 0.0  ;;  %v1768_v31 = vmax.f32 %v1576_v23, 0.0 }
 0x1bb   : > { %v1322_v24 = vpop.f32.mrf.mxu0  ;;  %v1578_v25 = vpop.f32.mrf.mxu1 }
 0x1bc   : > { %v1323_v26 = vadd.f32 %v3894_v55, %v1322_v24  ;;  %v1579_v27 = vadd.f32 %v3894_v55, %v1578_v25 }
 0x1bd   : > { %v1324_v28 = vpop.f32.mrf.mxu0  ;;  %v1580_v29 = vpop.f32.mrf.mxu1 }
 0x1be   : > { %v1705_v32 = vmax.f32 %v1323_v26, 0.0  ;;  %v1769_v33 = vmax.f32 %v1579_v27, 0.0 }
 0x1bf   : > { %v1327_v34 = vpop.f32.mrf.mxu0  ;;  %v1583_v35 = vpop.f32.mrf.mxu1 }
 0x1c0   : > { %v3046_v36 = vpack.c.bf16 %v1705_v32, %v1704_v30  ;;  %v3206_v37 = vpack.c.bf16 %v1769_v33, %v1768_v31  ;;  %v1328_v40 = vadd.f32 %v3894_v55, %v1327_v34  ;;  %v1584_v41 = vadd.f32 %v3894_v55, %v1583_v35 }
 0x1c1   : > { %v1329_v38 = vpop.f32.mrf.mxu0  ;;  %v1585_v39 = vpop.f32.mrf.mxu1 }
 0x1c2   : > { %3278 = vst [vmem:[%s3908_s25 + $0xa8] sm:$0xff] %v3046_v36   ;;  %3310 = vst [vmem:[%s3908_s25 + $0x1a8] sm:$0xff] %v3206_v37   ;;  %v1706_v48 = vmax.f32 %v1328_v40, 0.0  ;;  %v1770_v49 = vmax.f32 %v1584_v41, 0.0 }
 0x1c3   : > { %v1330_v42 = vpop.f32.mrf.mxu0  ;;  %v1586_v43 = vpop.f32.mrf.mxu1 }
 0x1c4   : > { %v1331_v44 = vadd.f32 %v3894_v55, %v1330_v42  ;;  %v1587_v45 = vadd.f32 %v3894_v55, %v1586_v43 }
 0x1c5   : > { %v1332_v46 = vpop.f32.mrf.mxu0  ;;  %v1588_v47 = vpop.f32.mrf.mxu1 }
 0x1c6   : > { %v1707_v50 = vmax.f32 %v1331_v44, 0.0  ;;  %v1771_v51 = vmax.f32 %v1587_v45, 0.0 }
 0x1c7   : > { %v1335_v52 = vpop.f32.mrf.mxu0  ;;  %v1591_v53 = vpop.f32.mrf.mxu1 }
 0x1c8   : > { %v3051_v54 = vpack.c.bf16 %v1707_v50, %v1706_v48  ;;  %v3211_v56 = vpack.c.bf16 %v1771_v51, %v1770_v49  ;;  %v1336_v55 = vadd.f32 %v4069_v59, %v1335_v52  ;;  %v1592_v60 = vadd.f32 %v4069_v59, %v1591_v53 }
 0x1c9   : > { %v1337_v57 = vpop.f32.mrf.mxu0  ;;  %v1593_v58 = vpop.f32.mrf.mxu1 }
 0x1ca   : > { %3279 = vst [vmem:[%s3908_s25 + $0xb0] sm:$0xff] %v3051_v54   ;;  %3311 = vst [vmem:[%s3908_s25 + $0x1b0] sm:$0xff] %v3211_v56   ;;  %v1708_v3 = vmax.f32 %v1336_v55, 0.0  ;;  %v1772_v4 = vmax.f32 %v1592_v60, 0.0 }
 0x1cb   : > { %v1338_v61 = vpop.f32.mrf.mxu0  ;;  %v1594_v62 = vpop.f32.mrf.mxu1 }
 0x1cc   : > { %v1339_v63 = vadd.f32 %v4069_v59, %v1338_v61  ;;  %v1595_v0 = vadd.f32 %v4069_v59, %v1594_v62 }
 0x1cd   : > { %v1340_v1 = vpop.f32.mrf.mxu0  ;;  %v1596_v2 = vpop.f32.mrf.mxu1 }
 0x1ce   : > { %v1709_v5 = vmax.f32 %v1339_v63, 0.0  ;;  %v1773_v6 = vmax.f32 %v1595_v0, 0.0 }
 0x1cf   : > { %v1343_v7 = vpop.f32.mrf.mxu0  ;;  %v1599_v8 = vpop.f32.mrf.mxu1 }
 0x1d0   : > { %v3056_v9 = vpack.c.bf16 %v1709_v5, %v1708_v3  ;;  %v3216_v10 = vpack.c.bf16 %v1773_v6, %v1772_v4  ;;  %v1344_v13 = vadd.f32 %v4069_v59, %v1343_v7  ;;  %v1600_v14 = vadd.f32 %v4069_v59, %v1599_v8 }
 0x1d1   : > { %v1345_v11 = vpop.f32.mrf.mxu0  ;;  %v1601_v12 = vpop.f32.mrf.mxu1 }
 0x1d2   : > { %3280 = vst [vmem:[%s3908_s25 + $0xb8] sm:$0xff] %v3056_v9   ;;  %3312 = vst [vmem:[%s3908_s25 + $0x1b8] sm:$0xff] %v3216_v10   ;;  %v1710_v21 = vmax.f32 %v1344_v13, 0.0  ;;  %v1774_v22 = vmax.f32 %v1600_v14, 0.0 }
 0x1d3   : > { %v1346_v15 = vpop.f32.mrf.mxu0  ;;  %v1602_v16 = vpop.f32.mrf.mxu1 }
 0x1d4   : > { %v1347_v17 = vadd.f32 %v4069_v59, %v1346_v15  ;;  %v1603_v18 = vadd.f32 %v4069_v59, %v1602_v16 }
 0x1d5   : > { %v1348_v19 = vpop.f32.mrf.mxu0  ;;  %v1604_v20 = vpop.f32.mrf.mxu1 }
 0x1d6   : > { %v1711_v23 = vmax.f32 %v1347_v17, 0.0  ;;  %v1775_v24 = vmax.f32 %v1603_v18, 0.0 }
 0x1d7   : > { %v1351_v25 = vpop.f32.mrf.mxu0  ;;  %v1607_v26 = vpop.f32.mrf.mxu1 }
 0x1d8   : > { %v3061_v27 = vpack.c.bf16 %v1711_v23, %v1710_v21  ;;  %v3221_v28 = vpack.c.bf16 %v1775_v24, %v1774_v22  ;;  %v1352_v31 = vadd.f32 %v4069_v59, %v1351_v25  ;;  %v1608_v32 = vadd.f32 %v4069_v59, %v1607_v26 }
 0x1d9   : > { %v1353_v29 = vpop.f32.mrf.mxu0  ;;  %v1609_v30 = vpop.f32.mrf.mxu1 }
 0x1da   : > { %3281 = vst [vmem:[%s3908_s25 + $0xc0] sm:$0xff] %v3061_v27   ;;  %3313 = vst [vmem:[%s3908_s25 + $0x1c0] sm:$0xff] %v3221_v28   ;;  %v1712_v39 = vmax.f32 %v1352_v31, 0.0  ;;  %v1776_v40 = vmax.f32 %v1608_v32, 0.0 }
 0x1db   : > { %v1354_v33 = vpop.f32.mrf.mxu0  ;;  %v1610_v34 = vpop.f32.mrf.mxu1 }
 0x1dc   : > { %v1355_v35 = vadd.f32 %v4069_v59, %v1354_v33  ;;  %v1611_v36 = vadd.f32 %v4069_v59, %v1610_v34 }
 0x1dd   : > { %v1356_v37 = vpop.f32.mrf.mxu0  ;;  %v1612_v38 = vpop.f32.mrf.mxu1 }
 0x1de   : > { %v1713_v41 = vmax.f32 %v1355_v35, 0.0  ;;  %v1777_v42 = vmax.f32 %v1611_v36, 0.0 }
 0x1df   : > { %v1359_v43 = vpop.f32.mrf.mxu0  ;;  %v1615_v44 = vpop.f32.mrf.mxu1 }
 0x1e0   : > { %v3066_v45 = vpack.c.bf16 %v1713_v41, %v1712_v39  ;;  %v3226_v46 = vpack.c.bf16 %v1777_v42, %v1776_v40  ;;  %v1360_v49 = vadd.f32 %v4069_v59, %v1359_v43  ;;  %v1616_v50 = vadd.f32 %v4069_v59, %v1615_v44 }
 0x1e1   : > { %v1361_v47 = vpop.f32.mrf.mxu0  ;;  %v1617_v48 = vpop.f32.mrf.mxu1 }
 0x1e2   : > { %3282 = vst [vmem:[%s3908_s25 + $0xc8] sm:$0xff] %v3066_v45   ;;  %3314 = vst [vmem:[%s3908_s25 + $0x1c8] sm:$0xff] %v3226_v46   ;;  %v1714_v58 = vmax.f32 %v1360_v49, 0.0  ;;  %v1778_v55 = vmax.f32 %v1616_v50, 0.0 }
 0x1e3   : > { %v1362_v51 = vpop.f32.mrf.mxu0  ;;  %v1618_v52 = vpop.f32.mrf.mxu1 }
 0x1e4   : > { %v1363_v53 = vadd.f32 %v4069_v59, %v1362_v51  ;;  %v1619_v54 = vadd.f32 %v4069_v59, %v1618_v52 }
 0x1e5   : > { %v1364_v56 = vpop.f32.mrf.mxu0  ;;  %v1620_v57 = vpop.f32.mrf.mxu1 }
 0x1e6   : > { %v1715_v60 = vmax.f32 %v1363_v53, 0.0  ;;  %v1779_v61 = vmax.f32 %v1619_v54, 0.0 }
 0x1e7   : > { %v1367_v62 = vpop.f32.mrf.mxu0  ;;  %v1623_v63 = vpop.f32.mrf.mxu1 }
 0x1e8   : > { %v3071_v0 = vpack.c.bf16 %v1715_v60, %v1714_v58  ;;  %v3231_v1 = vpack.c.bf16 %v1779_v61, %v1778_v55  ;;  %v1368_v4 = vadd.f32 %v4069_v59, %v1367_v62  ;;  %v1624_v5 = vadd.f32 %v4069_v59, %v1623_v63 }
 0x1e9   : > { %v1369_v2 = vpop.f32.mrf.mxu0  ;;  %v1625_v3 = vpop.f32.mrf.mxu1 }
 0x1ea   : > { %3283 = vst [vmem:[%s3908_s25 + $0xd0] sm:$0xff] %v3071_v0   ;;  %3315 = vst [vmem:[%s3908_s25 + $0x1d0] sm:$0xff] %v3231_v1   ;;  %v1716_v12 = vmax.f32 %v1368_v4, 0.0  ;;  %v1780_v13 = vmax.f32 %v1624_v5, 0.0 }
 0x1eb   : > { %v1370_v6 = vpop.f32.mrf.mxu0  ;;  %v1626_v7 = vpop.f32.mrf.mxu1 }
 0x1ec   : > { %v1371_v8 = vadd.f32 %v4069_v59, %v1370_v6  ;;  %v1627_v9 = vadd.f32 %v4069_v59, %v1626_v7 }
 0x1ed   : > { %v1372_v10 = vpop.f32.mrf.mxu0  ;;  %v1628_v11 = vpop.f32.mrf.mxu1 }
 0x1ee   : > { %v1717_v14 = vmax.f32 %v1371_v8, 0.0  ;;  %v1781_v15 = vmax.f32 %v1627_v9, 0.0 }
 0x1ef   : > { %v1375_v16 = vpop.f32.mrf.mxu0  ;;  %v1631_v17 = vpop.f32.mrf.mxu1 }
 0x1f0   : > { %v3076_v18 = vpack.c.bf16 %v1717_v14, %v1716_v12  ;;  %v3236_v19 = vpack.c.bf16 %v1781_v15, %v1780_v13  ;;  %v1376_v22 = vadd.f32 %v4069_v59, %v1375_v16  ;;  %v1632_v23 = vadd.f32 %v4069_v59, %v1631_v17 }
 0x1f1   : > { %v1377_v20 = vpop.f32.mrf.mxu0  ;;  %v1633_v21 = vpop.f32.mrf.mxu1 }
 0x1f2   : > { %3284 = vst [vmem:[%s3908_s25 + $0xd8] sm:$0xff] %v3076_v18   ;;  %3316 = vst [vmem:[%s3908_s25 + $0x1d8] sm:$0xff] %v3236_v19   ;;  %v1718_v30 = vmax.f32 %v1376_v22, 0.0  ;;  %v1782_v31 = vmax.f32 %v1632_v23, 0.0 }
 0x1f3   : > { %v1378_v24 = vpop.f32.mrf.mxu0  ;;  %v1634_v25 = vpop.f32.mrf.mxu1 }
 0x1f4   : > { %v1379_v26 = vadd.f32 %v4069_v59, %v1378_v24  ;;  %v1635_v27 = vadd.f32 %v4069_v59, %v1634_v25 }
 0x1f5   : > { %v1380_v28 = vpop.f32.mrf.mxu0  ;;  %v1636_v29 = vpop.f32.mrf.mxu1 }
 0x1f6   : > { %v1719_v32 = vmax.f32 %v1379_v26, 0.0  ;;  %v1783_v33 = vmax.f32 %v1635_v27, 0.0 }
 0x1f7   : > { %v1383_v34 = vpop.f32.mrf.mxu0  ;;  %v1639_v35 = vpop.f32.mrf.mxu1 }
 0x1f8   : > { %v3081_v36 = vpack.c.bf16 %v1719_v32, %v1718_v30  ;;  %v3241_v37 = vpack.c.bf16 %v1783_v33, %v1782_v31  ;;  %v1384_v40 = vadd.f32 %v4069_v59, %v1383_v34  ;;  %v1640_v41 = vadd.f32 %v4069_v59, %v1639_v35 }
 0x1f9   : > { %v1385_v38 = vpop.f32.mrf.mxu0  ;;  %v1641_v39 = vpop.f32.mrf.mxu1 }
 0x1fa   : > { %3285 = vst [vmem:[%s3908_s25 + $0xe0] sm:$0xff] %v3081_v36   ;;  %3317 = vst [vmem:[%s3908_s25 + $0x1e0] sm:$0xff] %v3241_v37   ;;  %v1720_v48 = vmax.f32 %v1384_v40, 0.0  ;;  %v1784_v49 = vmax.f32 %v1640_v41, 0.0 }
 0x1fb   : > { %v1386_v42 = vpop.f32.mrf.mxu0  ;;  %v1642_v43 = vpop.f32.mrf.mxu1 }
 0x1fc   : > { %v1387_v44 = vadd.f32 %v4069_v59, %v1386_v42  ;;  %v1643_v45 = vadd.f32 %v4069_v59, %v1642_v43 }
 0x1fd   : > { %v1388_v46 = vpop.f32.mrf.mxu0  ;;  %v1644_v47 = vpop.f32.mrf.mxu1 }
 0x1fe   : > { %v1721_v50 = vmax.f32 %v1387_v44, 0.0  ;;  %v1785_v51 = vmax.f32 %v1643_v45, 0.0 }
 0x1ff   : > { %v1391_v52 = vpop.f32.mrf.mxu0  ;;  %v1647_v53 = vpop.f32.mrf.mxu1 }
 0x200   : > { %v3086_v54 = vpack.c.bf16 %v1721_v50, %v1720_v48  ;;  %v3246_v56 = vpack.c.bf16 %v1785_v51, %v1784_v49  ;;  %v1392_v55 = vadd.f32 %v4069_v59, %v1391_v52  ;;  %v1648_v60 = vadd.f32 %v4069_v59, %v1647_v53 }
 0x201   : > { %v1393_v57 = vpop.f32.mrf.mxu0  ;;  %v1649_v58 = vpop.f32.mrf.mxu1 }
 0x202   : > { %3286 = vst [vmem:[%s3908_s25 + $0xe8] sm:$0xff] %v3086_v54   ;;  %3318 = vst [vmem:[%s3908_s25 + $0x1e8] sm:$0xff] %v3246_v56   ;;  %v1722_v3 = vmax.f32 %v1392_v55, 0.0  ;;  %v1786_v4 = vmax.f32 %v1648_v60, 0.0 }
 0x203   : > { %v1394_v61 = vpop.f32.mrf.mxu0  ;;  %v1650_v62 = vpop.f32.mrf.mxu1 }
 0x204   : > { %v1395_v63 = vadd.f32 %v4069_v59, %v1394_v61  ;;  %v1651_v0 = vadd.f32 %v4069_v59, %v1650_v62 }
 0x205   : > { %v1396_v1 = vpop.f32.mrf.mxu0  ;;  %v1652_v2 = vpop.f32.mrf.mxu1 }
 0x206   : > { %v1723_v5 = vmax.f32 %v1395_v63, 0.0  ;;  %v1787_v6 = vmax.f32 %v1651_v0, 0.0 }
 0x207   : > { %v1399_v7 = vpop.f32.mrf.mxu0  ;;  %v1655_v8 = vpop.f32.mrf.mxu1 }
 0x208   : > { %v3091_v9 = vpack.c.bf16 %v1723_v5, %v1722_v3  ;;  %v3251_v10 = vpack.c.bf16 %v1787_v6, %v1786_v4  ;;  %v1400_v13 = vadd.f32 %v4069_v59, %v1399_v7  ;;  %v1656_v14 = vadd.f32 %v4069_v59, %v1655_v8 }
 0x209   : > { %v1401_v11 = vpop.f32.mrf.mxu0  ;;  %v1657_v12 = vpop.f32.mrf.mxu1 }
 0x20a   : > { %3287 = vst [vmem:[%s3908_s25 + $0xf0] sm:$0xff] %v3091_v9   ;;  %3319 = vst [vmem:[%s3908_s25 + $0x1f0] sm:$0xff] %v3251_v10   ;;  %v1724_v21 = vmax.f32 %v1400_v13, 0.0  ;;  %v1788_v22 = vmax.f32 %v1656_v14, 0.0 }
 0x20b   : > { %v1402_v15 = vpop.f32.mrf.mxu0  ;;  %v1658_v16 = vpop.f32.mrf.mxu1 }
 0x20c   : > { %v1403_v17 = vadd.f32 %v4069_v59, %v1402_v15  ;;  %v1659_v18 = vadd.f32 %v4069_v59, %v1658_v16 }
 0x20d   : > { %v1404_v19 = vpop.f32.mrf.mxu0  ;;  %v1660_v20 = vpop.f32.mrf.mxu1 }
 0x20e   : > { %v1725_v23 = vmax.f32 %v1403_v17, 0.0  ;;  %v1789_v24 = vmax.f32 %v1659_v18, 0.0 }
 0x210   : > { %v3096_v25 = vpack.c.bf16 %v1725_v23, %v1724_v21  ;;  %v3256_v26 = vpack.c.bf16 %v1789_v24, %v1788_v22 }
 0x212   : > { %3288 = vst [vmem:[%s3908_s25 + $0xf8] sm:$0xff] %v3096_v25   ;;  %3320 = vst [vmem:[%s3908_s25 + $0x1f8] sm:$0xff] %v3256_v26  }
 0x213 PF: > { %s13_s16 = sadd.s32 1, %s3641_s16   ;;  %s4144_s12 = smov %s3633_s14 }
 0x214   : > { %p10_p7 = scmp.ge.s32.totalorder %s13_s16, 10   ;;  %s4145_s13 = smov %s3637_s15 }
 0x215   : > { %s4146_s14 = smov %s4149_s17  ;;  %s4147_s15 = smov %s4153_s18 }
 0x216   :  { %12 = sbr.rel (!%p10_p7) target bundleno = 3 (0x3), region = 62 }

// kernel: vgg6_forward.8
= control target key start
LH: loop header
LB: loop body
LE: loop exit
PB: predicated region body
PF: predicated region fallthrough
CT: control target
= control target key end

     0   :  { %s1146_s12 = smov 0   ;;  %s1148_s13 = smov 0   ;;  %s1320_s0 = inlined_call_operand.vmem [shape: bf16[2,64,512], index: 0, kind: input, shape index: {}]   ;;  %s1321_s1 = inlined_call_operand.vmem [shape: bf16[512,128], index: 1, kind: input, shape index: {}]   ;;  %s1322_s2 = inlined_call_operand.vmem [shape: f32[1,128], index: 2, kind: input, shape index: {}]   ;;  %s1323_s3 = inlined_call_operand.vmem [shape: bf16[2,64,128], index: 3, kind: output, shape index: {}]  }
   0x1   :  { %s1150_s14 = smov 0  }
   0x2 LB: > { %s25_s15 = sadd.s32 1, %s1120_s13  ;;  %p845_p0 = scmp.ge.s32.totalorder %s1124_s14, 1  ;;  %s1124_s14 = sphi %s1150_s14, %s13_s14   ;;  %s1120_s13 = sphi %s1148_s13, %s1325_s13   ;;  %s1116_s12 = sphi %s1146_s12, %s1324_s12  }
   0x3   : > { %p27_p1 = scmp.ge.s32.totalorder %s25_s15, 2  ;;  %p159_p2 = scmp.lt.s32.totalorder %s1124_s14, 3 }
   0x5   : > { %s1327_s15 = smov (%p27_p1, %s25_s15), 0  ;;  %p160_p3 = pnand %p845_p0, %p159_p2 }
   0x6   : > { %p193_p4 = scmp.lt.s32.totalorder (!%p160_p3), %s1116_s12, 1 }
   0x7   : > { %163 = sbr.rel (%p160_p3) target bundleno = 280 (0x118), region = 32 }
   0xc   : > { %v1046_v0 = vld [vmem:[%s1321_s1 + $0x78] sm:$0xff]   ;;  %v1050_v4 = vld [vmem:[%s1321_s1 + $0x70] sm:$0xff]   ;;  %v1054_v8 = vld [vmem:[%s1321_s1 + $0x68] sm:$0xff]   ;;  %s1329_s12 = smov (!%p193_p4, %s1116_s12), 1 }
   0xd   : > { %v1047_v1 = vld [vmem:[%s1321_s1 + $0xf8] sm:$0xff]   ;;  %942 = vmatprep.subr.bf16.mxu0 %v1046_v0  ;;  %v1051_v5 = vld [vmem:[%s1321_s1 + $0xf0] sm:$0xff]   ;;  %v1055_v9 = vld [vmem:[%s1321_s1 + $0xe8] sm:$0xff]   ;;  %s909_s24 = sshll.u32 %s1329_s12, 7  ;;  %s910_s17 = sshll.u32 %s1329_s12, 5 }
   0xe   : > { %v1048_v2 = vld [vmem:[%s1321_s1 + $0x38] sm:$0xff]   ;;  %982 = vmatprep.subr.bf16.mxu1 %v1047_v1  ;;  %v1052_v6 = vld [vmem:[%s1321_s1 + $0x30] sm:$0xff]   ;;  %v1056_v10 = vld [vmem:[%s1321_s1 + $0x28] sm:$0xff]   ;;  %s1264_s6 = scalar_lea.vmem %s1320_s0, %s909_s24  ;;  %s1300_s20 = scalar_lea.vmem %s1323_s3, %s910_s17 }
   0xf   : > { %v1049_v3 = vld [vmem:[%s1321_s1 + $0xb8] sm:$0xff]   ;;  %943 = vmatpush3.bf16.msra.mxu0 %v1048_v2  ;;  %v1053_v7 = vld [vmem:[%s1321_s1 + $0xb0] sm:$0xff]   ;;  %v1057_v11 = vld [vmem:[%s1321_s1 + $0xa8] sm:$0xff]  }
  0x10   : > { %983 = vmatpush3.bf16.msra.mxu1 %v1049_v3  ;;  %944 = vmatprep.subr.bf16.mxu0 %v1050_v4  ;;  %v1058_v12 = vld [vmem:[%s1321_s1 + $0x60] sm:$0xff]   ;;  %v1062_v16 = vld [vmem:[%s1321_s1 + $0x58] sm:$0xff]   ;;  %v1066_v20 = vld [vmem:[%s1321_s1 + $0x50] sm:$0xff]  }
  0x11   : > { %984 = vmatprep.subr.bf16.mxu1 %v1051_v5  ;;  %v1059_v13 = vld [vmem:[%s1321_s1 + $0xe0] sm:$0xff]   ;;  %v1063_v17 = vld [vmem:[%s1321_s1 + $0xd8] sm:$0xff]   ;;  %v1067_v21 = vld [vmem:[%s1321_s1 + $0xd0] sm:$0xff]  }
  0x12   : > { %v1060_v14 = vld [vmem:[%s1321_s1 + $0x20] sm:$0xff]   ;;  %v1064_v18 = vld [vmem:[%s1321_s1 + $0x18] sm:$0xff]   ;;  %v1068_v22 = vld [vmem:[%s1321_s1 + $0x10] sm:$0xff]  }
  0x13   : > { %945 = vmatpush3.bf16.msra.mxu0 %v1052_v6  ;;  %v1061_v15 = vld [vmem:[%s1321_s1 + $0xa0] sm:$0xff]   ;;  %v1065_v19 = vld [vmem:[%s1321_s1 + $0x98] sm:$0xff]   ;;  %v1069_v23 = vld [vmem:[%s1321_s1 + $0x90] sm:$0xff]  }
  0x14   : > { %985 = vmatpush3.bf16.msra.mxu1 %v1053_v7  ;;  %946 = vmatprep.subr.bf16.mxu0 %v1054_v8  ;;  %v1070_v24 = vld [vmem:[%s1321_s1 + $0x48] sm:$0xff]   ;;  %v1074_v28 = vld [vmem:[%s1321_s1 + $0x40] sm:$0xff]  }
  0x15   : > { %986 = vmatprep.subr.bf16.mxu1 %v1055_v9  ;;  %v1071_v25 = vld [vmem:[%s1321_s1 + $0xc8] sm:$0xff]   ;;  %v1075_v29 = vld [vmem:[%s1321_s1 + $0xc0] sm:$0xff]  }
  0x16   : > { %v1072_v26 = vld [vmem:[%s1321_s1 + $0x8] sm:$0xff]   ;;  %v1076_v30 = vld [vmem:[%s1321_s1] sm:$0xff]  }
  0x17   : > { %947 = vmatpush3.bf16.msra.mxu0 %v1056_v10  ;;  %v1073_v27 = vld [vmem:[%s1321_s1 + $0x88] sm:$0xff]   ;;  %v1077_v31 = vld [vmem:[%s1321_s1 + $0x80] sm:$0xff]  }
  0x18   : > { %987 = vmatpush3.bf16.msra.mxu1 %v1057_v11  ;;  %948 = vmatprep.subr.bf16.mxu0 %v1058_v12  ;;  %v1078_v32 = vld [vmem:[%s1264_s6] ss:$16 sps:$4 sm:$0xff]   ;;  %v1080_v33 = vld [vmem:[%s1264_s6 + $0x4] ss:$16 sps:$4 sm:$0xff]   ;;  %v1081_v34 = vld [vmem:[%s1264_s6 + $0x8] ss:$16 sps:$4 sm:$0xff]  }
  0x19   : > { %988 = vmatprep.subr.bf16.mxu1 %v1059_v13  ;;  %v1083_v35 = vld [vmem:[%s1264_s6 + $0xc] ss:$16 sps:$4 sm:$0xff]   ;;  %605 = vmatprep.mubr.bf16.mxu0 %v1080_v33  ;;  %v1084_v36 = vld [vmem:[%s1264_s6 + $0x24] ss:$16 sps:$4 sm:$0xff]   ;;  %v1088_v38 = vld [vmem:[%s1264_s6 + $0x20] ss:$16 sps:$4 sm:$0xff]  }
  0x1a   : > { %670 = vmatprep.mubr.bf16.mxu1 %v1083_v35  ;;  %v1086_v37 = vld [vmem:[%s1264_s6 + $0x2c] ss:$16 sps:$4 sm:$0xff]   ;;  %v1089_v39 = vld [vmem:[%s1264_s6 + $0x28] ss:$16 sps:$4 sm:$0xff]   ;;  %v1090_v40 = vld [vmem:[%s1264_s6 + $0x44] ss:$16 sps:$4 sm:$0xff]  }
  0x1b   : > { %949 = vmatpush3.bf16.msra.mxu0 %v1060_v14  ;;  %v1092_v41 = vld [vmem:[%s1264_s6 + $0x4c] ss:$16 sps:$4 sm:$0xff]   ;;  %v1094_v42 = vld [vmem:[%s1264_s6 + $0x40] ss:$16 sps:$4 sm:$0xff]   ;;  %v1095_v43 = vld [vmem:[%s1264_s6 + $0x48] ss:$16 sps:$4 sm:$0xff]  }
  0x1c   : > { %989 = vmatpush3.bf16.msra.mxu1 %v1061_v15  ;;  %950 = vmatprep.subr.bf16.mxu0 %v1062_v16  ;;  %v1096_v44 = vld [vmem:[%s1264_s6 + $0x64] ss:$16 sps:$4 sm:$0xff]   ;;  %v1098_v45 = vld [vmem:[%s1264_s6 + $0x6c] ss:$16 sps:$4 sm:$0xff]   ;;  %v1100_v46 = vld [vmem:[%s1264_s6 + $0x60] ss:$16 sps:$4 sm:$0xff]  }
  0x1d   : > { %990 = vmatprep.subr.bf16.mxu1 %v1063_v17  ;;  %v1101_v47 = vld [vmem:[%s1264_s6 + $0x68] ss:$16 sps:$4 sm:$0xff]   ;;  %v1291_v50 = vld [vmem:[%s1322_s2] ss:$0 sm:$0xff] }
  0x1f   : > { %951 = vmatpush3.bf16.msra.mxu0 %v1064_v18 }
  0x20   : > { %991 = vmatpush3.bf16.msra.mxu1 %v1065_v19  ;;  %952 = vmatprep.subr.bf16.mxu0 %v1066_v20 }
  0x21   : > { %992 = vmatprep.subr.bf16.mxu1 %v1067_v21 }
  0x23   : > { %953 = vmatpush3.bf16.msra.mxu0 %v1068_v22 }
  0x24   : > { %993 = vmatpush3.bf16.msra.mxu1 %v1069_v23  ;;  %954 = vmatprep.subr.bf16.mxu0 %v1070_v24 }
  0x25   : > { %994 = vmatprep.subr.bf16.mxu1 %v1071_v25 }
  0x27   : > { %955 = vmatpush3.bf16.msra.mxu0 %v1072_v26 }
  0x28   : > { %995 = vmatpush3.bf16.msra.mxu1 %v1073_v27  ;;  %956 = vmatprep.subr.bf16.mxu0 %v1074_v28 }
  0x29   : > { %996 = vmatprep.subr.bf16.mxu1 %v1075_v29 }
  0x2b   : > { %957 = vmatpush3.bf16.msra.mxu0 %v1076_v30 }
  0x2c   : > { %997 = vmatpush3.bf16.msra.mxu1 %v1077_v31 }
  0x2e   : > { %606 = vmatmul.mubr.bf16.vlgmr.msra.gmra.mxu0 %v1078_v32 }
  0x2f   : > { %671 = vmatmul.mubr.bf16.vlgmr.msra.gmra.mxu1 %v1081_v34  ;;  %613 = vmatprep.mubr.bf16.mxu0 %v1084_v36 }
  0x30   : > { %678 = vmatprep.mubr.bf16.mxu1 %v1086_v37 }
  0x36   : > { %614 = vmatmul.mubr.bf16.gmra.mxu0 %v1088_v38 }
  0x37   : > { %679 = vmatmul.mubr.bf16.gmra.mxu1 %v1089_v39  ;;  %621 = vmatprep.mubr.bf16.mxu0 %v1090_v40 }
  0x38   : > { %686 = vmatprep.mubr.bf16.mxu1 %v1092_v41 }
  0x3e   : > { %622 = vmatmul.mubr.bf16.gmra.mxu0 %v1094_v42 }
  0x3f   : > { %687 = vmatmul.mubr.bf16.gmra.mxu1 %v1095_v43  ;;  %629 = vmatprep.mubr.bf16.mxu0 %v1096_v44 }
  0x40   : > { %694 = vmatprep.mubr.bf16.mxu1 %v1098_v45 }
  0x46   : > { %630 = vmatmul.mubr.bf16.gmra.mxu0 %v1100_v46 }
  0x47   : > { %695 = vmatmul.mubr.bf16.gmra.mxu1 %v1101_v47 }
  0xee   : > { %v958_v48 = vpop.f32.mrf.mxu0 }
  0xef   : > { %v998_v49 = vpop.f32.mrf.mxu1 }
  0xf0   : > { %v959_v51 = vpop.f32.mrf.mxu0 }
  0xf1   : > { %v960_v52 = vadd.f32 %v959_v51, %v958_v48  ;;  %v999_v53 = vpop.f32.mrf.mxu1 }
  0xf2   : > { %v961_v54 = vpop.f32.mrf.mxu0  ;;  %v1000_v58 = vadd.f32 %v999_v53, %v998_v49 }
  0xf3   : > { %v608_v55 = vadd.f32 %v960_v52, %v1291_v50  ;;  %v1001_v56 = vpop.f32.mrf.mxu1 }
  0xf4   : > { %v962_v57 = vpop.f32.mrf.mxu0 }
  0xf5   : > { %v963_v59 = vadd.f32 %v962_v57, %v961_v54  ;;  %v1002_v60 = vpop.f32.mrf.mxu1  ;;  %v673_v62 = vadd.f32 %v1000_v58, %v608_v55 }
  0xf6   : > { %v964_v61 = vpop.f32.mrf.mxu0  ;;  %v1003_v0 = vadd.f32 %v1002_v60, %v1001_v56 }
  0xf7   : > { %v611_v63 = vadd.f32 %v963_v59, %v1291_v50  ;;  %v1004_v1 = vpop.f32.mrf.mxu1  ;;  %v703_v7 = vmax.f32 %v673_v62, 0.0 }
  0xf8   : > { %v965_v2 = vpop.f32.mrf.mxu0 }
  0xf9   : > { %v676_v3 = vadd.f32 %v1003_v0, %v611_v63  ;;  %v966_v4 = vadd.f32 %v965_v2, %v964_v61  ;;  %v1005_v5 = vpop.f32.mrf.mxu1 }
  0xfa   : > { %v967_v6 = vpop.f32.mrf.mxu0  ;;  %v1006_v13 = vadd.f32 %v1005_v5, %v1004_v1 }
  0xfb   : > { %v704_v8 = vmax.f32 %v676_v3, 0.0  ;;  %v616_v9 = vadd.f32 %v966_v4, %v1291_v50  ;;  %v1007_v10 = vpop.f32.mrf.mxu1 }
  0xfc   : > { %v968_v11 = vpop.f32.mrf.mxu0 }
  0xfd   : > { %v922_v12 = vpack.c.bf16 %v704_v8, %v703_v7  ;;  %v969_v14 = vadd.f32 %v968_v11, %v967_v6  ;;  %v1008_v15 = vpop.f32.mrf.mxu1  ;;  %v681_v17 = vadd.f32 %v1006_v13, %v616_v9 }
  0xfe   : > { %v970_v16 = vpop.f32.mrf.mxu0  ;;  %v1009_v19 = vadd.f32 %v1008_v15, %v1007_v10 }
  0xff   : > { %923 = vst [vmem:[%s1300_s20] sm:$0xff] %v922_v12   ;;  %v619_v18 = vadd.f32 %v969_v14, %v1291_v50  ;;  %v1010_v20 = vpop.f32.mrf.mxu1  ;;  %v705_v26 = vmax.f32 %v681_v17, 0.0 }
 0x100   : > { %v971_v21 = vpop.f32.mrf.mxu0 }
 0x101   : > { %v684_v22 = vadd.f32 %v1009_v19, %v619_v18  ;;  %v972_v23 = vadd.f32 %v971_v21, %v970_v16  ;;  %v1011_v24 = vpop.f32.mrf.mxu1 }
 0x102   : > { %v973_v25 = vpop.f32.mrf.mxu0  ;;  %v1012_v32 = vadd.f32 %v1011_v24, %v1010_v20 }
 0x103   : > { %v706_v27 = vmax.f32 %v684_v22, 0.0  ;;  %v624_v28 = vadd.f32 %v972_v23, %v1291_v50  ;;  %v1013_v29 = vpop.f32.mrf.mxu1 }
 0x104   : > { %v974_v30 = vpop.f32.mrf.mxu0 }
 0x105   : > { %v927_v31 = vpack.c.bf16 %v706_v27, %v705_v26  ;;  %v975_v33 = vadd.f32 %v974_v30, %v973_v25  ;;  %v1014_v34 = vpop.f32.mrf.mxu1  ;;  %v689_v36 = vadd.f32 %v1012_v32, %v624_v28 }
 0x106   : > { %v976_v35 = vpop.f32.mrf.mxu0  ;;  %v1015_v38 = vadd.f32 %v1014_v34, %v1013_v29 }
 0x107   : > { %939 = vst [vmem:[%s1300_s20 + $0x8] sm:$0xff] %v927_v31   ;;  %v627_v37 = vadd.f32 %v975_v33, %v1291_v50  ;;  %v1016_v39 = vpop.f32.mrf.mxu1  ;;  %v707_v45 = vmax.f32 %v689_v36, 0.0 }
 0x108   : > { %v977_v40 = vpop.f32.mrf.mxu0 }
 0x109   : > { %v692_v41 = vadd.f32 %v1015_v38, %v627_v37  ;;  %v978_v42 = vadd.f32 %v977_v40, %v976_v35  ;;  %v1017_v43 = vpop.f32.mrf.mxu1 }
 0x10a   : > { %v979_v44 = vpop.f32.mrf.mxu0  ;;  %v1018_v52 = vadd.f32 %v1017_v43, %v1016_v39 }
 0x10b   : > { %v708_v46 = vmax.f32 %v692_v41, 0.0  ;;  %v632_v47 = vadd.f32 %v978_v42, %v1291_v50  ;;  %v1019_v48 = vpop.f32.mrf.mxu1 }
 0x10c   : > { %v980_v49 = vpop.f32.mrf.mxu0 }
 0x10d   : > { %v932_v51 = vpack.c.bf16 %v708_v46, %v707_v45  ;;  %v981_v53 = vadd.f32 %v980_v49, %v979_v44  ;;  %v1020_v54 = vpop.f32.mrf.mxu1  ;;  %v697_v55 = vadd.f32 %v1018_v52, %v632_v47 }
 0x10e   : > { %v1021_v57 = vadd.f32 %v1020_v54, %v1019_v48 }
 0x10f   : > { %940 = vst [vmem:[%s1300_s20 + $0x10] sm:$0xff] %v932_v51   ;;  %v635_v56 = vadd.f32 %v981_v53, %v1291_v50  ;;  %v709_v59 = vmax.f32 %v697_v55, 0.0 }
 0x111   : > { %v700_v58 = vadd.f32 %v1021_v57, %v635_v56 }
 0x113   : > { %v710_v60 = vmax.f32 %v700_v58, 0.0 }
 0x115   : > { %v937_v61 = vpack.c.bf16 %v710_v60, %v709_v59 }
 0x117   : > { %941 = vst [vmem:[%s1300_s20 + $0x18] sm:$0xff] %v937_v61  }
 0x118 PF: > { %s13_s14 = sadd.s32 1, %s1124_s14   ;;  %s1324_s12 = smov %s1120_s13 }
 0x119   : > { %p10_p5 = scmp.ge.s32.totalorder %s13_s14, 4   ;;  %s1325_s13 = smov %s1327_s15 }
 0x11b   :  { %12 = sbr.rel (!%p10_p5) target bundleno = 2 (0x2), region = 62 }

// kernel: vgg6_forward.9
= control target key start
LH: loop header
LB: loop body
LE: loop exit
PB: predicated region body
PF: predicated region fallthrough
CT: control target
= control target key end

     0   :  { %s1699_s12 = smov 0   ;;  %s1701_s13 = smov 0   ;;  %s1984_s0 = inlined_call_operand.vmem [shape: bf16[2,64,896], index: 0, kind: input, shape index: {}]   ;;  %s1985_s1 = inlined_call_operand.vmem [shape: bf16[896,128], index: 1, kind: input, shape index: {}]   ;;  %s1986_s2 = inlined_call_operand.vmem [shape: f32[1,128], index: 2, kind: input, shape index: {}]   ;;  %s1987_s3 = inlined_call_operand.vmem [shape: bf16[2,64,128], index: 3, kind: output, shape index: {}]  }
   0x1   :  { %s1703_s14 = smov 0  }
   0x2 LB: > { %s25_s15 = sadd.s32 1, %s1673_s13  ;;  %p1247_p0 = scmp.ge.s32.totalorder %s1677_s14, 1  ;;  %s1677_s14 = sphi %s1703_s14, %s13_s14   ;;  %s1673_s13 = sphi %s1701_s13, %s1989_s13   ;;  %s1669_s12 = sphi %s1699_s12, %s1988_s12  }
   0x3   : > { %p27_p1 = scmp.ge.s32.totalorder %s25_s15, 2  ;;  %p159_p2 = scmp.lt.s32.totalorder %s1677_s14, 3 }
   0x5   : > { %s1991_s15 = smov (%p27_p1, %s25_s15), 0  ;;  %p160_p3 = pnand %p1247_p0, %p159_p2 }
   0x6   : > { %p193_p4 = scmp.lt.s32.totalorder (!%p160_p3), %s1669_s12, 1 }
   0x7   : > { %163 = sbr.rel (%p160_p3) target bundleno = 311 (0x137), region = 32 }
   0xc   : > { %v1559_v0 = vld [vmem:[%s1985_s1 + $0x78] sm:$0xff]   ;;  %v1563_v4 = vld [vmem:[%s1985_s1 + $0x70] sm:$0xff]   ;;  %v1567_v8 = vld [vmem:[%s1985_s1 + $0x68] sm:$0xff]   ;;  %s1993_s12 = smov (!%p193_p4, %s1669_s12), 1 }
   0xd   : > { %v1560_v1 = vld [vmem:[%s1985_s1 + $0x38] sm:$0xff]   ;;  %1378 = vmatprep.subr.bf16.mxu0 %v1559_v0  ;;  %v1564_v5 = vld [vmem:[%s1985_s1 + $0x30] sm:$0xff]   ;;  %v1568_v9 = vld [vmem:[%s1985_s1 + $0x28] sm:$0xff]   ;;  %s1534_s20 = smul.u32 224, %s1993_s12 }
   0xe   : > { %v1561_v2 = vld [vmem:[%s1985_s1 + $0xf8] sm:$0xff]   ;;  %1379 = vmatpush3.bf16.msra.mxu0 %v1560_v1  ;;  %v1565_v6 = vld [vmem:[%s1985_s1 + $0xf0] sm:$0xff]   ;;  %v1569_v10 = vld [vmem:[%s1985_s1 + $0xe8] sm:$0xff]  }
   0xf   : > { %v1562_v3 = vld [vmem:[%s1985_s1 + $0xb8] sm:$0xff]   ;;  %1418 = vmatprep.subr.bf16.mxu1 %v1561_v2  ;;  %1380 = vmatprep.subr.bf16.mxu0 %v1563_v4  ;;  %v1566_v7 = vld [vmem:[%s1985_s1 + $0xb0] sm:$0xff]   ;;  %v1570_v11 = vld [vmem:[%s1985_s1 + $0xa8] sm:$0xff]   ;;  %s1814_s4 = scalar_lea.vmem %s1984_s0, %s1534_s20  ;;  %s1346_s20 = sshll.u32 %s1993_s12, 5 }
  0x10   : > { %1419 = vmatpush3.bf16.msra.mxu1 %v1562_v3  ;;  %v1571_v12 = vld [vmem:[%s1985_s1 + $0x60] sm:$0xff]   ;;  %v1575_v16 = vld [vmem:[%s1985_s1 + $0x58] sm:$0xff]   ;;  %v1579_v20 = vld [vmem:[%s1985_s1 + $0x50] sm:$0xff]   ;;  %s1957_s23 = scalar_lea.vmem %s1987_s3, %s1346_s20 }
  0x11   : > { %1420 = vmatprep.subr.bf16.mxu1 %v1565_v6  ;;  %v1572_v13 = vld [vmem:[%s1985_s1 + $0x20] sm:$0xff]   ;;  %v1576_v17 = vld [vmem:[%s1985_s1 + $0x18] sm:$0xff]   ;;  %v1580_v21 = vld [vmem:[%s1985_s1 + $0x10] sm:$0xff]  }
  0x12   : > { %1381 = vmatpush3.bf16.msra.mxu0 %v1564_v5  ;;  %v1573_v14 = vld [vmem:[%s1985_s1 + $0xe0] sm:$0xff]   ;;  %v1577_v18 = vld [vmem:[%s1985_s1 + $0xd8] sm:$0xff]   ;;  %v1581_v22 = vld [vmem:[%s1985_s1 + $0xd0] sm:$0xff]  }
  0x13   : > { %1382 = vmatprep.subr.bf16.mxu0 %v1567_v8  ;;  %v1574_v15 = vld [vmem:[%s1985_s1 + $0xa0] sm:$0xff]   ;;  %v1578_v19 = vld [vmem:[%s1985_s1 + $0x98] sm:$0xff]   ;;  %v1582_v23 = vld [vmem:[%s1985_s1 + $0x90] sm:$0xff]  }
  0x14   : > { %1421 = vmatpush3.bf16.msra.mxu1 %v1566_v7  ;;  %v1583_v24 = vld [vmem:[%s1985_s1 + $0x48] sm:$0xff]   ;;  %v1587_v28 = vld [vmem:[%s1985_s1 + $0x40] sm:$0xff]   ;;  %v1594_v34 = vld [vmem:[%s1985_s1 + $0x178] sm:$0xff]  }
  0x15   : > { %1422 = vmatprep.subr.bf16.mxu1 %v1569_v10  ;;  %v1584_v25 = vld [vmem:[%s1985_s1 + $0x8] sm:$0xff]   ;;  %v1588_v29 = vld [vmem:[%s1985_s1] sm:$0xff]   ;;  %v1598_v37 = vld [vmem:[%s1985_s1 + $0x138] sm:$0xff]  }
  0x16   : > { %1383 = vmatpush3.bf16.msra.mxu0 %v1568_v9  ;;  %v1585_v26 = vld [vmem:[%s1985_s1 + $0xc8] sm:$0xff]   ;;  %v1589_v30 = vld [vmem:[%s1985_s1 + $0xc0] sm:$0xff]   ;;  %v1599_v38 = vld [vmem:[%s1985_s1 + $0x170] sm:$0xff]  }
  0x17   : > { %1384 = vmatprep.subr.bf16.mxu0 %v1571_v12  ;;  %v1586_v27 = vld [vmem:[%s1985_s1 + $0x88] sm:$0xff]   ;;  %v1590_v31 = vld [vmem:[%s1814_s4] ss:$28 sps:$4 sm:$0xff]   ;;  %v1601_v40 = vld [vmem:[%s1985_s1 + $0x130] sm:$0xff]  }
  0x18   : > { %1423 = vmatpush3.bf16.msra.mxu1 %v1570_v11  ;;  %v1592_v32 = vld [vmem:[%s1814_s4 + $0x4] ss:$28 sps:$4 sm:$0xff]   ;;  %v1597_v36 = vld [vmem:[%s1814_s4 + $0xc] ss:$28 sps:$4 sm:$0xff]   ;;  %v1600_v39 = vld [vmem:[%s1985_s1 + $0x1b8] sm:$0xff]  }
  0x19   : > { %1424 = vmatprep.subr.bf16.mxu1 %v1573_v14  ;;  %v1593_v33 = vld [vmem:[%s1985_s1 + $0x80] sm:$0xff]   ;;  %877 = vmatprep.mubr.bf16.mxu0 %v1592_v32  ;;  %v1602_v41 = vld [vmem:[%s1814_s4 + $0x3c] ss:$28 sps:$4 sm:$0xff]   ;;  %v1605_v43 = vld [vmem:[%s1985_s1 + $0x168] sm:$0xff]  }
  0x1a   : > { %1385 = vmatpush3.bf16.msra.mxu0 %v1572_v13  ;;  %v1595_v35 = vld [vmem:[%s1814_s4 + $0x8] ss:$28 sps:$4 sm:$0xff]   ;;  %942 = vmatprep.mubr.bf16.mxu1 %v1597_v36  ;;  %v1604_v42 = vld [vmem:[%s1814_s4 + $0x38] ss:$28 sps:$4 sm:$0xff]   ;;  %v1610_v47 = vld [vmem:[%s1814_s4 + $0x40] ss:$28 sps:$4 sm:$0xff]  }
  0x1b   : > { %1386 = vmatprep.subr.bf16.mxu0 %v1575_v16  ;;  %v1606_v44 = vld [vmem:[%s1985_s1 + $0x1b0] sm:$0xff]   ;;  %v1607_v45 = vld [vmem:[%s1814_s4 + $0x44] ss:$28 sps:$4 sm:$0xff]   ;;  %v1609_v46 = vld [vmem:[%s1985_s1 + $0x128] sm:$0xff]  }
  0x1c   : > { %1425 = vmatpush3.bf16.msra.mxu1 %v1574_v15  ;;  %v1611_v48 = vld [vmem:[%s1985_s1 + $0x160] sm:$0xff]   ;;  %v1612_v49 = vld [vmem:[%s1985_s1 + $0x1a8] sm:$0xff]   ;;  %v1614_v51 = vld [vmem:[%s1814_s4 + $0x74] ss:$28 sps:$4 sm:$0xff]  }
  0x1d   : > { %1426 = vmatprep.subr.bf16.mxu1 %v1577_v18  ;;  %v1613_v50 = vld [vmem:[%s1985_s1 + $0x120] sm:$0xff]   ;;  %v1616_v52 = vld [vmem:[%s1814_s4 + $0x70] ss:$28 sps:$4 sm:$0xff]   ;;  %v1617_v53 = vld [vmem:[%s1985_s1 + $0x158] sm:$0xff]  }
  0x1e   : > { %1387 = vmatpush3.bf16.msra.mxu0 %v1576_v17  ;;  %v1618_v54 = vld [vmem:[%s1985_s1 + $0x1a0] sm:$0xff]   ;;  %v1619_v55 = vld [vmem:[%s1814_s4 + $0x7c] ss:$28 sps:$4 sm:$0xff]   ;;  %v1623_v58 = vld [vmem:[%s1985_s1 + $0x150] sm:$0xff]  }
  0x1f   : > { %1388 = vmatprep.subr.bf16.mxu0 %v1579_v20  ;;  %v1621_v56 = vld [vmem:[%s1985_s1 + $0x118] sm:$0xff]   ;;  %v1625_v60 = vld [vmem:[%s1985_s1 + $0x110] sm:$0xff]   ;;  %v1626_v61 = vld [vmem:[%s1814_s4 + $0xac] ss:$28 sps:$4 sm:$0xff]  }
  0x20   : > { %1427 = vmatpush3.bf16.msra.mxu1 %v1578_v19  ;;  %v1622_v57 = vld [vmem:[%s1814_s4 + $0x78] ss:$28 sps:$4 sm:$0xff]   ;;  %v1628_v62 = vld [vmem:[%s1814_s4 + $0xa8] ss:$28 sps:$4 sm:$0xff]   ;;  %v1634_v3 = vld [vmem:[%s1814_s4 + $0xb0] ss:$28 sps:$4 sm:$0xff]  }
  0x21   : > { %1428 = vmatprep.subr.bf16.mxu1 %v1581_v22  ;;  %v1624_v59 = vld [vmem:[%s1985_s1 + $0x198] sm:$0xff]   ;;  %v1629_v63 = vld [vmem:[%s1985_s1 + $0x148] sm:$0xff]   ;;  %v1630_v0 = vld [vmem:[%s1985_s1 + $0x190] sm:$0xff]  }
  0x22   : > { %1389 = vmatpush3.bf16.msra.mxu0 %v1580_v21  ;;  %v1631_v1 = vld [vmem:[%s1814_s4 + $0xb4] ss:$28 sps:$4 sm:$0xff]   ;;  %v1633_v2 = vld [vmem:[%s1985_s1 + $0x108] sm:$0xff]   ;;  %v1635_v4 = vld [vmem:[%s1985_s1 + $0x140] sm:$0xff]  }
  0x23   : > { %1390 = vmatprep.subr.bf16.mxu0 %v1583_v24  ;;  %v1636_v5 = vld [vmem:[%s1985_s1 + $0x188] sm:$0xff]   ;;  %v1637_v6 = vld [vmem:[%s1985_s1 + $0x100] sm:$0xff]   ;;  %v1640_v8 = vld [vmem:[%s1814_s4 + $0x14] ss:$28 sps:$4 sm:$0xff]  }
  0x24   : > { %1429 = vmatpush3.bf16.msra.mxu1 %v1582_v23  ;;  %v1638_v7 = vld [vmem:[%s1814_s4 + $0x10] ss:$28 sps:$4 sm:$0xff]   ;;  %v1641_v9 = vld [vmem:[%s1985_s1 + $0x180] sm:$0xff]   ;;  %v1642_v10 = vld [vmem:[%s1814_s4 + $0x18] ss:$28 sps:$4 sm:$0xff]  }
  0x25   : > { %1430 = vmatprep.subr.bf16.mxu1 %v1585_v26  ;;  %v1643_v11 = vld [vmem:[%s1814_s4 + $0x50] ss:$28 sps:$4 sm:$0xff]   ;;  %v1650_v13 = vld [vmem:[%s1814_s4 + $0x88] ss:$28 sps:$4 sm:$0xff]   ;;  %v1651_v16 = vld [vmem:[%s1814_s4 + $0xc0] ss:$28 sps:$4 sm:$0xff]  }
  0x26   : > { %1391 = vmatpush3.bf16.msra.mxu0 %v1584_v25  ;;  %v1644_v12 = vld [vmem:[%s1814_s4 + $0x4c] ss:$28 sps:$4 sm:$0xff]   ;;  %v1647_v15 = vld [vmem:[%s1814_s4 + $0x84] ss:$28 sps:$4 sm:$0xff]   ;;  %v1652_v18 = vld [vmem:[%s1814_s4 + $0xbc] ss:$28 sps:$4 sm:$0xff]  }
  0x27   : > { %1392 = vmatprep.subr.bf16.mxu0 %v1587_v28  ;;  %v1646_v14 = vld [vmem:[%s1814_s4 + $0x48] ss:$28 sps:$4 sm:$0xff]   ;;  %v1649_v17 = vld [vmem:[%s1814_s4 + $0x80] ss:$28 sps:$4 sm:$0xff]   ;;  %v1654_v19 = vld [vmem:[%s1814_s4 + $0xb8] ss:$28 sps:$4 sm:$0xff]  }
  0x28   : > { %1431 = vmatpush3.bf16.msra.mxu1 %v1586_v27 }
  0x29   : > { %1432 = vmatprep.subr.bf16.mxu1 %v1589_v30 }
  0x2a   : > { %1393 = vmatpush3.bf16.msra.mxu0 %v1588_v29 }
  0x2b   : > { %1458 = vmatprep.subr.bf16.mxu0 %v1594_v34 }
  0x2c   : > { %1433 = vmatpush3.bf16.msra.mxu1 %v1593_v33 }
  0x2d   : > { %878 = vmatmul.mubr.bf16.vlgmr.msra.gmra.mxu0 %v1590_v31  ;;  %1510 = vmatprep.subr.bf16.mxu1 %v1600_v39 }
  0x2e   : > { %1459 = vmatpush3.bf16.msra.mxu0 %v1598_v37  ;;  %885 = vmatprep.mubr.bf16.mxu0 %v1602_v41 }
  0x2f   : > { %943 = vmatmul.mubr.bf16.vlgmr.msra.gmra.mxu1 %v1595_v35  ;;  %1460 = vmatprep.subr.bf16.mxu0 %v1599_v38 }
  0x30   : > { %1511 = vmatpush3.bf16.msra.mxu1 %v1600_v39  ;;  %950 = vmatprep.mubr.bf16.mxu1 %v1607_v45 }
  0x31   : > { %1512 = vmatprep.subr.bf16.mxu1 %v1606_v44 }
  0x32   : > { %1461 = vmatpush3.bf16.msra.mxu0 %v1601_v40 }
  0x33   : > { %1462 = vmatprep.subr.bf16.mxu0 %v1605_v43 }
  0x34   : > { %1513 = vmatpush3.bf16.msra.mxu1 %v1606_v44 }
  0x35   : > { %886 = vmatmul.mubr.bf16.gmra.mxu0 %v1604_v42  ;;  %1514 = vmatprep.subr.bf16.mxu1 %v1612_v49 }
  0x36   : > { %1463 = vmatpush3.bf16.msra.mxu0 %v1609_v46  ;;  %893 = vmatprep.mubr.bf16.mxu0 %v1614_v51 }
  0x37   : > { %951 = vmatmul.mubr.bf16.gmra.mxu1 %v1610_v47  ;;  %1464 = vmatprep.subr.bf16.mxu0 %v1611_v48 }
  0x38   : > { %1515 = vmatpush3.bf16.msra.mxu1 %v1612_v49  ;;  %958 = vmatprep.mubr.bf16.mxu1 %v1619_v55 }
  0x39   : > { %1516 = vmatprep.subr.bf16.mxu1 %v1618_v54 }
  0x3a   : > { %1465 = vmatpush3.bf16.msra.mxu0 %v1613_v50  ;;  %v1940_v50 = vld [vmem:[%s1986_s2] ss:$0 sm:$0xff] }
  0x3b   : > { %1466 = vmatprep.subr.bf16.mxu0 %v1617_v53 }
  0x3c   : > { %1517 = vmatpush3.bf16.msra.mxu1 %v1618_v54 }
  0x3d   : > { %894 = vmatmul.mubr.bf16.gmra.mxu0 %v1616_v52  ;;  %1518 = vmatprep.subr.bf16.mxu1 %v1624_v59 }
  0x3e   : > { %1467 = vmatpush3.bf16.msra.mxu0 %v1621_v56  ;;  %901 = vmatprep.mubr.bf16.mxu0 %v1626_v61 }
  0x3f   : > { %959 = vmatmul.mubr.bf16.gmra.mxu1 %v1622_v57  ;;  %1468 = vmatprep.subr.bf16.mxu0 %v1623_v58 }
  0x40   : > { %1519 = vmatpush3.bf16.msra.mxu1 %v1624_v59  ;;  %966 = vmatprep.mubr.bf16.mxu1 %v1631_v1 }
  0x41   : > { %1520 = vmatprep.subr.bf16.mxu1 %v1630_v0 }
  0x42   : > { %1469 = vmatpush3.bf16.msra.mxu0 %v1625_v60 }
  0x43   : > { %1470 = vmatprep.subr.bf16.mxu0 %v1629_v63 }
  0x44   : > { %1521 = vmatpush3.bf16.msra.mxu1 %v1630_v0 }
  0x45   : > { %902 = vmatmul.mubr.bf16.gmra.mxu0 %v1628_v62  ;;  %1522 = vmatprep.subr.bf16.mxu1 %v1636_v5 }
  0x46   : > { %1471 = vmatpush3.bf16.msra.mxu0 %v1633_v2  ;;  %1007 = vmatprep.mubr.bf16.mxu0 %v1640_v8 }
  0x47   : > { %967 = vmatmul.mubr.bf16.gmra.mxu1 %v1634_v3  ;;  %1472 = vmatprep.subr.bf16.mxu0 %v1635_v4 }
  0x48   : > { %1523 = vmatpush3.bf16.msra.mxu1 %v1636_v5  ;;  %1526 = vmatprep.mubr.bf16.mxu1 %v1642_v10 }
  0x49   : > { %1524 = vmatprep.subr.bf16.mxu1 %v1641_v9 }
  0x4a   : > { %1473 = vmatpush3.bf16.msra.mxu0 %v1637_v6 }
  0x4c   : > { %1525 = vmatpush3.bf16.msra.mxu1 %v1641_v9 }
  0x4d   : > { %1008 = vmatmul.mubr.bf16.vlgmr.msra.gmra.mxu0 %v1638_v7 }
  0x4e   : > { %1015 = vmatprep.mubr.bf16.mxu0 %v1644_v12 }
  0x4f   : > { %1527 = vmatmul.mubr.bf16.vlgmr.msra.gmra.mxu1 %v1643_v11 }
  0x50   : > { %1530 = vmatprep.mubr.bf16.mxu1 %v1650_v13 }
  0x55   : > { %1016 = vmatmul.mubr.bf16.gmra.mxu0 %v1646_v14 }
  0x56   : > { %1023 = vmatprep.mubr.bf16.mxu0 %v1647_v15 }
  0x57   : > { %1531 = vmatmul.mubr.bf16.gmra.mxu1 %v1651_v16 }
  0x5d   : > { %1024 = vmatmul.mubr.bf16.gmra.mxu0 %v1649_v17 }
  0x5e   : > { %1031 = vmatprep.mubr.bf16.mxu0 %v1652_v18 }
  0x65   : > { %1032 = vmatmul.mubr.bf16.gmra.mxu0 %v1654_v19 }
  0xed   : > { %v1394_v20 = vpop.f32.mrf.mxu0 }
  0xef   : > { %v1395_v21 = vpop.f32.mrf.mxu0  ;;  %v1434_v22 = vpop.f32.mrf.mxu1 }
  0xf0   : > { %v1396_v48 = vadd.f32 %v1395_v21, %v1394_v20 }
  0xf1   : > { %v1397_v23 = vpop.f32.mrf.mxu0  ;;  %v1435_v24 = vpop.f32.mrf.mxu1 }
  0xf2   : > { %v880_v53 = vadd.f32 %v1396_v48, %v1940_v50  ;;  %v1436_v54 = vadd.f32 %v1435_v24, %v1434_v22 }
  0xf3   : > { %v1398_v25 = vpop.f32.mrf.mxu0  ;;  %v1437_v26 = vpop.f32.mrf.mxu1 }
  0xf4   : > { %v1399_v55 = vadd.f32 %v1398_v25, %v1397_v23  ;;  %v945_v60 = vadd.f32 %v1436_v54, %v880_v53 }
  0xf5   : > { %v1400_v27 = vpop.f32.mrf.mxu0  ;;  %v1438_v28 = vpop.f32.mrf.mxu1 }
  0xf6   : > { %v883_v61 = vadd.f32 %v1399_v55, %v1940_v50  ;;  %v1439_v62 = vadd.f32 %v1438_v28, %v1437_v26 }
  0xf7   : > { %v1401_v29 = vpop.f32.mrf.mxu0  ;;  %v1440_v30 = vpop.f32.mrf.mxu1 }
  0xf8   : > { %v1402_v58 = vadd.f32 %v1401_v29, %v1400_v27  ;;  %v948_v7 = vadd.f32 %v1439_v62, %v883_v61 }
  0xf9   : > { %v1403_v31 = vpop.f32.mrf.mxu0  ;;  %v1441_v32 = vpop.f32.mrf.mxu1 }
  0xfa   : > { %v888_v4 = vadd.f32 %v1402_v58, %v1940_v50  ;;  %v1442_v5 = vadd.f32 %v1441_v32, %v1440_v30 }
  0xfb   : > { %v1404_v33 = vpop.f32.mrf.mxu0  ;;  %v1443_v34 = vpop.f32.mrf.mxu1 }
  0xfc   : > { %v1405_v8 = vadd.f32 %v1404_v33, %v1403_v31  ;;  %v953_v15 = vadd.f32 %v1442_v5, %v888_v4 }
  0xfd   : > { %v1406_v35 = vpop.f32.mrf.mxu0  ;;  %v1444_v36 = vpop.f32.mrf.mxu1 }
  0xfe   : > { %v891_v18 = vadd.f32 %v1405_v8, %v1940_v50  ;;  %v1445_v19 = vadd.f32 %v1444_v36, %v1443_v34 }
  0xff   : > { %v1407_v37 = vpop.f32.mrf.mxu0  ;;  %v1446_v38 = vpop.f32.mrf.mxu1 }
 0x100   : > { %v1408_v16 = vadd.f32 %v1407_v37, %v1406_v35  ;;  %v956_v30 = vadd.f32 %v1445_v19, %v891_v18 }
 0x101   : > { %v1409_v39 = vpop.f32.mrf.mxu0  ;;  %v1447_v40 = vpop.f32.mrf.mxu1 }
 0x102   : > { %v896_v27 = vadd.f32 %v1408_v16, %v1940_v50  ;;  %v1448_v28 = vadd.f32 %v1447_v40, %v1446_v38 }
 0x103   : > { %v1410_v41 = vpop.f32.mrf.mxu0  ;;  %v1925_v42 = vpop.f32.mrf.mxu1 }
 0x104   : > { %v1411_v31 = vadd.f32 %v1410_v41, %v1409_v39  ;;  %v961_v48 = vadd.f32 %v1448_v28, %v896_v27 }
 0x105   : > { %v1927_v43 = vpop.f32.mrf.mxu0  ;;  %v1929_v44 = vpop.f32.mrf.mxu1 }
 0x106   : > { %v899_v40 = vadd.f32 %v1411_v31, %v1940_v50  ;;  %v1451_v54 = vadd.f32 %v1929_v44, %v1925_v42 }
 0x107   : > { %v1413_v45 = vpop.f32.mrf.mxu0  ;;  %v1931_v46 = vpop.f32.mrf.mxu1 }
 0x108   : > { %v1414_v53 = vadd.f32 %v1413_v45, %v1927_v43  ;;  %v964_v45 = vadd.f32 %v1451_v54, %v899_v40 }
 0x109   : > { %v1933_v47 = vpop.f32.mrf.mxu0  ;;  %v1935_v49 = vpop.f32.mrf.mxu1 }
 0x10a   : > { %v904_v61 = vadd.f32 %v1414_v53, %v1940_v50  ;;  %v1454_v62 = vadd.f32 %v1935_v49, %v1931_v46 }
 0x10b   : > { %v1942_v51 = vpop.f32.mrf.mxu0  ;;  %v1944_v52 = vpop.f32.mrf.mxu1 }
 0x10c   : > { %v969_v4 = vadd.f32 %v1454_v62, %v904_v61 }
 0x10d   : > { %v1474_v56 = vpop.f32.mrf.mxu0  ;;  %v1947_v57 = vpop.f32.mrf.mxu1 }
 0x10e   : > { %v1457_v46 = vadd.f32 %v1947_v57, %v1944_v52 }
 0x10f   : > { %v1475_v59 = vpop.f32.mrf.mxu0  ;;  %v1528_v0 = vpop.f32.mrf.mxu1 }
 0x110   : > { %v1476_v63 = vadd.f32 %v1475_v59, %v1474_v56 }
 0x111   : > { %v1477_v1 = vpop.f32.mrf.mxu0  ;;  %v1074_v3 = vpop.f32.mrf.mxu1 }
 0x112   : > { %v1010_v2 = vadd.f32 %v1476_v63, %v945_v60  ;;  %v1417_v63 = vadd.f32 %v1942_v51, %v1933_v47 }
 0x113   : > { %v1478_v6 = vpop.f32.mrf.mxu0  ;;  %v1529_v10 = vpop.f32.mrf.mxu1 }
 0x114   : > { %v1479_v9 = vadd.f32 %v1478_v6, %v1477_v1  ;;  %v1075_v12 = vadd.f32 %v1074_v3, %v1010_v2  ;;  %v907_v6 = vadd.f32 %v1417_v63, %v1940_v50 }
 0x115   : > { %v1480_v11 = vpop.f32.mrf.mxu0  ;;  %v1077_v14 = vpop.f32.mrf.mxu1 }
 0x116   : > { %v1013_v13 = vadd.f32 %v1479_v9, %v948_v7  ;;  %v1105_v24 = vmax.f32 %v1075_v12, 0.0 }
 0x117   : > { %v1481_v17 = vpop.f32.mrf.mxu0  ;;  %v1532_v23 = vpop.f32.mrf.mxu1 }
 0x118   : > { %v1482_v20 = vadd.f32 %v1481_v17, %v1480_v11  ;;  %v1078_v21 = vadd.f32 %v1077_v14, %v1013_v13  ;;  %v972_v11 = vadd.f32 %v1457_v46, %v907_v6 }
 0x119   : > { %v1483_v22 = vpop.f32.mrf.mxu0  ;;  %v1090_v35 = vpop.f32.mrf.mxu1 }
 0x11a   : > { %v1018_v25 = vadd.f32 %v1482_v20, %v953_v15  ;;  %v1106_v26 = vmax.f32 %v1078_v21, 0.0 }
 0x11b   : > { %v1484_v29 = vpop.f32.mrf.mxu0  ;;  %v1533_v41 = vpop.f32.mrf.mxu1 }
 0x11c   : > { %v1358_v32 = vpack.c.bf16 %v1106_v26, %v1105_v24  ;;  %v1485_v33 = vadd.f32 %v1484_v29, %v1483_v22  ;;  %v1083_v36 = vadd.f32 %v1528_v0, %v1018_v25 }
 0x11d   : > { %v1486_v34 = vpop.f32.mrf.mxu0  ;;  %v1093_v1 = vpop.f32.mrf.mxu1 }
 0x11e   : > { %1359 = vst [vmem:[%s1957_s23] sm:$0xff] %v1358_v32   ;;  %v1021_v37 = vadd.f32 %v1485_v33, %v956_v30  ;;  %v1107_v58 = vmax.f32 %v1083_v36, 0.0 }
 0x11f   : > { %v1487_v38 = vpop.f32.mrf.mxu0 }
 0x120   : > { %v1086_v55 = vadd.f32 %v1529_v10, %v1021_v37  ;;  %v1488_v56 = vadd.f32 %v1487_v38, %v1486_v34 }
 0x121   : > { %v1489_v39 = vpop.f32.mrf.mxu0 }
 0x122   : > { %v1108_v59 = vmax.f32 %v1086_v55, 0.0  ;;  %v1026_v60 = vadd.f32 %v1488_v56, %v961_v48 }
 0x123   : > { %v1490_v43 = vpop.f32.mrf.mxu0 }
 0x124   : > { %v1363_v0 = vpack.c.bf16 %v1108_v59, %v1107_v58  ;;  %v1491_v42 = vadd.f32 %v1490_v43, %v1489_v39  ;;  %v1091_v2 = vadd.f32 %v1090_v35, %v1026_v60 }
 0x125   : > { %v1492_v44 = vpop.f32.mrf.mxu0 }
 0x126   : > { %1375 = vst [vmem:[%s1957_s23 + $0x8] sm:$0xff] %v1363_v0   ;;  %v1029_v3 = vadd.f32 %v1491_v42, %v964_v45  ;;  %v1109_v47 = vmax.f32 %v1091_v2, 0.0 }
 0x127   : > { %v1493_v5 = vpop.f32.mrf.mxu0 }
 0x128   : > { %v1494_v49 = vadd.f32 %v1493_v5, %v1492_v44  ;;  %v1094_v7 = vadd.f32 %v1093_v1, %v1029_v3 }
 0x129   : > { %v1495_v8 = vpop.f32.mrf.mxu0 }
 0x12a   : > { %v1034_v51 = vadd.f32 %v1494_v49, %v969_v4  ;;  %v1110_v9 = vmax.f32 %v1094_v7, 0.0 }
 0x12b   : > { %v1496_v10 = vpop.f32.mrf.mxu0 }
 0x12c   : > { %v1368_v12 = vpack.c.bf16 %v1110_v9, %v1109_v47  ;;  %v1497_v13 = vadd.f32 %v1496_v10, %v1495_v8  ;;  %v1099_v14 = vadd.f32 %v1532_v23, %v1034_v51 }
 0x12e   : > { %1376 = vst [vmem:[%s1957_s23 + $0x10] sm:$0xff] %v1368_v12   ;;  %v1037_v15 = vadd.f32 %v1497_v13, %v972_v11  ;;  %v1111_v17 = vmax.f32 %v1099_v14, 0.0 }
 0x130   : > { %v1102_v16 = vadd.f32 %v1533_v41, %v1037_v15 }
 0x132   : > { %v1112_v50 = vmax.f32 %v1102_v16, 0.0 }
 0x134   : > { %v1373_v18 = vpack.c.bf16 %v1112_v50, %v1111_v17 }
 0x136   : > { %1377 = vst [vmem:[%s1957_s23 + $0x18] sm:$0xff] %v1373_v18  }
 0x137 PF: > { %s13_s14 = sadd.s32 1, %s1677_s14   ;;  %s1988_s12 = smov %s1673_s13 }
 0x138   : > { %p10_p5 = scmp.ge.s32.totalorder %s13_s14, 4   ;;  %s1989_s13 = smov %s1991_s15 }
 0x13a   :  { %12 = sbr.rel (!%p10_p5) target bundleno = 2 (0x2), region = 62 }

// kernel: vgg6_forward.10
= control target key start
LH: loop header
LB: loop body
LE: loop exit
PB: predicated region body
PF: predicated region fallthrough
CT: control target
= control target key end

     0   :  { %s1235_s12 = smov 0   ;;  %s1237_s13 = smov 0   ;;  %s1453_s0 = inlined_call_operand.vmem [shape: bf16[2,8,896], index: 0, kind: input, shape index: {}]   ;;  %s1454_s1 = inlined_call_operand.vmem [shape: bf16[896,128], index: 1, kind: input, shape index: {}]   ;;  %s1455_s2 = inlined_call_operand.vmem [shape: f32[1,128], index: 2, kind: input, shape index: {}]   ;;  %s1456_s3 = inlined_call_operand.vmem [shape: bf16[2,8,128], index: 3, kind: output, shape index: {}]  }
   0x1   :  { %s1239_s14 = smov 0  }
   0x2 LB: > { %s25_s15 = sadd.s32 1, %s1207_s13  ;;  %p935_p0 = scmp.ge.s32.totalorder %s1211_s14, 1  ;;  %s1211_s14 = sphi %s1239_s14, %s13_s14   ;;  %s1207_s13 = sphi %s1237_s13, %s1458_s13   ;;  %s1203_s12 = sphi %s1235_s12, %s1457_s12  }
   0x3   : > { %p27_p1 = scmp.ge.s32.totalorder %s25_s15, 2  ;;  %p157_p2 = scmp.lt.s32.totalorder %s1211_s14, 3 }
   0x5   : > { %s1460_s15 = smov (%p27_p1, %s25_s15), 0  ;;  %p158_p3 = pnand %p935_p0, %p157_p2 }
   0x6   : > { %p187_p4 = scmp.lt.s32.totalorder (!%p158_p3), %s1203_s12, 1 }
   0x7   : > { %161 = sbr.rel (%p158_p3) target bundleno = 284 (0x11c), region = 32 }
   0xc   : > { %v1126_v0 = vld [vmem:[%s1454_s1 + $0x78] sm:$0xff]   ;;  %v1130_v4 = vld [vmem:[%s1454_s1 + $0x70] sm:$0xff]   ;;  %v1134_v8 = vld [vmem:[%s1454_s1 + $0x68] sm:$0xff]   ;;  %s1462_s12 = smov (!%p187_p4, %s1203_s12), 1  ;;  %v1213_v39 = vmov 0.0   ;;  %vm1214_vm0 = vmmov 0  }
   0xd   : > { %v1127_v1 = vld [vmem:[%s1454_s1 + $0xf8] sm:$0xff]   ;;  %1004 = vmatprep.subr.bf16.mxu0 %v1126_v0  ;;  %v1131_v5 = vld [vmem:[%s1454_s1 + $0xf0] sm:$0xff]   ;;  %v1135_v9 = vld [vmem:[%s1454_s1 + $0xe8] sm:$0xff]   ;;  %s1099_s22 = smul.u32 28, %s1462_s12 }
   0xe   : > { %v1128_v2 = vld [vmem:[%s1454_s1 + $0x38] sm:$0xff]   ;;  %1026 = vmatprep.subr.bf16.mxu1 %v1127_v1  ;;  %v1132_v6 = vld [vmem:[%s1454_s1 + $0x30] sm:$0xff]   ;;  %v1136_v10 = vld [vmem:[%s1454_s1 + $0x28] sm:$0xff]  }
   0xf   : > { %v1129_v3 = vld [vmem:[%s1454_s1 + $0xb8] sm:$0xff]   ;;  %1005 = vmatpush3.bf16.msra.mxu0 %v1128_v2  ;;  %v1133_v7 = vld [vmem:[%s1454_s1 + $0xb0] sm:$0xff]   ;;  %v1137_v11 = vld [vmem:[%s1454_s1 + $0xa8] sm:$0xff]   ;;  %s1353_s6 = scalar_lea.vmem %s1453_s0, %s1099_s22 }
  0x10   : > { %1027 = vmatpush3.bf16.msra.mxu1 %v1129_v3  ;;  %1006 = vmatprep.subr.bf16.mxu0 %v1130_v4  ;;  %v1138_v12 = vld [vmem:[%s1454_s1 + $0x60] sm:$0xff]   ;;  %v1142_v16 = vld [vmem:[%s1454_s1 + $0x58] sm:$0xff]   ;;  %v1146_v20 = vld [vmem:[%s1454_s1 + $0x50] sm:$0xff]  }
  0x11   : > { %1028 = vmatprep.subr.bf16.mxu1 %v1131_v5  ;;  %v1139_v13 = vld [vmem:[%s1454_s1 + $0xe0] sm:$0xff]   ;;  %v1143_v17 = vld [vmem:[%s1454_s1 + $0xd8] sm:$0xff]   ;;  %v1147_v21 = vld [vmem:[%s1454_s1 + $0xd0] sm:$0xff]  }
  0x12   : > { %v1140_v14 = vld [vmem:[%s1454_s1 + $0x20] sm:$0xff]   ;;  %v1144_v18 = vld [vmem:[%s1454_s1 + $0x18] sm:$0xff]   ;;  %v1148_v22 = vld [vmem:[%s1454_s1 + $0x10] sm:$0xff]  }
  0x13   : > { %1007 = vmatpush3.bf16.msra.mxu0 %v1132_v6  ;;  %v1141_v15 = vld [vmem:[%s1454_s1 + $0xa0] sm:$0xff]   ;;  %v1145_v19 = vld [vmem:[%s1454_s1 + $0x98] sm:$0xff]   ;;  %v1149_v23 = vld [vmem:[%s1454_s1 + $0x90] sm:$0xff]  }
  0x14   : > { %1029 = vmatpush3.bf16.msra.mxu1 %v1133_v7  ;;  %1008 = vmatprep.subr.bf16.mxu0 %v1134_v8  ;;  %v1150_v24 = vld [vmem:[%s1454_s1 + $0x48] sm:$0xff]   ;;  %v1154_v28 = vld [vmem:[%s1454_s1 + $0x40] sm:$0xff]   ;;  %v1162_v38 = vld [vmem:[%s1454_s1 + $0x178] sm:$0xff]  }
  0x15   : > { %1030 = vmatprep.subr.bf16.mxu1 %v1135_v9  ;;  %v1151_v25 = vld [vmem:[%s1454_s1 + $0xc8] sm:$0xff]   ;;  %v1155_v29 = vld [vmem:[%s1454_s1 + $0xc0] sm:$0xff]   ;;  %v1163_v40 = vld [vmem:[%s1454_s1 + $0x138] sm:$0xff]  }
  0x16   : > { %v1152_v26 = vld [vmem:[%s1454_s1 + $0x8] sm:$0xff]   ;;  %v1156_v30 = vld [vmem:[%s1454_s1] sm:$0xff]   ;;  %v1164_v41 = vld [vmem:[%s1454_s1 + $0x1b8] sm:$0xff]  }
  0x17   : > { %1009 = vmatpush3.bf16.msra.mxu0 %v1136_v10  ;;  %v1153_v27 = vld [vmem:[%s1454_s1 + $0x88] sm:$0xff]   ;;  %v1157_v31 = vld [vmem:[%s1454_s1 + $0x80] sm:$0xff]   ;;  %v1165_v42 = vld [vmem:[%s1454_s1 + $0x170] sm:$0xff]  }
  0x18   : > { %1031 = vmatpush3.bf16.msra.mxu1 %v1137_v11  ;;  %1010 = vmatprep.subr.bf16.mxu0 %v1138_v12  ;;  %v204_v32 = vld [vmem:[%s1353_s6] sm:$0xff]  ;;  %v205_v33 = vld [vmem:[%s1353_s6 + $0x8] sm:$0xff]  ;;  %v1166_v43 = vld [vmem:[%s1454_s1 + $0x130] sm:$0xff]  }
  0x19   : > { %1032 = vmatprep.subr.bf16.mxu1 %v1139_v13  ;;  %v939_v34 = vcombine.low %v204_v32, %v204_v32  ;;  %v940_v35 = vcombine.high %v204_v32, %v204_v32  ;;  %v941_v36 = vcombine.low %v205_v33, %v205_v33  ;;  %v942_v37 = vcombine.high %v205_v33, %v205_v33  ;;  %v1167_v44 = vld [vmem:[%s1454_s1 + $0x1b0] sm:$0xff]   ;;  %v1168_v45 = vld [vmem:[%s1454_s1 + $0x168] sm:$0xff]   ;;  %v1171_v48 = vld [vmem:[%s1454_s1 + $0x160] sm:$0xff]  }
  0x1a   : > { %v1169_v46 = vld [vmem:[%s1454_s1 + $0x128] sm:$0xff]   ;;  %v1172_v49 = vld [vmem:[%s1454_s1 + $0x120] sm:$0xff]   ;;  %v1174_v51 = vld [vmem:[%s1454_s1 + $0x158] sm:$0xff]  }
  0x1b   : > { %1011 = vmatpush3.bf16.msra.mxu0 %v1140_v14  ;;  %720 = vmatprep.mubr.bf16.mxu0 %v940_v35  ;;  %v1170_v47 = vld [vmem:[%s1454_s1 + $0x1a8] sm:$0xff]   ;;  %v1173_v50 = vld [vmem:[%s1454_s1 + $0x1a0] sm:$0xff]   ;;  %v1175_v52 = vld [vmem:[%s1454_s1 + $0x118] sm:$0xff]  }
  0x1c   : > { %1033 = vmatpush3.bf16.msra.mxu1 %v1141_v15  ;;  %1012 = vmatprep.subr.bf16.mxu0 %v1142_v16  ;;  %v1176_v53 = vld [vmem:[%s1454_s1 + $0x198] sm:$0xff]   ;;  %v1177_v54 = vld [vmem:[%s1454_s1 + $0x150] sm:$0xff]   ;;  %v1180_v57 = vld [vmem:[%s1454_s1 + $0x148] sm:$0xff]  }
  0x1d   : > { %1034 = vmatprep.subr.bf16.mxu1 %v1143_v17  ;;  %760 = vmatprep.mubr.bf16.mxu1 %v942_v37  ;;  %v1178_v55 = vld [vmem:[%s1454_s1 + $0x110] sm:$0xff]   ;;  %v1181_v59 = vld [vmem:[%s1454_s1 + $0x108] sm:$0xff]   ;;  %v1183_v62 = vld [vmem:[%s1454_s1 + $0x140] sm:$0xff]  }
  0x1e   : > { %v1179_v56 = vld [vmem:[%s1454_s1 + $0x190] sm:$0xff]   ;;  %v1182_v61 = vld [vmem:[%s1454_s1 + $0x188] sm:$0xff]   ;;  %v1184_v63 = vld [vmem:[%s1454_s1 + $0x100] sm:$0xff]  }
  0x1f   : > { %1013 = vmatpush3.bf16.msra.mxu0 %v1144_v18  ;;  %v206_v58 = vld [vmem:[%s1353_s6 + $0x10] sm:$0xff]  ;;  %v1185_v0 = vld [vmem:[%s1454_s1 + $0x180] sm:$0xff]   ;;  %v1188_v2 = vld [vmem:[%s1353_s6 + $0x18] ss:$0 sps:$4 sm:$0xff]   ;;  %s937_s6 = sshll.u32 %s1462_s12, 2 }
  0x20   : > { %1035 = vmatpush3.bf16.msra.mxu1 %v1145_v19  ;;  %1014 = vmatprep.subr.bf16.mxu0 %v1146_v20  ;;  %v944_v60 = vcombine.high %v206_v58, %v206_v58  ;;  %v943_v1 = vcombine.low %v206_v58, %v206_v58  ;;  %v938_v12 = vld [vmem:[%s1455_s2] ss:$0 sm:$0xff]  ;;  %s202_s23 = scalar_lea.vmem %s1456_s3, %s937_s6 }
  0x21   : > { %1036 = vmatprep.subr.bf16.mxu1 %v1147_v21 }
  0x23   : > { %1015 = vmatpush3.bf16.msra.mxu0 %v1148_v22 }
  0x24   : > { %1037 = vmatpush3.bf16.msra.mxu1 %v1149_v23  ;;  %1016 = vmatprep.subr.bf16.mxu0 %v1150_v24 }
  0x25   : > { %1038 = vmatprep.subr.bf16.mxu1 %v1151_v25 }
  0x27   : > { %1017 = vmatpush3.bf16.msra.mxu0 %v1152_v26 }
  0x28   : > { %1039 = vmatpush3.bf16.msra.mxu1 %v1153_v27  ;;  %1018 = vmatprep.subr.bf16.mxu0 %v1154_v28 }
  0x29   : > { %1040 = vmatprep.subr.bf16.mxu1 %v1155_v29 }
  0x2b   : > { %1019 = vmatpush3.bf16.msra.mxu0 %v1156_v30 }
  0x2c   : > { %1041 = vmatpush3.bf16.msra.mxu1 %v1157_v31  ;;  %1048 = vmatprep.subr.bf16.mxu0 %v1162_v38 }
  0x2d   : > { %1079 = vmatprep.subr.bf16.mxu1 %v1213_v39 }
  0x2e   : > { %721 = vmatmul.mubr.bf16.vlgmr.msra.gmra.mxu0 %v939_v34 }
  0x2f   : > { %761 = vmatmul.mubr.bf16.vlgmr.msra.gmra.mxu1 %v941_v36  ;;  %1049 = vmatpush3.bf16.msra.mxu0 %v1163_v40 }
  0x30   : > { %1080 = vmatpush3.bf16.msra.mxu1 %v1164_v41  ;;  %1050 = vmatprep.subr.bf16.mxu0 %v1165_v42 }
  0x31   : > { %1081 = vmatprep.subr.bf16.mxu1 %v1213_v39  ;;  %1095 = vmatprep.mubr.msk.bf16.mxu1 %vm1214_vm0, %v1213_v39 }
  0x32   : > { %800 = vmatprep.mubr.bf16.mxu0 %v944_v60 }
  0x33   : > { %1051 = vmatpush3.bf16.msra.mxu0 %v1166_v43 }
  0x34   : > { %1082 = vmatpush3.bf16.msra.mxu1 %v1167_v44  ;;  %1052 = vmatprep.subr.bf16.mxu0 %v1168_v45 }
  0x35   : > { %1083 = vmatprep.subr.bf16.mxu1 %v1213_v39 }
  0x37   : > { %1053 = vmatpush3.bf16.msra.mxu0 %v1169_v46 }
  0x38   : > { %1084 = vmatpush3.bf16.msra.mxu1 %v1170_v47  ;;  %1054 = vmatprep.subr.bf16.mxu0 %v1171_v48 }
  0x39   : > { %1085 = vmatprep.subr.bf16.mxu1 %v1213_v39 }
  0x3b   : > { %1055 = vmatpush3.bf16.msra.mxu0 %v1172_v49 }
  0x3c   : > { %1086 = vmatpush3.bf16.msra.mxu1 %v1173_v50  ;;  %1056 = vmatprep.subr.bf16.mxu0 %v1174_v51 }
  0x3d   : > { %1087 = vmatprep.subr.bf16.mxu1 %v1213_v39 }
  0x3f   : > { %1057 = vmatpush3.bf16.msra.mxu0 %v1175_v52 }
  0x40   : > { %1088 = vmatpush3.bf16.msra.mxu1 %v1176_v53  ;;  %1058 = vmatprep.subr.bf16.mxu0 %v1177_v54 }
  0x41   : > { %1089 = vmatprep.subr.bf16.mxu1 %v1213_v39 }
  0x43   : > { %1059 = vmatpush3.bf16.msra.mxu0 %v1178_v55 }
  0x44   : > { %1090 = vmatpush3.bf16.msra.mxu1 %v1179_v56  ;;  %1060 = vmatprep.subr.bf16.mxu0 %v1180_v57 }
  0x45   : > { %1091 = vmatprep.subr.bf16.mxu1 %v1213_v39 }
  0x47   : > { %1061 = vmatpush3.bf16.msra.mxu0 %v1181_v59 }
  0x48   : > { %1092 = vmatpush3.bf16.msra.mxu1 %v1182_v61  ;;  %1062 = vmatprep.subr.bf16.mxu0 %v1183_v62 }
  0x49   : > { %1093 = vmatprep.subr.bf16.mxu1 %v1213_v39 }
  0x4b   : > { %1063 = vmatpush3.bf16.msra.mxu0 %v1184_v63 }
  0x4c   : > { %1094 = vmatpush3.bf16.msra.mxu1 %v1185_v0 }
  0x4e   : > { %801 = vmatmul.mubr.bf16.vlgmr.msra.gmra.mxu0 %v943_v1 }
  0x4f   : > { %1096 = vmatmul.mubr.bf16.vlgmr.msra.gmra.mxu1 %v1188_v2 }
  0xee   : > { %v1020_v3 = vpop.f32.mrf.mxu0 }
  0xef   : > { %v1042_v4 = vpop.f32.mrf.mxu1 }
  0xf0   : > { %v1021_v5 = vpop.f32.mrf.mxu0 }
  0xf1   : > { %v1043_v6 = vpop.f32.mrf.mxu1  ;;  %v1022_v11 = vadd.f32 %v1021_v5, %v1020_v3 }
  0xf2   : > { %v1023_v7 = vpop.f32.mrf.mxu0  ;;  %v1044_v14 = vadd.f32 %v1043_v6, %v1042_v4 }
  0xf3   : > { %v1045_v8 = vpop.f32.mrf.mxu1  ;;  %v723_v13 = vadd.f32 %v1022_v11, %v938_v12 }
  0xf4   : > { %v1024_v9 = vpop.f32.mrf.mxu0 }
  0xf5   : > { %v1046_v10 = vpop.f32.mrf.mxu1  ;;  %v763_v18 = vadd.f32 %v1044_v14, %v723_v13 }
 0x10e   : > { %v1064_v15 = vpop.f32.mrf.mxu0 }
 0x10f   : > { %v842_v16 = vpop.f32.mrf.mxu1 }
 0x110   : > { %v1065_v17 = vpop.f32.mrf.mxu0 }
 0x111   : > { %v1066_v19 = vadd.f32 %v1065_v17, %v1064_v15  ;;  %v1097_v20 = vpop.f32.mrf.mxu1 }
 0x112   : > { %v1067_v21 = vpop.f32.mrf.mxu0 }
 0x113   : > { %v803_v22 = vadd.f32 %v1066_v19, %v763_v18  ;;  %v845_v23 = vpop.f32.mrf.mxu1 }
 0x114   : > { %v1068_v24 = vpop.f32.mrf.mxu0 }
 0x115   : > { %v843_v25 = vadd.f32 %v842_v16, %v803_v22  ;;  %v1098_v26 = vpop.f32.mrf.mxu1 }
 0x117   : > { %v848_v27 = vmax.f32 %v843_v25, 0.0 }
 0x119   : > { %v849_v28 = vpack.c.bf16 %v848_v27, %v848_v27 }
 0x11b   : > { %850 = vst [vmem:[%s202_s23] sm:$0xf] %v849_v28 }
 0x11c PF: > { %s13_s14 = sadd.s32 1, %s1211_s14   ;;  %s1457_s12 = smov %s1207_s13 }
 0x11d   : > { %p10_p5 = scmp.ge.s32.totalorder %s13_s14, 4   ;;  %s1458_s13 = smov %s1460_s15 }
 0x11f   :  { %12 = sbr.rel (!%p10_p5) target bundleno = 2 (0x2), region = 62 }

// kernel: vgg6_forward.11
= control target key start
LH: loop header
LB: loop body
LE: loop exit
PB: predicated region body
PF: predicated region fallthrough
CT: control target
= control target key end

     0   :  { %s2011_s12 = smov 0   ;;  %s2013_s13 = smov 0   ;;  %s2400_s0 = inlined_call_operand.vmem [shape: bf16[2,8,1792], index: 0, kind: input, shape index: {}]   ;;  %s2401_s1 = inlined_call_operand.vmem [shape: bf16[1792,128], index: 1, kind: input, shape index: {}]   ;;  %s2402_s2 = inlined_call_operand.vmem [shape: f32[1,128], index: 2, kind: input, shape index: {}]   ;;  %s2403_s3 = inlined_call_operand.vmem [shape: bf16[2,8,128], index: 3, kind: output, shape index: {}]  }
   0x1   :  { %s2015_s14 = smov 0  }
   0x2 LB: > { %s25_s15 = sadd.s32 1, %s1985_s13  ;;  %p1530_p0 = scmp.ge.s32.totalorder %s1989_s14, 1  ;;  %s1989_s14 = sphi %s2015_s14, %s13_s14   ;;  %s1985_s13 = sphi %s2013_s13, %s2405_s13   ;;  %s1981_s12 = sphi %s2011_s12, %s2404_s12  }
   0x3   : > { %p27_p1 = scmp.ge.s32.totalorder %s25_s15, 2  ;;  %p157_p2 = scmp.lt.s32.totalorder %s1989_s14, 3 }
   0x5   : > { %s2407_s15 = smov (%p27_p1, %s25_s15), 0  ;;  %p158_p3 = pnand %p1530_p0, %p157_p2 }
   0x6   : > { %p187_p4 = scmp.lt.s32.totalorder (!%p158_p3), %s1981_s12, 1 }
   0x7   : > { %161 = sbr.rel (%p158_p3) target bundleno = 345 (0x159), region = 32 }
   0xc   : > { %v1841_v0 = vld [vmem:[%s2401_s1 + $0x78] sm:$0xff]   ;;  %v1845_v4 = vld [vmem:[%s2401_s1 + $0x70] sm:$0xff]   ;;  %v1849_v8 = vld [vmem:[%s2401_s1 + $0x68] sm:$0xff]   ;;  %s2409_s12 = smov (!%p187_p4, %s1981_s12), 1 }
   0xd   : > { %v1842_v1 = vld [vmem:[%s2401_s1 + $0x38] sm:$0xff]   ;;  %1662 = vmatprep.subr.bf16.mxu0 %v1841_v0  ;;  %v1846_v5 = vld [vmem:[%s2401_s1 + $0x30] sm:$0xff]   ;;  %v1850_v9 = vld [vmem:[%s2401_s1 + $0x28] sm:$0xff]   ;;  %s1816_s20 = smul.u32 56, %s2409_s12  ;;  %s1532_s22 = sshll.u32 %s2409_s12, 2 }
   0xe   : > { %v1843_v2 = vld [vmem:[%s2401_s1 + $0xf8] sm:$0xff]   ;;  %1663 = vmatpush3.bf16.msra.mxu0 %v1842_v1  ;;  %v1847_v6 = vld [vmem:[%s2401_s1 + $0xf0] sm:$0xff]   ;;  %v1851_v10 = vld [vmem:[%s2401_s1 + $0xe8] sm:$0xff]   ;;  %s202_s25 = scalar_lea.vmem %s2403_s3, %s1532_s22 }
   0xf   : > { %v1844_v3 = vld [vmem:[%s2401_s1 + $0xb8] sm:$0xff]   ;;  %1684 = vmatprep.subr.bf16.mxu1 %v1843_v2  ;;  %1664 = vmatprep.subr.bf16.mxu0 %v1845_v4  ;;  %v1848_v7 = vld [vmem:[%s2401_s1 + $0xb0] sm:$0xff]   ;;  %v1852_v11 = vld [vmem:[%s2401_s1 + $0xa8] sm:$0xff]   ;;  %s2126_s4 = scalar_lea.vmem %s2400_s0, %s1816_s20 }
  0x10   : > { %1685 = vmatpush3.bf16.msra.mxu1 %v1844_v3  ;;  %v1853_v12 = vld [vmem:[%s2401_s1 + $0x60] sm:$0xff]   ;;  %v1857_v16 = vld [vmem:[%s2401_s1 + $0x58] sm:$0xff]   ;;  %v1861_v20 = vld [vmem:[%s2401_s1 + $0x50] sm:$0xff]  }
  0x11   : > { %1686 = vmatprep.subr.bf16.mxu1 %v1847_v6  ;;  %v1854_v13 = vld [vmem:[%s2401_s1 + $0x20] sm:$0xff]   ;;  %v1858_v17 = vld [vmem:[%s2401_s1 + $0x18] sm:$0xff]   ;;  %v1862_v21 = vld [vmem:[%s2401_s1 + $0x10] sm:$0xff]  }
  0x12   : > { %1665 = vmatpush3.bf16.msra.mxu0 %v1846_v5  ;;  %v1855_v14 = vld [vmem:[%s2401_s1 + $0xe0] sm:$0xff]   ;;  %v1859_v18 = vld [vmem:[%s2401_s1 + $0xd8] sm:$0xff]   ;;  %v1863_v22 = vld [vmem:[%s2401_s1 + $0xd0] sm:$0xff]  }
  0x13   : > { %1666 = vmatprep.subr.bf16.mxu0 %v1849_v8  ;;  %v1856_v15 = vld [vmem:[%s2401_s1 + $0xa0] sm:$0xff]   ;;  %v1860_v19 = vld [vmem:[%s2401_s1 + $0x98] sm:$0xff]   ;;  %v1864_v23 = vld [vmem:[%s2401_s1 + $0x90] sm:$0xff]  }
  0x14   : > { %1687 = vmatpush3.bf16.msra.mxu1 %v1848_v7  ;;  %v1865_v24 = vld [vmem:[%s2401_s1 + $0x48] sm:$0xff]   ;;  %v1869_v28 = vld [vmem:[%s2401_s1 + $0x40] sm:$0xff]   ;;  %v1875_v35 = vld [vmem:[%s2401_s1 + $0x178] sm:$0xff]  }
  0x15   : > { %1688 = vmatprep.subr.bf16.mxu1 %v1851_v10  ;;  %v1866_v25 = vld [vmem:[%s2401_s1 + $0x8] sm:$0xff]   ;;  %v1870_v29 = vld [vmem:[%s2401_s1] sm:$0xff]   ;;  %v1878_v39 = vld [vmem:[%s2401_s1 + $0x138] sm:$0xff]  }
  0x16   : > { %1667 = vmatpush3.bf16.msra.mxu0 %v1850_v9  ;;  %v1867_v26 = vld [vmem:[%s2401_s1 + $0xc8] sm:$0xff]   ;;  %v1871_v30 = vld [vmem:[%s2401_s1 + $0xc0] sm:$0xff]   ;;  %v1879_v40 = vld [vmem:[%s2401_s1 + $0x1f8] sm:$0xff]  }
  0x17   : > { %1668 = vmatprep.subr.bf16.mxu0 %v1853_v12  ;;  %v1868_v27 = vld [vmem:[%s2401_s1 + $0x88] sm:$0xff]   ;;  %v204_v31 = vld [vmem:[%s2126_s4] sm:$0xff]  ;;  %v1880_v41 = vld [vmem:[%s2401_s1 + $0x1b8] sm:$0xff]  }
  0x18   : > { %1689 = vmatpush3.bf16.msra.mxu1 %v1852_v11  ;;  %v1534_v32 = vcombine.low %v204_v31, %v204_v31  ;;  %v1535_v33 = vcombine.high %v204_v31, %v204_v31  ;;  %v1874_v34 = vld [vmem:[%s2401_s1 + $0x80] sm:$0xff]   ;;  %v205_v36 = vld [vmem:[%s2126_s4 + $0x8] sm:$0xff]  ;;  %v1881_v42 = vld [vmem:[%s2401_s1 + $0x170] sm:$0xff]  }
  0x19   : > { %1690 = vmatprep.subr.bf16.mxu1 %v1855_v14  ;;  %v1536_v37 = vcombine.low %v205_v36, %v205_v36  ;;  %v1537_v38 = vcombine.high %v205_v36, %v205_v36  ;;  %v1882_v43 = vld [vmem:[%s2401_s1 + $0x130] sm:$0xff]   ;;  %v1885_v46 = vld [vmem:[%s2401_s1 + $0x168] sm:$0xff]   ;;  %v1889_v50 = vld [vmem:[%s2401_s1 + $0x160] sm:$0xff]  }
  0x1a   : > { %1669 = vmatpush3.bf16.msra.mxu0 %v1854_v13  ;;  %1195 = vmatprep.mubr.bf16.mxu0 %v1535_v33  ;;  %v1883_v44 = vld [vmem:[%s2401_s1 + $0x1f0] sm:$0xff]   ;;  %v1886_v47 = vld [vmem:[%s2401_s1 + $0x128] sm:$0xff]   ;;  %v1890_v51 = vld [vmem:[%s2401_s1 + $0x120] sm:$0xff]  }
  0x1b   : > { %1670 = vmatprep.subr.bf16.mxu0 %v1857_v16  ;;  %1235 = vmatprep.mubr.bf16.mxu1 %v1537_v38  ;;  %v1884_v45 = vld [vmem:[%s2401_s1 + $0x1b0] sm:$0xff]   ;;  %v1887_v48 = vld [vmem:[%s2401_s1 + $0x1e8] sm:$0xff]   ;;  %v1891_v52 = vld [vmem:[%s2401_s1 + $0x1e0] sm:$0xff]  }
  0x1c   : > { %1691 = vmatpush3.bf16.msra.mxu1 %v1856_v15  ;;  %v1888_v49 = vld [vmem:[%s2401_s1 + $0x1a8] sm:$0xff]   ;;  %v1892_v53 = vld [vmem:[%s2401_s1 + $0x1a0] sm:$0xff]   ;;  %v1893_v54 = vld [vmem:[%s2401_s1 + $0x158] sm:$0xff]  }
  0x1d   : > { %1692 = vmatprep.subr.bf16.mxu1 %v1859_v18  ;;  %v1894_v55 = vld [vmem:[%s2401_s1 + $0x118] sm:$0xff]   ;;  %v1897_v58 = vld [vmem:[%s2401_s1 + $0x150] sm:$0xff]   ;;  %v1901_v62 = vld [vmem:[%s2401_s1 + $0x148] sm:$0xff]  }
  0x1e   : > { %1671 = vmatpush3.bf16.msra.mxu0 %v1858_v17  ;;  %v1895_v56 = vld [vmem:[%s2401_s1 + $0x1d8] sm:$0xff]   ;;  %v1898_v59 = vld [vmem:[%s2401_s1 + $0x110] sm:$0xff]   ;;  %v1902_v63 = vld [vmem:[%s2401_s1 + $0x108] sm:$0xff]  }
  0x1f   : > { %1672 = vmatprep.subr.bf16.mxu0 %v1861_v20  ;;  %v1896_v57 = vld [vmem:[%s2401_s1 + $0x198] sm:$0xff]   ;;  %v1899_v60 = vld [vmem:[%s2401_s1 + $0x1d0] sm:$0xff]   ;;  %v1903_v0 = vld [vmem:[%s2401_s1 + $0x1c8] sm:$0xff]  }
  0x20   : > { %1693 = vmatpush3.bf16.msra.mxu1 %v1860_v19  ;;  %v1900_v61 = vld [vmem:[%s2401_s1 + $0x190] sm:$0xff]   ;;  %v1904_v1 = vld [vmem:[%s2401_s1 + $0x188] sm:$0xff]   ;;  %v1905_v2 = vld [vmem:[%s2401_s1 + $0x140] sm:$0xff]  }
  0x21   : > { %1694 = vmatprep.subr.bf16.mxu1 %v1863_v22  ;;  %v1906_v3 = vld [vmem:[%s2401_s1 + $0x100] sm:$0xff]   ;;  %v206_v5 = vld [vmem:[%s2126_s4 + $0x10] sm:$0xff]  ;;  %v1911_v9 = vld [vmem:[%s2401_s1 + $0x278] sm:$0xff]  }
  0x22   : > { %1673 = vmatpush3.bf16.msra.mxu0 %v1862_v21  ;;  %v1907_v4 = vld [vmem:[%s2401_s1 + $0x1c0] sm:$0xff]   ;;  %v1538_v6 = vcombine.low %v206_v5, %v206_v5  ;;  %v1539_v7 = vcombine.high %v206_v5, %v206_v5  ;;  %v207_v10 = vld [vmem:[%s2126_s4 + $0x18] sm:$0xff]  ;;  %v1917_v16 = vld [vmem:[%s2401_s1 + $0x270] sm:$0xff]  }
  0x23   : > { %1674 = vmatprep.subr.bf16.mxu0 %v1865_v24  ;;  %v1910_v8 = vld [vmem:[%s2401_s1 + $0x180] sm:$0xff]   ;;  %v1540_v11 = vcombine.low %v207_v10, %v207_v10  ;;  %v1541_v12 = vcombine.high %v207_v10, %v207_v10  ;;  %v1914_v13 = vld [vmem:[%s2401_s1 + $0x238] sm:$0xff]   ;;  %v1918_v17 = vld [vmem:[%s2401_s1 + $0x230] sm:$0xff]  }
  0x24   : > { %1695 = vmatpush3.bf16.msra.mxu1 %v1864_v23  ;;  %v1915_v14 = vld [vmem:[%s2401_s1 + $0x2f8] sm:$0xff]   ;;  %v1919_v18 = vld [vmem:[%s2401_s1 + $0x2f0] sm:$0xff]   ;;  %v1921_v20 = vld [vmem:[%s2401_s1 + $0x268] sm:$0xff]  }
  0x25   : > { %1696 = vmatprep.subr.bf16.mxu1 %v1867_v26  ;;  %v1916_v15 = vld [vmem:[%s2401_s1 + $0x2b8] sm:$0xff]   ;;  %v1920_v19 = vld [vmem:[%s2401_s1 + $0x2b0] sm:$0xff]   ;;  %v1922_v21 = vld [vmem:[%s2401_s1 + $0x228] sm:$0xff]  }
  0x26   : > { %1675 = vmatpush3.bf16.msra.mxu0 %v1866_v25  ;;  %v1923_v22 = vld [vmem:[%s2401_s1 + $0x2e8] sm:$0xff]   ;;  %v1925_v24 = vld [vmem:[%s2401_s1 + $0x260] sm:$0xff]   ;;  %v1932_v31 = vld [vmem:[%s2401_s1 + $0x298] sm:$0xff]  }
  0x27   : > { %1676 = vmatprep.subr.bf16.mxu0 %v1869_v28  ;;  %v1924_v23 = vld [vmem:[%s2401_s1 + $0x2a8] sm:$0xff]   ;;  %v1926_v25 = vld [vmem:[%s2401_s1 + $0x220] sm:$0xff]   ;;  %v1929_v28 = vld [vmem:[%s2401_s1 + $0x258] sm:$0xff]  }
  0x28   : > { %1697 = vmatpush3.bf16.msra.mxu1 %v1868_v27  ;;  %v1927_v26 = vld [vmem:[%s2401_s1 + $0x2e0] sm:$0xff]   ;;  %v1934_v33 = vld [vmem:[%s2401_s1 + $0x210] sm:$0xff]   ;;  %v1937_v36 = vld [vmem:[%s2401_s1 + $0x248] sm:$0xff]  }
  0x29   : > { %1698 = vmatprep.subr.bf16.mxu1 %v1871_v30  ;;  %v1928_v27 = vld [vmem:[%s2401_s1 + $0x2a0] sm:$0xff]   ;;  %v1931_v30 = vld [vmem:[%s2401_s1 + $0x2d8] sm:$0xff]   ;;  %v1939_v38 = vld [vmem:[%s2401_s1 + $0x2c8] sm:$0xff]  }
  0x2a   : > { %1677 = vmatpush3.bf16.msra.mxu0 %v1870_v29  ;;  %v1930_v29 = vld [vmem:[%s2401_s1 + $0x218] sm:$0xff]  }
  0x2b   : > { %1706 = vmatprep.subr.bf16.mxu0 %v1875_v35  ;;  %v1936_v35 = vld [vmem:[%s2401_s1 + $0x290] sm:$0xff]  }
  0x2c   : > { %1699 = vmatpush3.bf16.msra.mxu1 %v1874_v34  ;;  %v1935_v34 = vld [vmem:[%s2401_s1 + $0x2d0] sm:$0xff]  }
  0x2d   : > { %1196 = vmatmul.mubr.bf16.vlgmr.msra.gmra.mxu0 %v1534_v32  ;;  %1728 = vmatprep.subr.bf16.mxu1 %v1879_v40  ;;  %v1933_v32 = vld [vmem:[%s2401_s1 + $0x250] sm:$0xff]   ;;  %v1941_v40 = vld [vmem:[%s2401_s1 + $0x240] sm:$0xff]  }
  0x2e   : > { %1707 = vmatpush3.bf16.msra.mxu0 %v1878_v39  ;;  %1275 = vmatprep.mubr.bf16.mxu0 %v1539_v7  ;;  %v1940_v39 = vld [vmem:[%s2401_s1 + $0x288] sm:$0xff]  }
  0x2f   : > { %1236 = vmatmul.mubr.bf16.vlgmr.msra.gmra.mxu1 %v1536_v37  ;;  %1708 = vmatprep.subr.bf16.mxu0 %v1881_v42  ;;  %v1938_v37 = vld [vmem:[%s2401_s1 + $0x208] sm:$0xff]   ;;  %v1943_v42 = vld [vmem:[%s2401_s1 + $0x2c0] sm:$0xff]  }
  0x30   : > { %1729 = vmatpush3.bf16.msra.mxu1 %v1880_v41  ;;  %1315 = vmatprep.mubr.bf16.mxu1 %v1541_v12  ;;  %v1942_v41 = vld [vmem:[%s2401_s1 + $0x200] sm:$0xff]  }
  0x31   : > { %1730 = vmatprep.subr.bf16.mxu1 %v1883_v44 }
  0x32   : > { %1709 = vmatpush3.bf16.msra.mxu0 %v1882_v43  ;;  %v208_v43 = vld [vmem:[%s2126_s4 + $0x20] sm:$0xff] }
  0x33   : > { %1710 = vmatprep.subr.bf16.mxu0 %v1885_v46  ;;  %v1542_v44 = vcombine.low %v208_v43, %v208_v43  ;;  %v1946_v46 = vld [vmem:[%s2401_s1 + $0x280] sm:$0xff]  }
  0x34   : > { %1731 = vmatpush3.bf16.msra.mxu1 %v1884_v45  ;;  %v1543_v45 = vcombine.high %v208_v43, %v208_v43 }
  0x35   : > { %1732 = vmatprep.subr.bf16.mxu1 %v1887_v48  ;;  %v209_v48 = vld [vmem:[%s2126_s4 + $0x28] sm:$0xff] }
  0x36   : > { %1711 = vmatpush3.bf16.msra.mxu0 %v1886_v47  ;;  %v1947_v47 = vld [vmem:[%s2401_s1 + $0x378] sm:$0xff]  }
  0x37   : > { %1712 = vmatprep.subr.bf16.mxu0 %v1889_v50  ;;  %v1545_v50 = vcombine.high %v209_v48, %v209_v48 }
  0x38   : > { %1733 = vmatpush3.bf16.msra.mxu1 %v1888_v49  ;;  %v1544_v49 = vcombine.low %v209_v48, %v209_v48 }
  0x39   : > { %1734 = vmatprep.subr.bf16.mxu1 %v1891_v52  ;;  %v1951_v52 = vld [vmem:[%s2401_s1 + $0x370] sm:$0xff]  }
  0x3a   : > { %1713 = vmatpush3.bf16.msra.mxu0 %v1890_v51  ;;  %v1950_v51 = vld [vmem:[%s2401_s1 + $0x338] sm:$0xff]  }
  0x3b   : > { %1714 = vmatprep.subr.bf16.mxu0 %v1893_v54  ;;  %v1953_v54 = vld [vmem:[%s2401_s1 + $0x368] sm:$0xff]  }
  0x3c   : > { %1735 = vmatpush3.bf16.msra.mxu1 %v1892_v53  ;;  %v1952_v53 = vld [vmem:[%s2401_s1 + $0x330] sm:$0xff]  }
  0x3d   : > { %1736 = vmatprep.subr.bf16.mxu1 %v1895_v56  ;;  %v1955_v56 = vld [vmem:[%s2401_s1 + $0x360] sm:$0xff]  }
  0x3e   : > { %1715 = vmatpush3.bf16.msra.mxu0 %v1894_v55  ;;  %v1954_v55 = vld [vmem:[%s2401_s1 + $0x328] sm:$0xff]  }
  0x3f   : > { %1716 = vmatprep.subr.bf16.mxu0 %v1897_v58  ;;  %v1957_v58 = vld [vmem:[%s2401_s1 + $0x358] sm:$0xff]  }
  0x40   : > { %1737 = vmatpush3.bf16.msra.mxu1 %v1896_v57  ;;  %v1956_v57 = vld [vmem:[%s2401_s1 + $0x320] sm:$0xff]  }
  0x41   : > { %1738 = vmatprep.subr.bf16.mxu1 %v1899_v60  ;;  %v1959_v60 = vld [vmem:[%s2401_s1 + $0x350] sm:$0xff]  }
  0x42   : > { %1717 = vmatpush3.bf16.msra.mxu0 %v1898_v59  ;;  %v1958_v59 = vld [vmem:[%s2401_s1 + $0x318] sm:$0xff]  }
  0x43   : > { %1718 = vmatprep.subr.bf16.mxu0 %v1901_v62 }
  0x44   : > { %1739 = vmatpush3.bf16.msra.mxu1 %v1900_v61  ;;  %v210_v61 = vld [vmem:[%s2126_s4 + $0x30] sm:$0xff] }
  0x45   : > { %1740 = vmatprep.subr.bf16.mxu1 %v1903_v0  ;;  %v1547_v62 = vcombine.high %v210_v61, %v210_v61  ;;  %v1961_v0 = vld [vmem:[%s2401_s1 + $0x348] sm:$0xff]  }
  0x46   : > { %1719 = vmatpush3.bf16.msra.mxu0 %v1902_v63  ;;  %v1960_v63 = vld [vmem:[%s2401_s1 + $0x310] sm:$0xff]  }
  0x47   : > { %1720 = vmatprep.subr.bf16.mxu0 %v1905_v2  ;;  %v1963_v2 = vld [vmem:[%s2401_s1 + $0x340] sm:$0xff]  }
  0x48   : > { %1741 = vmatpush3.bf16.msra.mxu1 %v1904_v1  ;;  %v1962_v1 = vld [vmem:[%s2401_s1 + $0x308] sm:$0xff]  }
  0x49   : > { %1742 = vmatprep.subr.bf16.mxu1 %v1907_v4  ;;  %v1546_v4 = vcombine.low %v210_v61, %v210_v61 }
  0x4a   : > { %1721 = vmatpush3.bf16.msra.mxu0 %v1906_v3  ;;  %v1964_v3 = vld [vmem:[%s2401_s1 + $0x300] sm:$0xff]  }
  0x4b   : > { %1750 = vmatprep.subr.bf16.mxu0 %v1911_v9 }
  0x4c   : > { %1743 = vmatpush3.bf16.msra.mxu1 %v1910_v8 }
  0x4d   : > { %1276 = vmatmul.mubr.bf16.vlgmr.msra.gmra.mxu0 %v1538_v6  ;;  %1772 = vmatprep.subr.bf16.mxu1 %v1915_v14  ;;  %v1533_v6 = vld [vmem:[%s2402_s2] ss:$0 sm:$0xff] }
  0x4e   : > { %1751 = vmatpush3.bf16.msra.mxu0 %v1914_v13  ;;  %1355 = vmatprep.mubr.bf16.mxu0 %v1543_v45 }
  0x4f   : > { %1316 = vmatmul.mubr.bf16.vlgmr.msra.gmra.mxu1 %v1540_v11  ;;  %1752 = vmatprep.subr.bf16.mxu0 %v1917_v16 }
  0x50   : > { %1773 = vmatpush3.bf16.msra.mxu1 %v1916_v15  ;;  %1395 = vmatprep.mubr.bf16.mxu1 %v1545_v50 }
  0x51   : > { %1774 = vmatprep.subr.bf16.mxu1 %v1919_v18 }
  0x52   : > { %1753 = vmatpush3.bf16.msra.mxu0 %v1918_v17 }
  0x53   : > { %1754 = vmatprep.subr.bf16.mxu0 %v1921_v20 }
  0x54   : > { %1775 = vmatpush3.bf16.msra.mxu1 %v1920_v19 }
  0x55   : > { %1776 = vmatprep.subr.bf16.mxu1 %v1923_v22 }
  0x56   : > { %1755 = vmatpush3.bf16.msra.mxu0 %v1922_v21 }
  0x57   : > { %1756 = vmatprep.subr.bf16.mxu0 %v1925_v24 }
  0x58   : > { %1777 = vmatpush3.bf16.msra.mxu1 %v1924_v23 }
  0x59   : > { %1778 = vmatprep.subr.bf16.mxu1 %v1927_v26 }
  0x5a   : > { %1757 = vmatpush3.bf16.msra.mxu0 %v1926_v25 }
  0x5b   : > { %1758 = vmatprep.subr.bf16.mxu0 %v1929_v28 }
  0x5c   : > { %1779 = vmatpush3.bf16.msra.mxu1 %v1928_v27 }
  0x5d   : > { %1780 = vmatprep.subr.bf16.mxu1 %v1931_v30 }
  0x5e   : > { %1759 = vmatpush3.bf16.msra.mxu0 %v1930_v29 }
  0x5f   : > { %1760 = vmatprep.subr.bf16.mxu0 %v1933_v32 }
  0x60   : > { %1781 = vmatpush3.bf16.msra.mxu1 %v1932_v31 }
  0x61   : > { %1782 = vmatprep.subr.bf16.mxu1 %v1935_v34 }
  0x62   : > { %1761 = vmatpush3.bf16.msra.mxu0 %v1934_v33 }
  0x63   : > { %1762 = vmatprep.subr.bf16.mxu0 %v1937_v36 }
  0x64   : > { %1783 = vmatpush3.bf16.msra.mxu1 %v1936_v35 }
  0x65   : > { %1784 = vmatprep.subr.bf16.mxu1 %v1939_v38 }
  0x66   : > { %1763 = vmatpush3.bf16.msra.mxu0 %v1938_v37 }
  0x67   : > { %1764 = vmatprep.subr.bf16.mxu0 %v1941_v40 }
  0x68   : > { %1785 = vmatpush3.bf16.msra.mxu1 %v1940_v39 }
  0x69   : > { %1786 = vmatprep.subr.bf16.mxu1 %v1943_v42 }
  0x6a   : > { %1765 = vmatpush3.bf16.msra.mxu0 %v1942_v41 }
  0x6b   : > { %1794 = vmatprep.subr.bf16.mxu0 %v1947_v47 }
  0x6c   : > { %1787 = vmatpush3.bf16.msra.mxu1 %v1946_v46 }
  0x6d   : > { %1356 = vmatmul.mubr.bf16.vlgmr.msra.gmra.mxu0 %v1542_v44 }
  0x6e   : > { %1795 = vmatpush3.bf16.msra.mxu0 %v1950_v51  ;;  %1435 = vmatprep.mubr.bf16.mxu0 %v1547_v62 }
  0x6f   : > { %1396 = vmatmul.mubr.bf16.vlgmr.msra.gmra.mxu1 %v1544_v49  ;;  %1796 = vmatprep.subr.bf16.mxu0 %v1951_v52 }
  0x72   : > { %1797 = vmatpush3.bf16.msra.mxu0 %v1952_v53 }
  0x73   : > { %1798 = vmatprep.subr.bf16.mxu0 %v1953_v54 }
  0x76   : > { %1799 = vmatpush3.bf16.msra.mxu0 %v1954_v55 }
  0x77   : > { %1800 = vmatprep.subr.bf16.mxu0 %v1955_v56 }
  0x7a   : > { %1801 = vmatpush3.bf16.msra.mxu0 %v1956_v57 }
  0x7b   : > { %1802 = vmatprep.subr.bf16.mxu0 %v1957_v58 }
  0x7e   : > { %1803 = vmatpush3.bf16.msra.mxu0 %v1958_v59 }
  0x7f   : > { %1804 = vmatprep.subr.bf16.mxu0 %v1959_v60 }
  0x82   : > { %1805 = vmatpush3.bf16.msra.mxu0 %v1960_v63 }
  0x83   : > { %1806 = vmatprep.subr.bf16.mxu0 %v1961_v0 }
  0x86   : > { %1807 = vmatpush3.bf16.msra.mxu0 %v1962_v1 }
  0x87   : > { %1808 = vmatprep.subr.bf16.mxu0 %v1963_v2 }
  0x8a   : > { %1809 = vmatpush3.bf16.msra.mxu0 %v1964_v3 }
  0x8d   : > { %1436 = vmatmul.mubr.bf16.vlgmr.msra.gmra.mxu0 %v1546_v4 }
  0xed   : > { %v1678_v5 = vpop.f32.mrf.mxu0 }
  0xef   : > { %v1679_v7 = vpop.f32.mrf.mxu0  ;;  %v1700_v8 = vpop.f32.mrf.mxu1 }
  0xf0   : > { %v1680_v9 = vadd.f32 %v1679_v7, %v1678_v5 }
  0xf1   : > { %v1681_v10 = vpop.f32.mrf.mxu0  ;;  %v1701_v11 = vpop.f32.mrf.mxu1 }
  0xf2   : > { %v1198_v12 = vadd.f32 %v1680_v9, %v1533_v6  ;;  %v1702_v13 = vadd.f32 %v1701_v11, %v1700_v8 }
  0xf3   : > { %v1682_v14 = vpop.f32.mrf.mxu0  ;;  %v1703_v15 = vpop.f32.mrf.mxu1 }
  0xf4   : > { %v1238_v16 = vadd.f32 %v1702_v13, %v1198_v12 }
  0xf5   : > { %v1704_v17 = vpop.f32.mrf.mxu1 }
 0x10d   : > { %v1722_v18 = vpop.f32.mrf.mxu0 }
 0x10f   : > { %v1723_v19 = vpop.f32.mrf.mxu0  ;;  %v1744_v20 = vpop.f32.mrf.mxu1 }
 0x110   : > { %v1724_v34 = vadd.f32 %v1723_v19, %v1722_v18 }
 0x111   : > { %v1725_v21 = vpop.f32.mrf.mxu0  ;;  %v1745_v22 = vpop.f32.mrf.mxu1 }
 0x112   : > { %v1278_v35 = vadd.f32 %v1724_v34, %v1238_v16  ;;  %v1746_v36 = vadd.f32 %v1745_v22, %v1744_v20 }
 0x113   : > { %v1726_v23 = vpop.f32.mrf.mxu0  ;;  %v1747_v24 = vpop.f32.mrf.mxu1 }
 0x114   : > { %v1318_v38 = vadd.f32 %v1746_v36, %v1278_v35 }
 0x115   : > { %v1748_v25 = vpop.f32.mrf.mxu1 }
 0x12d   : > { %v1766_v26 = vpop.f32.mrf.mxu0 }
 0x12f   : > { %v1767_v27 = vpop.f32.mrf.mxu0  ;;  %v1788_v28 = vpop.f32.mrf.mxu1 }
 0x130   : > { %v1768_v37 = vadd.f32 %v1767_v27, %v1766_v26 }
 0x131   : > { %v1769_v29 = vpop.f32.mrf.mxu0  ;;  %v1789_v30 = vpop.f32.mrf.mxu1 }
 0x132   : > { %v1358_v39 = vadd.f32 %v1768_v37, %v1318_v38  ;;  %v1790_v40 = vadd.f32 %v1789_v30, %v1788_v28 }
 0x133   : > { %v1770_v31 = vpop.f32.mrf.mxu0  ;;  %v1791_v32 = vpop.f32.mrf.mxu1 }
 0x134   : > { %v1398_v43 = vadd.f32 %v1790_v40, %v1358_v39 }
 0x135   : > { %v1792_v33 = vpop.f32.mrf.mxu1 }
 0x14d   : > { %v1810_v41 = vpop.f32.mrf.mxu0 }
 0x14f   : > { %v1811_v42 = vpop.f32.mrf.mxu0 }
 0x150   : > { %v1812_v44 = vadd.f32 %v1811_v42, %v1810_v41 }
 0x151   : > { %v1813_v45 = vpop.f32.mrf.mxu0 }
 0x152   : > { %v1438_v46 = vadd.f32 %v1812_v44, %v1398_v43 }
 0x153   : > { %v1814_v47 = vpop.f32.mrf.mxu0 }
 0x154   : > { %v1443_v48 = vmax.f32 %v1438_v46, 0.0 }
 0x156   : > { %v1444_v49 = vpack.c.bf16 %v1443_v48, %v1443_v48 }
 0x158   : > { %1445 = vst [vmem:[%s202_s25] sm:$0xf] %v1444_v49 }
 0x159 PF: > { %s13_s14 = sadd.s32 1, %s1989_s14   ;;  %s2404_s12 = smov %s1985_s13 }
 0x15a   : > { %p10_p5 = scmp.ge.s32.totalorder %s13_s14, 4   ;;  %s2405_s13 = smov %s2407_s15 }
 0x15c   :  { %12 = sbr.rel (!%p10_p5) target bundleno = 2 (0x2), region = 62 }

</bundles_post_ra>
